<compile_context>
chip_gen: v6e
topology: v6e:2x2x1
jax: 0.10.0
libtpu: 0.0.40
codegen_flags: <defaults>
</compile_context>

<pallas_src>
import functools

import jax
import jax.numpy as jnp
import numpy as np
from jax.experimental import pallas as pl
from jax.experimental.pallas import tpu as pltpu

_EPS = 1e-07
# Force exact fp32 MXU contractions (one-hot gather must not be bf16-demoted).
_F32_PRECISION = jax.lax.Precision.HIGHEST


# ------------------------------- Pallas kernel -------------------------------

def _pixel_triplet_kernel(img1_ref, img2_ref, idx_ref, o_ref, *, margin):
    """img1/img2: (D, HW) f32 VMEM.  idx: (3, N) i32 VMEM.  o: (1, 1) f32 SMEM."""
    img1 = img1_ref[...]                                  # (D, HW)
    img2 = img2_ref[...]                                  # (D, HW)
    idx = idx_ref[...]                                    # (3, N) int32

    d, hw = img1.shape
    n = idx.shape[1]

    # ---- fused pixel gather: one-hot selection matrices contracted on the MXU
    pix = jax.lax.broadcasted_iota(jnp.int32, (hw, n), 0)   # pix[p, j] = p

    def gather(img, sel_row):                               # sel_row: (1, N)
        onehot = (pix == sel_row).astype(jnp.float32)       # (HW, N)
        return jax.lax.dot_general(
            img, onehot, (((1,), (0,)), ((), ())),
            precision=_F32_PRECISION,
            preferred_element_type=jnp.float32)             # (D, N)

    f1 = gather(img1, idx[0:1, :])                          # anchors
    f2 = gather(img2, idx[1:2, :])                          # positives
    f2n = gather(img2, idx[2:3, :])                         # negatives

    # ---- positive distance: per-channel L2 over points, mean over channels
    dpos = f1 - f2
    pos_sq = jnp.sum(dpos * dpos, axis=-1, keepdims=True)   # (D, 1)
    pos = jnp.sum(jnp.sqrt(pos_sq + _EPS)) * (1.0 / d)      # scalar

    # ---- negative pairwise distances via the Gram identity (cross term on MXU)
    nt = (((1,), (1,)), ((), ()))                           # contract last dims
    gram = jax.lax.dot_general(
        f1, f2n, nt, precision=_F32_PRECISION,
        preferred_element_type=jnp.float32)                 # (D, D)
    f1_sq = jnp.sum(f1 * f1, axis=-1, keepdims=True)        # (D, 1)
    # Column norms as a lane-aligned (1, D) row without a (D,1)->(1,D)
    # transpose: contract a ones matrix against f2n^2 on the (idle) MXU.
    f2n_sq = jax.lax.dot_general(
        jnp.ones((d, n), jnp.float32), f2n * f2n, nt,
        precision=_F32_PRECISION,
        preferred_element_type=jnp.float32)[0:1, :]         # (1, D)
    neg_sq = jnp.maximum(f1_sq + f2n_sq - 2.0 * gram, 0.0)  # (D, D)
    neg = jnp.sqrt(neg_sq + _EPS)

    # ---- triplet hinge + mean (Python-constant scale; no vector divide)
    hinge = jnp.maximum(margin + pos - neg, 0.0)            # (D, D)
    o_ref[0, 0] = jnp.sum(hinge) * (1.0 / (d * d))


def _run_pixel_triplet_kernel(img1_flat, img2_flat, idx, *, margin):
    kernel = functools.partial(_pixel_triplet_kernel, margin=float(margin))
    out = pl.pallas_call(
        kernel,
        out_shape=jax.ShapeDtypeStruct((1, 1), jnp.float32),
        in_specs=[
            pl.BlockSpec(memory_space=pltpu.MemorySpace.VMEM),
            pl.BlockSpec(memory_space=pltpu.MemorySpace.VMEM),
            pl.BlockSpec(memory_space=pltpu.MemorySpace.VMEM),
        ],
        out_specs=pl.BlockSpec(memory_space=pltpu.MemorySpace.SMEM),
    )(img1_flat, img2_flat, idx)
    return out[0, 0]


# --------------------------------- JAX glue ----------------------------------

def _sample_points(key, height, width, num_pos_points, num_neg_points):
    # TODO(synk): cv2.Canny edge detection + Python random.sample has no
    # JAX/Pallas equivalent; replaced by uniform pixel-coordinate sampling.
    # Note: the torch module samples the negatives' first coordinate in
    # [0, width) although it indexes the H axis (and vice versa); here each
    # coordinate is sampled within the axis it actually indexes so it is
    # always in bounds (identical behaviour whenever H == W, as here).
    keys = jax.random.split(key, 6)
    r1 = jax.random.randint(keys[0], (num_pos_points,), 0, height, dtype=jnp.int32)
    c1 = jax.random.randint(keys[1], (num_pos_points,), 0, width, dtype=jnp.int32)
    r2 = jax.random.randint(keys[2], (num_pos_points,), 0, height, dtype=jnp.int32)
    c2 = jax.random.randint(keys[3], (num_pos_points,), 0, width, dtype=jnp.int32)
    rn = jax.random.randint(keys[4], (num_neg_points,), 0, height, dtype=jnp.int32)
    cn = jax.random.randint(keys[5], (num_neg_points,), 0, width, dtype=jnp.int32)
    return (r1, c1), (r2, c2), (rn, cn)


@functools.partial(
    jax.jit,
    static_argnames=("num_pos_points", "num_neg_points", "width", "height", "margin"))
def pixel_triplet_loss(img1, img1_out, img2, img2_out, key, *,
                       num_pos_points, num_neg_points, width, height, margin):
    """Pallas forward pass of PixelTripletLoss (B == 1). Hot path only."""
    del img1, img2  # only used by cv2.Canny edge detection in the original
    if num_pos_points != num_neg_points:
        raise ValueError("the torch broadcast in loss_non_matches requires "
                         "num_pos_points == num_neg_points")
    if img1_out.shape[0] != 1:
        raise ValueError("only B == 1 is supported (as in the torch broadcast)")
    b, d, h, w = img1_out.shape
    if (h, w) != (height, width):
        raise ValueError("configured (height, width) must match the feature map")

    (r1, c1), (r2, c2), (rn, cn) = _sample_points(
        key, height, width, num_pos_points, num_neg_points)

    # Flattened pixel indices for the in-kernel (fused) gather.
    idx = jnp.stack([r1 * w + c1, r2 * w + c2, rn * w + cn],
                    axis=0).astype(jnp.int32)                # (3, N)

    img1_flat = img1_out[0].astype(jnp.float32).reshape(d, h * w)
    img2_flat = img2_out[0].astype(jnp.float32).reshape(d, h * w)
    # NOTE: if many triplet sets are evaluated per step, stack them and add a
    # leading "parallel" grid axis instead of one pallas_call per triplet.
    return _run_pixel_triplet_kernel(img1_flat, img2_flat, idx, margin=margin)


def pixel_triplet_loss_reference(img1, img1_out, img2, img2_out, key, *,
                                 num_pos_points, num_neg_points,
                                 width, height, margin):
    """Pure-JAX/XLA mirror of the torch forward (B == 1).

    Validation only — kept OUT of the Pallas hot path (perf feedback)."""
    del img1, img2
    (r1, c1), (r2, c2), (rn, cn) = _sample_points(
        key, height, width, num_pos_points, num_neg_points)
    f1 = img1_out[:, :, r1, c1]                      # (1, D, N)
    f2 = img2_out[:, :, r2, c2]                      # (1, D, N)
    f2n = img2_out[:, :, rn[None, :], cn[None, :]]   # (1, D, 1, N)
    pos = jnp.sqrt(jnp.sum(jnp.abs(f1 - f2) ** 2, axis=-1) + _EPS).mean()
    neg = jnp.sqrt(jnp.sum(jnp.abs(f1 - f2n) ** 2, axis=-1) + _EPS)  # (1, D, D)
    return jnp.clip(margin + pos - neg, 0.0, None).mean()


# ----------------------------------- main -------------------------------------

if __name__ == "__main__":
    B, C_IMG, D, H, W = 1, 3, 8, 16, 16
    NUM_POS = 128           # lane-width friendly stand-in for the 500 in torch
    NUM_NEG = 128
    MARGINS = [25, 15, 10, 5, 2]
    MARGIN = MARGINS[0]     # margin_step == 0 right after __init__

    key = jax.random.PRNGKey(0)
    k_img1, k_img2, k_out1, k_out2, k_pts = jax.random.split(key, 5)

    img1 = jax.random.uniform(k_img1, (B, C_IMG, H, W), dtype=jnp.float32)
    img2 = jax.random.uniform(k_img2, (B, C_IMG, H, W), dtype=jnp.float32)
    img1_out = jax.random.normal(k_out1, (B, D, H, W), dtype=jnp.float32)
    img2_out = jax.random.normal(k_out2, (B, D, H, W), dtype=jnp.float32)

    loss = pixel_triplet_loss(
        img1, img1_out, img2, img2_out, k_pts,
        num_pos_points=NUM_POS, num_neg_points=NUM_NEG,
        width=W, height=H, margin=MARGIN)
    loss = jax.block_until_ready(loss)

    ref = jax.block_until_ready(pixel_triplet_loss_reference(
        img1, img1_out, img2, img2_out, k_pts,
        num_pos_points=NUM_POS, num_neg_points=NUM_NEG,
        width=W, height=H, margin=MARGIN))

    np.testing.assert_allclose(np.asarray(loss), np.asarray(ref),
                               rtol=1e-4, atol=1e-4)
    print("KERNEL_OK")
</pallas_src>

<mosaic_0001>
module attributes {stable_mosaic.version = 11 : i64} {
  func.func @_pixel_triplet_kernel(%arg0: memref<8x256xf32, #tpu.memory_space<vmem>>, %arg1: memref<8x256xf32, #tpu.memory_space<vmem>>, %arg2: memref<3x128xi32, #tpu.memory_space<vmem>>, %arg3: memref<1x1xf32, #tpu.memory_space<smem>>) attributes {dimension_semantics = [], scalar_prefetch = 0 : i64, scratch_operands = 0 : i64, tpu.core_type = #tpu.core_type<tc>} {
    %c0 = arith.constant 0 : index
    %c0_0 = arith.constant 0 : index
    %0 = vector.load %arg0[%c0, %c0_0] : memref<8x256xf32, #tpu.memory_space<vmem>>, vector<8x256xf32>
    %c0_1 = arith.constant 0 : index
    %c0_2 = arith.constant 0 : index
    %1 = vector.load %arg1[%c0_1, %c0_2] : memref<8x256xf32, #tpu.memory_space<vmem>>, vector<8x256xf32>
    %c0_3 = arith.constant 0 : index
    %c0_4 = arith.constant 0 : index
    %2 = vector.load %arg2[%c0_3, %c0_4] : memref<3x128xi32, #tpu.memory_space<vmem>>, vector<3x128xi32>
    %3 = tpu.iota {dimensions = array<i32: 0>} : vector<256x128xi32>
    %4 = vector.extract_strided_slice %2 {offsets = [0, 0], sizes = [1, 128], strides = [1, 1]} : vector<3x128xi32> to vector<1x128xi32>
    %5 = vector.broadcast %4 : vector<1x128xi32> to vector<256x128xi32>
    %6 = arith.cmpi eq, %3, %5 : vector<256x128xi32>
    %7 = arith.extui %6 : vector<256x128xi1> to vector<256x128xi32>
    %8 = arith.sitofp %7 : vector<256x128xi32> to vector<256x128xf32>
    %cst = arith.constant dense<0.000000e+00> : vector<8x128xf32>
    %9 = tpu.matmul %0, %8, %cst {dimension_numbers = #tpu.dot_dimension_numbers<[1], [0], [0], [1], [0, 0, 1, 1], [], []>, precision = #tpu.contract_precision<fp32>} : vector<8x256xf32>, vector<256x128xf32>, vector<8x128xf32> -> vector<8x128xf32>
    %10 = vector.extract_strided_slice %2 {offsets = [1, 0], sizes = [1, 128], strides = [1, 1]} : vector<3x128xi32> to vector<1x128xi32>
    %11 = vector.broadcast %10 : vector<1x128xi32> to vector<256x128xi32>
    %12 = arith.cmpi eq, %3, %11 : vector<256x128xi32>
    %13 = arith.extui %12 : vector<256x128xi1> to vector<256x128xi32>
    %14 = arith.sitofp %13 : vector<256x128xi32> to vector<256x128xf32>
    %cst_5 = arith.constant dense<0.000000e+00> : vector<8x128xf32>
    %15 = tpu.matmul %1, %14, %cst_5 {dimension_numbers = #tpu.dot_dimension_numbers<[1], [0], [0], [1], [0, 0, 1, 1], [], []>, precision = #tpu.contract_precision<fp32>} : vector<8x256xf32>, vector<256x128xf32>, vector<8x128xf32> -> vector<8x128xf32>
    %16 = vector.extract_strided_slice %2 {offsets = [2, 0], sizes = [1, 128], strides = [1, 1]} : vector<3x128xi32> to vector<1x128xi32>
    %17 = vector.broadcast %16 : vector<1x128xi32> to vector<256x128xi32>
    %18 = arith.cmpi eq, %3, %17 : vector<256x128xi32>
    %19 = arith.extui %18 : vector<256x128xi1> to vector<256x128xi32>
    %20 = arith.sitofp %19 : vector<256x128xi32> to vector<256x128xf32>
    %cst_6 = arith.constant dense<0.000000e+00> : vector<8x128xf32>
    %21 = tpu.matmul %1, %20, %cst_6 {dimension_numbers = #tpu.dot_dimension_numbers<[1], [0], [0], [1], [0, 0, 1, 1], [], []>, precision = #tpu.contract_precision<fp32>} : vector<8x256xf32>, vector<256x128xf32>, vector<8x128xf32> -> vector<8x128xf32>
    %22 = arith.subf %9, %15 : vector<8x128xf32>
    %23 = arith.mulf %22, %22 : vector<8x128xf32>
    %cst_7 = arith.constant dense<0.000000e+00> : vector<8xf32>
    %24 = vector.multi_reduction <add>, %23, %cst_7 [1] : vector<8x128xf32> to vector<8xf32>
    %25 = vector.shape_cast %24 : vector<8xf32> to vector<8x1xf32>
    %cst_8 = arith.constant 1.000000e-07 : f32
    %26 = vector.broadcast %cst_8 : f32 to vector<8x1xf32>
    %27 = arith.addf %25, %26 : vector<8x1xf32>
    %28 = math.sqrt %27 : vector<8x1xf32>
    %29 = vector.shape_cast %28 : vector<8x1xf32> to vector<1x8x1xf32>
    %cst_9 = arith.constant dense<0.000000e+00> : vector<1xf32>
    %30 = vector.multi_reduction <add>, %29, %cst_9 [1, 2] : vector<1x8x1xf32> to vector<1xf32>
    %31 = vector.shape_cast %30 : vector<1xf32> to vector<1x1x1xf32>
    %32 = vector.extract %31[0, 0, 0] : f32 from vector<1x1x1xf32>
    %cst_10 = arith.constant 1.250000e-01 : f32
    %33 = arith.mulf %32, %cst_10 : f32
    %cst_11 = arith.constant dense<0.000000e+00> : vector<8x8xf32>
    %34 = tpu.matmul %9, %21, %cst_11 {dimension_numbers = #tpu.dot_dimension_numbers<[1], [1], [0], [0], [0, 0, 1, 0], [], []>, precision = #tpu.contract_precision<fp32>} : vector<8x128xf32>, vector<8x128xf32>, vector<8x8xf32> -> vector<8x8xf32>
    %35 = arith.mulf %9, %9 : vector<8x128xf32>
    %cst_12 = arith.constant dense<0.000000e+00> : vector<8xf32>
    %36 = vector.multi_reduction <add>, %35, %cst_12 [1] : vector<8x128xf32> to vector<8xf32>
    %37 = vector.shape_cast %36 : vector<8xf32> to vector<8x1xf32>
    %cst_13 = arith.constant 1.000000e+00 : f32
    %38 = vector.broadcast %cst_13 : f32 to vector<8x128xf32>
    %39 = arith.mulf %21, %21 : vector<8x128xf32>
    %cst_14 = arith.constant dense<0.000000e+00> : vector<8x8xf32>
    %40 = tpu.matmul %38, %39, %cst_14 {dimension_numbers = #tpu.dot_dimension_numbers<[1], [1], [0], [0], [0, 0, 1, 0], [], []>, precision = #tpu.contract_precision<fp32>} : vector<8x128xf32>, vector<8x128xf32>, vector<8x8xf32> -> vector<8x8xf32>
    %41 = vector.extract_strided_slice %40 {offsets = [0, 0], sizes = [1, 8], strides = [1, 1]} : vector<8x8xf32> to vector<1x8xf32>
    %42 = vector.broadcast %37 : vector<8x1xf32> to vector<8x8xf32>
    %43 = vector.broadcast %41 : vector<1x8xf32> to vector<8x8xf32>
    %44 = arith.addf %42, %43 : vector<8x8xf32>
    %cst_15 = arith.constant 2.000000e+00 : f32
    %45 = vector.broadcast %cst_15 : f32 to vector<8x8xf32>
    %46 = arith.mulf %45, %34 : vector<8x8xf32>
    %47 = arith.subf %44, %46 : vector<8x8xf32>
    %cst_16 = arith.constant 0.000000e+00 : f32
    %48 = vector.broadcast %cst_16 : f32 to vector<8x8xf32>
    %49 = arith.maximumf %47, %48 : vector<8x8xf32>
    %cst_17 = arith.constant 1.000000e-07 : f32
    %50 = vector.broadcast %cst_17 : f32 to vector<8x8xf32>
    %51 = arith.addf %49, %50 : vector<8x8xf32>
    %52 = math.sqrt %51 : vector<8x8xf32>
    %cst_18 = arith.constant 2.500000e+01 : f32
    %53 = arith.addf %cst_18, %33 : f32
    %54 = vector.broadcast %53 : f32 to vector<8x8xf32>
    %55 = arith.subf %54, %52 : vector<8x8xf32>
    %cst_19 = arith.constant 0.000000e+00 : f32
    %56 = vector.broadcast %cst_19 : f32 to vector<8x8xf32>
    %57 = arith.maximumf %55, %56 : vector<8x8xf32>
    %58 = vector.shape_cast %57 : vector<8x8xf32> to vector<1x8x8xf32>
    %cst_20 = arith.constant dense<0.000000e+00> : vector<1xf32>
    %59 = vector.multi_reduction <add>, %58, %cst_20 [1, 2] : vector<1x8x8xf32> to vector<1xf32>
    %60 = vector.shape_cast %59 : vector<1xf32> to vector<1x1x1xf32>
    %61 = vector.extract %60[0, 0, 0] : f32 from vector<1x1x1xf32>
    %cst_21 = arith.constant 1.562500e-02 : f32
    %62 = arith.mulf %61, %cst_21 : f32
    %c0_22 = arith.constant 0 : index
    %c0_23 = arith.constant 0 : index
    %63 = memref.load %arg3[%c0_22, %c0_23] : memref<1x1xf32, #tpu.memory_space<smem>>
    memref.store %62, %arg3[%c0_22, %c0_23] : memref<1x1xf32, #tpu.memory_space<smem>>
    return
  }
}

</mosaic_0001>

<bundles_post_ra>
// kernel: squeeze.35
= control target key start
LH: loop header
LB: loop body
LE: loop exit
PB: predicated region body
PF: predicated region fallthrough
CT: control target
= control target key end

     0   :  { %vm35_vm0 = vcmask 1043458   ;;  %vm40_vm1 = vcmask 1045508   ;;  %vm45_vm2 = vcmask 1047558   ;;  %s75_s6 = smov 3  ;;  %s78_s7 = smov 12  ;;  %vm4_vm3 = vcmask 1047556   ;;  %s738_s0 = inlined_call_operand.vmem [shape: f32[1,8,16,16], index: 0, kind: input, shape index: {}]   ;;  %s739_s1 = inlined_call_operand.vmem [shape: f32[8,256], index: 1, kind: output, shape index: {}]  }
   0x1   :  { %v362_v0 = vld [vmem:[%s738_s0 + $0x6] ss:$16 sm:%s75_s6]   ;;  %s83_s12 = smov 48  ;;  %s88_s13 = smov 192  ;;  %vm6_vm4 = vcmask 130048   ;;  %vm49_vm5 = vcmask 1048448  }
   0x2   :  { %v363_v1 = vld [vmem:[%s738_s0 + $0x6] ss:$16 sm:%s78_s7]   ;;  %s30_s18 = smov 3  ;;  %s33_s21 = smov 12  ;;  %vm94_vm6 = vcmask 917248   ;;  %vm139_vm7 = vcmask 786048  }
   0x3   :  { %v81_v2 = vsel %vm35_vm0, %v363_v1, %v362_v0  ;;  %v364_v3 = vld [vmem:[%s738_s0 + $0x6] ss:$16 sm:%s83_s12]   ;;  %v353_v6 = vld [vmem:[%s738_s0 + $0x7] ss:$16 sm:%s30_s18]   ;;  %s38_s22 = smov 48  ;;  %s43_s27 = smov 192 }
   0x4   :  { %v365_v4 = vld [vmem:[%s738_s0 + $0x6] ss:$16 sm:%s88_s13]   ;;  %v86_v5 = vsel %vm40_vm1, %v364_v3, %v81_v2  ;;  %v354_v8 = vld [vmem:[%s738_s0 + $0x7] ss:$16 sm:%s33_s21]   ;;  %s423_s28 = smov 96   ;;  %s97_s2 = smov 3 }
   0x5   :  { %v91_v7 = vsel %vm45_vm2, %v365_v4, %v86_v5  ;;  %v355_v9 = vld [vmem:[%s738_s0 + $0x7] ss:$16 sm:%s38_s22]   ;;  %v36_v10 = vsel %vm35_vm0, %v354_v8, %v353_v6  ;;  %s100_s3 = smov 12  ;;  %v366_v13 = vld [vmem:[%s738_s0 + $0xe] ss:$16 sm:%s97_s2]   ;;  %s105_s8 = smov 48 }
   0x6   :  { %92 = vrot.lane.b32.xlu1 %v91_v7, %s423_s28  ;;  %v356_v11 = vld [vmem:[%s738_s0 + $0x7] ss:$16 sm:%s43_s27]   ;;  %v41_v12 = vsel %vm40_vm1, %v355_v9, %v36_v10  ;;  %s110_s9 = smov 192  ;;  %s52_s14 = smov 3  ;;  %vm184_vm8 = vcmask 654848   ;;  %vm229_vm9 = vcmask 523648  }
   0x7   :  { %v367_v14 = vld [vmem:[%s738_s0 + $0xe] ss:$16 sm:%s100_s3]   ;;  %v46_v15 = vsel %vm45_vm2, %v356_v11, %v41_v12  ;;  %s55_s15 = smov 12  ;;  %s424_s16 = smov 112   ;;  %v357_v20 = vld [vmem:[%s738_s0 + $0xf] ss:$16 sm:%s52_s14]  }
   0x8   :  { %v103_v16 = vsel %vm35_vm0, %v367_v14, %v366_v13  ;;  %v368_v17 = vld [vmem:[%s738_s0 + $0xe] ss:$16 sm:%s105_s8]   ;;  %47 = vrot.lane.b32.xlu0 %v46_v15, %s424_s16  ;;  %s60_s19 = smov 48  ;;  %s65_s20 = smov 192  ;;  %vm274_vm10 = vcmask 392448   ;;  %vm319_vm11 = vcmask 261248  }
   0x9   :  { %v369_v18 = vld [vmem:[%s738_s0 + $0xe] ss:$16 sm:%s110_s9]   ;;  %v108_v19 = vsel %vm40_vm1, %v368_v17, %v103_v16  ;;  %v358_v22 = vld [vmem:[%s738_s0 + $0xf] ss:$16 sm:%s55_s15]   ;;  %s142_s25 = smov 3  ;;  %s150_s29 = smov 48 }
   0xa   :  { %v113_v21 = vsel %vm45_vm2, %v369_v18, %v108_v19  ;;  %v359_v23 = vld [vmem:[%s738_s0 + $0xf] ss:$16 sm:%s60_s19]   ;;  %v58_v24 = vsel %vm35_vm0, %v358_v22, %v357_v20  ;;  %v375_v27 = vld [vmem:[%s738_s0 + $0xd] ss:$16 sm:%s142_s25]   ;;  %s155_s5 = smov 192  ;;  %s120_s6 = smov 3 }
   0xb   :  { %114 = vrot.lane.b32.xlu1 %v113_v21, %s423_s28  ;;  %v360_v25 = vld [vmem:[%s738_s0 + $0xf] ss:$16 sm:%s65_s20]   ;;  %s145_s28 = smov 12  ;;  %v63_v26 = vsel %vm40_vm1, %v359_v23, %v58_v24  ;;  %s123_s11 = smov 12 }
   0xc   :  { %v376_v28 = vld [vmem:[%s738_s0 + $0xd] ss:$16 sm:%s145_s28]   ;;  %v68_v29 = vsel %vm45_vm2, %v360_v25, %v63_v26  ;;  %s128_s12 = smov 48  ;;  %v371_v34 = vld [vmem:[%s738_s0 + $0x5] ss:$16 sm:%s120_s6]   ;;  %s133_s15 = smov 192 }
   0xd   :  { %v148_v30 = vsel %vm35_vm0, %v376_v28, %v375_v27  ;;  %v377_v31 = vld [vmem:[%s738_s0 + $0xd] ss:$16 sm:%s150_s29]   ;;  %69 = vrot.lane.b32.xlu0 %v68_v29, %s424_s16  ;;  %s187_s20 = smov 3  ;;  %s190_s21 = smov 12 }
   0xe   :  { %v378_v32 = vld [vmem:[%s738_s0 + $0xd] ss:$16 sm:%s155_s5]   ;;  %v153_v33 = vsel %vm40_vm1, %v377_v31, %v148_v30  ;;  %v372_v36 = vld [vmem:[%s738_s0 + $0x5] ss:$16 sm:%s123_s11]   ;;  %s425_s22 = smov 80   ;;  %s195_s25 = smov 48 }
   0xf   :  { %v158_v35 = vsel %vm45_vm2, %v378_v32, %v153_v33  ;;  %v373_v37 = vld [vmem:[%s738_s0 + $0x5] ss:$16 sm:%s128_s12]   ;;  %v126_v38 = vsel %vm35_vm0, %v372_v36, %v371_v34  ;;  %s200_s26 = smov 192  ;;  %v384_v41 = vld [vmem:[%s738_s0 + $0xc] ss:$16 sm:%s187_s20]   ;;  %s165_s2 = smov 3 }
  0x10   :  { %159 = vrot.lane.b32.xlu1 %v158_v35, %s425_s22  ;;  %v374_v39 = vld [vmem:[%s738_s0 + $0x5] ss:$16 sm:%s133_s15]   ;;  %v131_v40 = vsel %vm40_vm1, %v373_v37, %v126_v38  ;;  %s168_s3 = smov 12  ;;  %s173_s8 = smov 48 }
  0x11   :  { %v385_v42 = vld [vmem:[%s738_s0 + $0xc] ss:$16 sm:%s190_s21]   ;;  %v136_v43 = vsel %vm45_vm2, %v374_v39, %v131_v40  ;;  %s178_s9 = smov 192  ;;  %v380_v48 = vld [vmem:[%s738_s0 + $0x4] ss:$16 sm:%s165_s2]   ;;  %s232_s12 = smov 3 }
  0x12   :  { %v193_v44 = vsel %vm35_vm0, %v385_v42, %v384_v41  ;;  %v386_v45 = vld [vmem:[%s738_s0 + $0xc] ss:$16 sm:%s195_s25]   ;;  %137 = vrot.lane.b32.xlu0 %v136_v43, %s425_s22  ;;  %s235_s17 = smov 12  ;;  %s240_s18 = smov 48 }
  0x13   :  { %v387_v46 = vld [vmem:[%s738_s0 + $0xc] ss:$16 sm:%s200_s26]   ;;  %v198_v47 = vsel %vm40_vm1, %v386_v45, %v193_v44  ;;  %v381_v50 = vld [vmem:[%s738_s0 + $0x4] ss:$16 sm:%s168_s3]   ;;  %s426_s19 = smov 64   ;;  %s245_s22 = smov 192 }
  0x14   :  { %v203_v49 = vsel %vm45_vm2, %v387_v46, %v198_v47  ;;  %v382_v51 = vld [vmem:[%s738_s0 + $0x4] ss:$16 sm:%s173_s8]   ;;  %v171_v52 = vsel %vm35_vm0, %v381_v50, %v380_v48  ;;  %s210_s23 = smov 3  ;;  %v393_v55 = vld [vmem:[%s738_s0 + $0xb] ss:$16 sm:%s232_s12]   ;;  %s213_s28 = smov 12 }
  0x15   :  { %204 = vrot.lane.b32.xlu1 %v203_v49, %s426_s19  ;;  %v383_v53 = vld [vmem:[%s738_s0 + $0x4] ss:$16 sm:%s178_s9]   ;;  %v176_v54 = vsel %vm40_vm1, %v382_v51, %v171_v52  ;;  %s218_s29 = smov 48  ;;  %s223_s5 = smov 192 }
  0x16   :  { %v394_v56 = vld [vmem:[%s738_s0 + $0xb] ss:$16 sm:%s235_s17]   ;;  %v181_v57 = vsel %vm45_vm2, %v383_v53, %v176_v54  ;;  %v389_v62 = vld [vmem:[%s738_s0 + $0x3] ss:$16 sm:%s210_s23]   ;;  %s277_s8 = smov 3  ;;  %s280_s9 = smov 12 }
  0x17   :  { %v238_v58 = vsel %vm35_vm0, %v394_v56, %v393_v55  ;;  %v395_v59 = vld [vmem:[%s738_s0 + $0xb] ss:$16 sm:%s240_s18]   ;;  %182 = vrot.lane.b32.xlu0 %v181_v57, %s426_s19  ;;  %s285_s14 = smov 48  ;;  %s290_s15 = smov 192 }
  0x18   :  { %v396_v60 = vld [vmem:[%s738_s0 + $0xb] ss:$16 sm:%s245_s22]   ;;  %v243_v61 = vsel %vm40_vm1, %v395_v59, %v238_v58  ;;  %v390_v0 = vld [vmem:[%s738_s0 + $0x3] ss:$16 sm:%s213_s28]   ;;  %s427_s16 = smov 48   ;;  %s255_s19 = smov 3 }
  0x19   :  { %v248_v63 = vsel %vm45_vm2, %v396_v60, %v243_v61  ;;  %v391_v1 = vld [vmem:[%s738_s0 + $0x3] ss:$16 sm:%s218_s29]   ;;  %v216_v2 = vsel %vm35_vm0, %v390_v0, %v389_v62  ;;  %v402_v5 = vld [vmem:[%s738_s0 + $0xa] ss:$16 sm:%s277_s8]   ;;  %s258_s24 = smov 12  ;;  %s263_s25 = smov 48 }
  0x1a   :  { %249 = vrot.lane.b32.xlu1 %v248_v63, %s427_s16  ;;  %v392_v3 = vld [vmem:[%s738_s0 + $0x3] ss:$16 sm:%s223_s5]   ;;  %v221_v4 = vsel %vm40_vm1, %v391_v1, %v216_v2  ;;  %s268_s30 = smov 192  ;;  %s322_s4 = smov 3 }
  0x1b   :  { %v403_v6 = vld [vmem:[%s738_s0 + $0xa] ss:$16 sm:%s280_s9]   ;;  %v226_v7 = vsel %vm45_vm2, %v392_v3, %v221_v4  ;;  %v398_v12 = vld [vmem:[%s738_s0 + $0x2] ss:$16 sm:%s255_s19]   ;;  %s325_s5 = smov 12  ;;  %s330_s10 = smov 48 }
  0x1c   :  { %v283_v8 = vsel %vm35_vm0, %v403_v6, %v402_v5  ;;  %v404_v9 = vld [vmem:[%s738_s0 + $0xa] ss:$16 sm:%s285_s14]   ;;  %227 = vrot.lane.b32.xlu0 %v226_v7, %s427_s16  ;;  %s335_s11 = smov 192  ;;  %s428_s12 = smov 32  }
  0x1d   :  { %v405_v10 = vld [vmem:[%s738_s0 + $0xa] ss:$16 sm:%s290_s15]   ;;  %v288_v11 = vsel %vm40_vm1, %v404_v9, %v283_v8  ;;  %v399_v14 = vld [vmem:[%s738_s0 + $0x2] ss:$16 sm:%s258_s24]   ;;  %s300_s15 = smov 3  ;;  %s303_s20 = smov 12 }
  0x1e   :  { %v293_v13 = vsel %vm45_vm2, %v405_v10, %v288_v11  ;;  %v400_v15 = vld [vmem:[%s738_s0 + $0x2] ss:$16 sm:%s263_s25]   ;;  %v261_v16 = vsel %vm35_vm0, %v399_v14, %v398_v12  ;;  %v411_v19 = vld [vmem:[%s738_s0 + $0x9] ss:$16 sm:%s322_s4]   ;;  %s308_s21 = smov 48  ;;  %s313_s26 = smov 192 }
  0x1f   :  { %294 = vrot.lane.b32.xlu1 %v293_v13, %s428_s12  ;;  %v401_v17 = vld [vmem:[%s738_s0 + $0x2] ss:$16 sm:%s268_s30]   ;;  %v266_v18 = vsel %vm40_vm1, %v400_v15, %v261_v16  ;;  %v2_v27 = vld [vmem:[%s738_s0] ss:$8 sm:$0xf]   ;;  %s429_s6 = smov 16  }
  0x20   :  { %v412_v20 = vld [vmem:[%s738_s0 + $0x9] ss:$16 sm:%s325_s5]   ;;  %v271_v21 = vsel %vm45_vm2, %v401_v17, %v266_v18  ;;  %v407_v26 = vld [vmem:[%s738_s0 + $0x1] ss:$16 sm:%s300_s15]  }
  0x21   :  { %v328_v22 = vsel %vm35_vm0, %v412_v20, %v411_v19  ;;  %v413_v23 = vld [vmem:[%s738_s0 + $0x9] ss:$16 sm:%s330_s10]   ;;  %272 = vrot.lane.b32.xlu0 %v271_v21, %s428_s12  ;;  %v3_v33 = vld [vmem:[%s738_s0] ss:$8 sm:$0xf0]  }
  0x22   :  { %v414_v24 = vld [vmem:[%s738_s0 + $0x9] ss:$16 sm:%s335_s11]   ;;  %v333_v25 = vsel %vm40_vm1, %v413_v23, %v328_v22  ;;  %v408_v29 = vld [vmem:[%s738_s0 + $0x1] ss:$16 sm:%s303_s20]   ;;  %v5_v35 = vsel %vm4_vm3, %v3_v33, %v2_v27 }
  0x23   :  { %v338_v28 = vsel %vm45_vm2, %v414_v24, %v333_v25  ;;  %v409_v30 = vld [vmem:[%s738_s0 + $0x1] ss:$16 sm:%s308_s21]   ;;  %v306_v31 = vsel %vm35_vm0, %v408_v29, %v407_v26  ;;  %v347_v36 = vld [vmem:[%s738_s0 + $0x40] ss:$8 sm:$0xf]  }
  0x24   :  { %339 = vrot.lane.b32.xlu1 %v338_v28, %s429_s6  ;;  %v410_v32 = vld [vmem:[%s738_s0 + $0x1] ss:$16 sm:%s313_s26]   ;;  %v311_v34 = vsel %vm40_vm1, %v409_v30, %v306_v31  ;;  %v348_v37 = vld [vmem:[%s738_s0 + $0x40] ss:$8 sm:$0xf0]  }
  0x25   :  { %v316_v38 = vsel %vm45_vm2, %v410_v32, %v311_v34  ;;  %7 = vst.msk [vmem:[%s739_s1] ss:$8 sm:$0x3] %vm6_vm4, %v5_v35   ;;  %344 = vst.msk [vmem:[%s739_s1 - $0xf] ss:$8 sm:$0xc] %vm6_vm4, %v5_v35   ;;  %v19_v39 = vsel %vm4_vm3, %v348_v37, %v347_v36 }
  0x26   :  { %345 = vst.msk [vmem:[%s739_s1 - $0x1e] ss:$8 sm:$0x30] %vm6_vm4, %v5_v35   ;;  %346 = vst.msk [vmem:[%s739_s1 - $0x2d] ss:$8 sm:$0xc0] %vm6_vm4, %v5_v35   ;;  %317 = vrot.lane.b32.xlu0 %v316_v38, %s429_s6 }
  0x27   :  { %349 = vst.msk [vmem:[%s739_s1 + $0x4] ss:$8 sm:$0x3] %vm6_vm4, %v19_v39   ;;  %350 = vst.msk [vmem:[%s739_s1 - $0xb] ss:$8 sm:$0xc] %vm6_vm4, %v19_v39  }
  0x28   :  { %351 = vst.msk [vmem:[%s739_s1 - $0x1a] ss:$8 sm:$0x30] %vm6_vm4, %v19_v39   ;;  %352 = vst.msk [vmem:[%s739_s1 - $0x29] ss:$8 sm:$0xc0] %vm6_vm4, %v19_v39  }
  0x78   :  { %v93_v40 = vpop.permute.xlu1 %92  }
  0x7a   :  { %v48_v41 = vpop.permute.xlu0 %47  }
  0x7b   :  { %50 = vst.msk [vmem:[%s739_s1] sm:$0xff] %vm49_vm5, %v48_v41  }
  0x7c   :  { %95 = vst.msk [vmem:[%s739_s1] sm:$0xff] %vm94_vm6, %v93_v40  }
  0x7d   :  { %v115_v42 = vpop.permute.xlu1 %114  }
  0x7f   :  { %v70_v43 = vpop.permute.xlu0 %69  }
  0x80   :  { %361 = vst.msk [vmem:[%s739_s1 + $0x8] sm:$0xff] %vm49_vm5, %v70_v43  }
  0x81   :  { %370 = vst.msk [vmem:[%s739_s1 + $0x8] sm:$0xff] %vm94_vm6, %v115_v42  }
  0x82   :  { %v160_v44 = vpop.permute.xlu1 %159  }
  0x83   :  { %379 = vst.msk [vmem:[%s739_s1 + $0x8] sm:$0xff] %vm139_vm7, %v160_v44  }
  0x84   :  { %v138_v45 = vpop.permute.xlu0 %137  }
  0x85   :  { %140 = vst.msk [vmem:[%s739_s1] sm:$0xff] %vm139_vm7, %v138_v45  }
  0x87   :  { %v205_v46 = vpop.permute.xlu1 %204  }
  0x88   :  { %388 = vst.msk [vmem:[%s739_s1 + $0x8] sm:$0xff] %vm184_vm8, %v205_v46  }
  0x89   :  { %v183_v47 = vpop.permute.xlu0 %182  }
  0x8a   :  { %185 = vst.msk [vmem:[%s739_s1] sm:$0xff] %vm184_vm8, %v183_v47  }
  0x8c   :  { %v250_v48 = vpop.permute.xlu1 %249  }
  0x8d   :  { %397 = vst.msk [vmem:[%s739_s1 + $0x8] sm:$0xff] %vm229_vm9, %v250_v48  }
  0x8e   :  { %v228_v49 = vpop.permute.xlu0 %227  }
  0x8f   :  { %230 = vst.msk [vmem:[%s739_s1] sm:$0xff] %vm229_vm9, %v228_v49  }
  0x91   :  { %v295_v50 = vpop.permute.xlu1 %294  }
  0x92   :  { %406 = vst.msk [vmem:[%s739_s1 + $0x8] sm:$0xff] %vm274_vm10, %v295_v50  }
  0x93   :  { %v273_v51 = vpop.permute.xlu0 %272  }
  0x94   :  { %275 = vst.msk [vmem:[%s739_s1] sm:$0xff] %vm274_vm10, %v273_v51  }
  0x96   :  { %v340_v52 = vpop.permute.xlu1 %339  }
  0x97   :  { %415 = vst.msk [vmem:[%s739_s1 + $0x8] sm:$0xff] %vm319_vm11, %v340_v52  }
  0x98   :  { %v318_v53 = vpop.permute.xlu0 %317  }
  0x99   :  { %320 = vst.msk [vmem:[%s739_s1] sm:$0xff] %vm319_vm11, %v318_v53  }

// kernel: pixel_triplet_loss.1
= control target key start
LH: loop header
LB: loop body
LE: loop exit
PB: predicated region body
PF: predicated region fallthrough
CT: control target
= control target key end

     0   :  { %v20_v0 = vlaneseq  ;;  %s8017_s0 = inlined_call_operand.vmem [shape: f32[8,256], index: 0, kind: input, shape index: {}]   ;;  %s8018_s1 = inlined_call_operand.vmem [shape: f32[8,256], index: 1, kind: input, shape index: {}]   ;;  %s8019_s2 = inlined_call_operand.vmem [shape: s32[3,128], index: 2, kind: input, shape index: {}]   ;;  %s8020_s3 = inlined_call_operand.hbm [shape: f32[1,1], index: 3, kind: output, shape index: {}]  }
   0x1   :  { %v16_v1 = vld [vmem:[%s8017_s0 + $0x8] sm:$0xff]  ;;  %v15_v2 = vld [vmem:[%s8017_s0] sm:$0xff] }
   0x2   :  { %v5044_v3 = vand.u32 4294901760, %v16_v1  ;;  %v5046_v4 = vand.u32 4294901760, %v15_v2 }
   0x4   :  { %8268 = vst [vmem:[#allocation5_spill] sm:$0xff] %v5044_v3  ;;  %8269 = vst [vmem:[#allocation6_spill] sm:$0xff] %v5046_v4 }
   0x5   :  { %8 = vsyncpa [#allocation3], 0  ;;  %v5048_v5 = vshrl.u32 %v20_v0, 7  ;;  %v5053_v6 = vld [vmem:[%s8019_s2] sm:$0x7]  ;;  %v5056_v7 = vsub.f32 %v16_v1, %v5044_v3  ;;  %v5059_v8 = vsub.f32 %v15_v2, %v5046_v4  ;;  %490 = vmatprep.mubr.f32.mxu1 %v5044_v3  ;;  %v8051_v25 = vmov 1.0  }
   0x6   :  { %8271 = vst [vmem:[#allocation8_spill] sm:$0xff] %v5053_v6  ;;  %v8048_v26 = vmov 0.0   ;;  %s5017_s26 = smov [#allocation2]  }
   0x7   :  { %8270 = vst [vmem:[#allocation7_spill] sm:$0xff] %v5048_v5  ;;  %8272 = vst [vmem:[#allocation9_spill] sm:$0xff] %v5056_v7  ;;  %v5063_v9 = vadd.s32 248, %v5048_v5  ;;  %v8025_v10 = vsub.s32 0, %v5048_v5  ;;  %v5067_v11 = vadd.s32 120, %v5048_v5  ;;  %v5070_v12 = vadd.s32 240, %v5048_v5 }
   0x8   :  { %8273 = vst [vmem:[#allocation10_spill] sm:$0xff] %v5059_v8  ;;  %v5073_v13 = vadd.s32 112, %v5048_v5  ;;  %v5076_v14 = vadd.s32 232, %v5048_v5  ;;  %v5079_v15 = vadd.s32 104, %v5048_v5  ;;  %v5082_v16 = vadd.s32 224, %v5048_v5 }
   0x9   :  { %8274 = vst [vmem:[#allocation11_spill] sm:$0xff] %v5063_v9  ;;  %8275 = vst [vmem:[#allocation12_spill] sm:$0xff] %v5067_v11  ;;  %v5087_v17 = vrot.slane %v5053_v6, %v8025_v10  ;;  %v5090_v18 = vadd.s32 96, %v5048_v5  ;;  %v5093_v19 = vadd.s32 216, %v5048_v5  ;;  %v5096_v20 = vadd.s32 88, %v5048_v5 }
   0xa   :  { %8276 = vst [vmem:[#allocation13_spill] sm:$0xff] %v5070_v12  ;;  %8277 = vst [vmem:[#allocation14_spill] sm:$0xff] %v5073_v13  ;;  %v5099_v21 = vadd.s32 208, %v5048_v5  ;;  %v5102_v22 = vadd.s32 80, %v5048_v5  ;;  %v5105_v23 = vadd.s32 200, %v5048_v5  ;;  %v5108_v24 = vadd.s32 72, %v5048_v5 }
   0xb   :  { %8278 = vst [vmem:[#allocation15_spill] sm:$0xff] %v5076_v14  ;;  %8279 = vst [vmem:[#allocation16_spill] sm:$0xff] %v5079_v15  ;;  %vm88_vm0 = vcmp.eq.s32.totalorder %v5063_v9, %v5087_v17  ;;  %vm72_vm1 = vcmp.eq.s32.totalorder %v5067_v11, %v5087_v17  ;;  %vm87_vm2 = vcmp.eq.s32.totalorder %v5070_v12, %v5087_v17 }
   0xc   :  { %8280 = vst [vmem:[#allocation17_spill] sm:$0xff] %v5082_v16  ;;  %8281 = vst [vmem:[#allocation18_spill] sm:$0xff] %v5090_v18  ;;  %vm71_vm3 = vcmp.eq.s32.totalorder %v5073_v13, %v5087_v17  ;;  %4277 = vmatprep.subr.msk.mxu0 %vm88_vm0, %v8051_v25  ;;  %v3923_v27 = vsel %vm87_vm2, 1.0, %v8048_v26  ;;  %vm86_vm4 = vcmp.eq.s32.totalorder %v5076_v14, %v5087_v17  ;;  %v3924_v43 = vsel %vm88_vm0, 1.0, %v8048_v26 }
   0xd   :  { %8282 = vst [vmem:[#allocation19_spill] sm:$0xff] %v5093_v19  ;;  %8283 = vst [vmem:[#allocation20_spill] sm:$0xff] %v5096_v20  ;;  %v3907_v28 = vsel %vm71_vm3, 1.0, %v8048_v26  ;;  %vm70_vm5 = vcmp.eq.s32.totalorder %v5079_v15, %v5087_v17  ;;  %4278 = vmatpush3.msk.msra.mxu0 %vm72_vm1, %v8051_v25  ;;  %v5138_v29 = vsub.f32 %v3923_v27, %v3923_v27  ;;  %v3922_v31 = vsel %vm86_vm4, 1.0, %v8048_v26 }
   0xe   :  { %8284 = vst [vmem:[#allocation21_spill] sm:$0xff] %v5099_v21  ;;  %8285 = vst [vmem:[#allocation22_spill] sm:$0xff] %v5102_v22  ;;  %v5140_v30 = vsub.f32 %v3907_v28, %v3907_v28  ;;  %v3906_v32 = vsel %vm70_vm5, 1.0, %v8048_v26  ;;  %4279 = vmatprep.subr.msk.mxu0 %vm87_vm2, %v8051_v25  ;;  %v5154_v33 = vsub.f32 %v3922_v31, %v3922_v31  ;;  %v3908_v46 = vsel %vm72_vm1, 1.0, %v8048_v26 }
   0xf   :  { %8286 = vst [vmem:[#allocation23_spill] sm:$0xff] %v5105_v23  ;;  %v5156_v34 = vsub.f32 %v3906_v32, %v3906_v32  ;;  %vm85_vm6 = vcmp.eq.s32.totalorder %v5082_v16, %v5087_v17  ;;  %vm69_vm7 = vcmp.eq.s32.totalorder %v5090_v18, %v5087_v17  ;;  %4280 = vmatpush3.msk.msra.mxu0 %vm71_vm3, %v8051_v25  ;;  %v8036_v50 = vand.u32 4294901760, %v5138_v29 }
  0x10   :  { %v3921_v35 = vsel %vm85_vm6, 1.0, %v8048_v26  ;;  %v3905_v36 = vsel %vm69_vm7, 1.0, %v8048_v26  ;;  %vm84_vm8 = vcmp.eq.s32.totalorder %v5093_v19, %v5087_v17  ;;  %vm68_vm9 = vcmp.eq.s32.totalorder %v5096_v20, %v5087_v17  ;;  %4281 = vmatprep.subr.msk.mxu0 %vm86_vm4, %v8051_v25 }
  0x11   :  { %v5182_v37 = vsub.f32 %v3921_v35, %v3921_v35  ;;  %v5184_v38 = vsub.f32 %v3905_v36, %v3905_v36  ;;  %v3920_v39 = vsel %vm84_vm8, 1.0, %v8048_v26  ;;  %v3904_v40 = vsel %vm68_vm9, 1.0, %v8048_v26  ;;  %4282 = vmatpush3.msk.msra.mxu0 %vm70_vm5, %v8051_v25 }
  0x12   :  { %v5198_v41 = vsub.f32 %v3920_v39, %v3920_v39  ;;  %v5200_v42 = vsub.f32 %v3904_v40, %v3904_v40  ;;  %vm8111_vm10 = vcmp.eq.s32.totalorder %v5099_v21, %v5087_v17  ;;  %4283 = vmatprep.subr.msk.mxu0 %vm85_vm6, %v8051_v25  ;;  %v5212_v44 = vsub.f32 %v3924_v43, %v3924_v43 }
  0x13   :  { %v3919_v45 = vsel %vm8111_vm10, 1.0, %v8048_v26  ;;  %vm8112_vm11 = vcmp.eq.s32.totalorder %v5102_v22, %v5087_v17  ;;  %4284 = vmatpush3.msk.msra.mxu0 %vm69_vm7, %v8051_v25  ;;  %v5230_v48 = vsub.f32 %v3908_v46, %v3908_v46  ;;  %vm8113_vm12 = vcmp.eq.s32.totalorder %v5105_v23, %v5087_v17 }
  0x14   :  { %8287 = vst [vmem:[#allocation24_spill] sm:$0xff] %v5212_v44  ;;  %v5228_v47 = vsub.f32 %v3919_v45, %v3919_v45  ;;  %v3903_v49 = vsel %vm8112_vm11, 1.0, %v8048_v26  ;;  %4285 = vmatprep.subr.msk.mxu0 %vm84_vm8, %v8051_v25  ;;  %v8041_v51 = vand.u32 4294901760, %v5212_v44  ;;  %v8034_v53 = vand.u32 4294901760, %v5140_v30 }
  0x15   :  { %v5242_v52 = vsub.f32 %v3903_v49, %v3903_v49  ;;  %4286 = vmatpush3.msk.msra.mxu0 %vm68_vm9, %v8051_v25  ;;  %v8040_v54 = vand.u32 4294901760, %v5230_v48  ;;  %v388_v55 = vsub.f32 %v5138_v29, %v8036_v50  ;;  %v3918_v56 = vsel %vm8113_vm12, 1.0, %v8048_v26 }
  0x16   :  { %vm8024_vm13 = vcmp.eq.s32.totalorder %v5108_v24, %v5087_v17  ;;  %v381_v57 = vsub.f32 %v5212_v44, %v8041_v51  ;;  %4287 = vmatprep.subr.msk.mxu0 %vm8111_vm10, %v8051_v25  ;;  %v5268_v58 = vsub.f32 %v3918_v56, %v3918_v56  ;;  %v276_v59 = vsub.f32 %v5140_v30, %v8034_v53 }
  0x17   :  { %v3902_v60 = vsel %vm8024_vm13, 1.0, %v8048_v26  ;;  %v269_v61 = vsub.f32 %v5230_v48, %v8040_v54  ;;  %4288 = vmatpush3.msk.msra.mxu0 %vm8112_vm11, %v8051_v25  ;;  %v389_v62 = vand.u32 4294901760, %v388_v55  ;;  %v8033_v0 = vand.u32 4294901760, %v5154_v33 }
  0x18   :  { %v5284_v63 = vsub.f32 %v3902_v60, %v3902_v60  ;;  %v382_v1 = vand.u32 4294901760, %v381_v57  ;;  %4289 = vmatprep.subr.msk.mxu0 %vm8113_vm12, %v8051_v25  ;;  %v277_v2 = vand.u32 4294901760, %v276_v59  ;;  %v5292_v27 = vadd.s32 192, %v5048_v5 }
  0x19   :  { %v8032_v28 = vand.u32 4294901760, %v5156_v34  ;;  %v270_v31 = vand.u32 4294901760, %v269_v61  ;;  %4290 = vmatpush3.msk.msra.mxu0 %vm8024_vm13, %v8051_v25  ;;  %v395_v32 = vsub.f32 %v5154_v33, %v8033_v0  ;;  %v5303_v35 = vadd.s32 64, %v5048_v5 }
  0x1a   :  { %8288 = vst [vmem:[#allocation25_spill] sm:$0xff] %v5292_v27  ;;  %v8028_v36 = vand.u32 4294901760, %v5182_v37  ;;  %4312 = vmatprep.subr.mxu1 %v382_v1  ;;  %vm8021_vm14 = vcmp.eq.s32.totalorder %v5292_v27, %v5087_v17  ;;  %v5312_v40 = vadd.s32 184, %v5048_v5  ;;  %v8027_v43 = vand.u32 4294901760, %v5184_v38 }
  0x1b   :  { %8289 = vst [vmem:[#allocation26_spill] sm:$0xff] %v5303_v35  ;;  %v283_v39 = vsub.f32 %v5156_v34, %v8032_v28  ;;  %4313 = vmatpush3.msra.mxu1 %v270_v31  ;;  %v396_v45 = vand.u32 4294901760, %v395_v32  ;;  %v3917_v46 = vsel %vm8021_vm14, 1.0, %v8048_v26  ;;  %4291 = vmatprep.subr.msk.mxu0 %vm8021_vm14, %v8051_v25  ;;  %vm8023_vm15 = vcmp.eq.s32.totalorder %v5303_v35, %v5087_v17 }
  0x1c   :  { %8290 = vst [vmem:[#allocation27_spill] sm:$0xff] %v5312_v40  ;;  %v402_v49 = vsub.f32 %v5182_v37, %v8028_v36  ;;  %4314 = vmatprep.subr.mxu1 %v389_v62  ;;  %v5328_v55 = vsub.f32 %v3917_v46, %v3917_v46  ;;  %v3901_v57 = vsel %vm8023_vm15, 1.0, %v8048_v26  ;;  %4292 = vmatpush3.msk.msra.mxu0 %vm8023_vm15, %v8051_v25  ;;  %v8026_v31 = vand.u32 4294901760, %v5198_v41 }
  0x1d   :  { %v284_v56 = vand.u32 4294901760, %v283_v39  ;;  %vm8022_vm14 = vcmp.eq.s32.totalorder %v5312_v40, %v5087_v17  ;;  %4315 = vmatpush3.msra.mxu1 %v277_v2  ;;  %v5340_v59 = vsub.f32 %v3901_v57, %v3901_v57  ;;  %v290_v62 = vsub.f32 %v5184_v38, %v8027_v43 }
  0x1e   :  { %v403_v60 = vand.u32 4294901760, %v402_v49  ;;  %v3916_v61 = vsel %vm8022_vm14, 1.0, %v8048_v26  ;;  %4293 = vmatprep.subr.msk.mxu0 %vm8022_vm14, %v8051_v25  ;;  %4316 = vmatprep.subr.mxu1 %v396_v45  ;;  %v5356_v2 = vadd.s32 56, %v5048_v5  ;;  %v5360_v32 = vadd.s32 176, %v5048_v5 }
  0x1f   :  { %v5353_v1 = vsub.f32 %v3916_v61, %v3916_v61  ;;  %4317 = vmatpush3.msra.mxu1 %v284_v56  ;;  %v291_v39 = vand.u32 4294901760, %v290_v62  ;;  %v8031_v46 = vand.u32 4294901760, %v5200_v42  ;;  %v5364_v49 = vadd.s32 48, %v5048_v5 }
  0x20   :  { %8291 = vst [vmem:[#allocation28_spill] sm:$0xff] %v5356_v2  ;;  %8292 = vst [vmem:[#allocation29_spill] sm:$0xff] %v5360_v32  ;;  %v8030_v57 = vand.u32 4294901760, %v5228_v47  ;;  %4318 = vmatprep.subr.mxu1 %v403_v60  ;;  %vm8055_vm14 = vcmp.eq.s32.totalorder %v5356_v2, %v5087_v17  ;;  %v409_v45 = vsub.f32 %v5198_v41, %v8026_v31  ;;  %v5375_v56 = vadd.s32 168, %v5048_v5 }
  0x21   :  { %8293 = vst [vmem:[#allocation30_spill] sm:$0xff] %v5364_v49  ;;  %vm8029_vm15 = vcmp.eq.s32.totalorder %v5360_v32, %v5087_v17  ;;  %4319 = vmatpush3.msra.mxu1 %v291_v39  ;;  %v3900_v61 = vsel %vm8055_vm14, 1.0, %v8048_v26  ;;  %4294 = vmatpush3.msk.msra.mxu0 %vm8055_vm14, %v8051_v25  ;;  %v297_v62 = vsub.f32 %v5200_v42, %v8031_v46  ;;  %v5433_v28 = vadd.s32 160, %v5048_v5 }
  0x22   :  { %8294 = vst [vmem:[#allocation31_spill] sm:$0xff] %v5375_v56  ;;  %v3915_v60 = vsel %vm8029_vm15, 1.0, %v8048_v26  ;;  %vm8037_vm13 = vcmp.eq.s32.totalorder %v5364_v49, %v5087_v17  ;;  %v5394_v39 = vsub.f32 %v3900_v61, %v3900_v61  ;;  %v410_v10 = vand.u32 4294901760, %v409_v45  ;;  %4295 = vmatprep.subr.msk.mxu0 %vm8029_vm15, %v8051_v25 }
  0x23   :  { %v5400_v31 = vsub.f32 %v3915_v60, %v3915_v60  ;;  %v3899_v43 = vsel %vm8037_vm13, 1.0, %v8048_v26  ;;  %v298_v36 = vand.u32 4294901760, %v297_v62  ;;  %4296 = vmatpush3.msk.msra.mxu0 %vm8037_vm13, %v8051_v25  ;;  %v416_v45 = vsub.f32 %v5228_v47, %v8030_v57  ;;  %8296 = vst [vmem:[#allocation33_spill] sm:$0xff] %v5433_v28 }
  0x24   :  { %v5410_v61 = vsub.f32 %v3899_v43, %v3899_v43  ;;  %vm8035_vm15 = vcmp.eq.s32.totalorder %v5375_v56, %v5087_v17  ;;  %4320 = vmatprep.subr.mxu1 %v410_v10  ;;  %v8039_v43 = vand.u32 4294901760, %v5242_v52  ;;  %v5427_v62 = vadd.s32 40, %v5048_v5 }
  0x25   :  { %v3914_v60 = vsel %vm8035_vm15, 1.0, %v8048_v26  ;;  %4297 = vmatprep.subr.msk.mxu0 %vm8035_vm15, %v8051_v25  ;;  %v8038_v57 = vand.u32 4294901760, %v5268_v58  ;;  %4321 = vmatpush3.msra.mxu1 %v298_v36  ;;  %v417_v46 = vand.u32 4294901760, %v416_v45  ;;  %v8047_v0 = vand.u32 4294901760, %v5284_v63 }
  0x26   :  { %8295 = vst [vmem:[#allocation32_spill] sm:$0xff] %v5427_v62  ;;  %v5430_v10 = vsub.f32 %v3914_v60, %v3914_v60  ;;  %v304_v53 = vsub.f32 %v5242_v52, %v8039_v43  ;;  %vm8045_vm15 = vcmp.eq.s32.totalorder %v5427_v62, %v5087_v17  ;;  %v5445_v36 = vadd.s32 32, %v5048_v5 }
  0x27   :  { %v423_v50 = vsub.f32 %v5268_v58, %v8038_v57  ;;  %4322 = vmatprep.subr.mxu1 %v417_v46  ;;  %v3898_v45 = vsel %vm8045_vm15, 1.0, %v8048_v26  ;;  %4298 = vmatpush3.msk.msra.mxu0 %vm8045_vm15, %v8051_v25  ;;  %vm8053_vm13 = vcmp.eq.s32.totalorder %v5433_v28, %v5087_v17  ;;  %v311_v60 = vsub.f32 %v5284_v63, %v8047_v0 }
  0x28   :  { %8297 = vst [vmem:[#allocation34_spill] sm:$0xff] %v5445_v36  ;;  %v8046_v57 = vand.u32 4294901760, %v5328_v55  ;;  %v305_v46 = vand.u32 4294901760, %v304_v53  ;;  %v5461_v43 = vsub.f32 %v3898_v45, %v3898_v45  ;;  %v3913_v51 = vsel %vm8053_vm13, 1.0, %v8048_v26  ;;  %4299 = vmatprep.subr.msk.mxu0 %vm8053_vm13, %v8051_v25 }
  0x29   :  { %v424_v54 = vand.u32 4294901760, %v423_v50  ;;  %v5471_v3 = vsub.f32 %v3913_v51, %v3913_v51  ;;  %v312_v6 = vand.u32 4294901760, %v311_v60  ;;  %vm8050_vm15 = vcmp.eq.s32.totalorder %v5445_v36, %v5087_v17 }
  0x2a   :  { %v430_v50 = vsub.f32 %v5328_v55, %v8046_v57  ;;  %4323 = vmatpush3.msra.mxu1 %v305_v46  ;;  %v3897_v53 = vsel %vm8050_vm15, 1.0, %v8048_v26  ;;  %4300 = vmatpush3.msk.msra.mxu0 %vm8050_vm15, %v8051_v25  ;;  %v5487_v51 = vadd.s32 152, %v5048_v5  ;;  %v8054_v45 = vand.u32 4294901760, %v5340_v59 }
  0x2b   :  { %v5491_v60 = vadd.s32 24, %v5048_v5  ;;  %4324 = vmatprep.subr.mxu1 %v424_v54  ;;  %v5493_v46 = vsub.f32 %v3897_v53, %v3897_v53  ;;  %v5497_v26 = vadd.s32 144, %v5048_v5  ;;  %v8302_v0 = vmov 1.0  }
  0x2c   :  { %8298 = vst [vmem:[#allocation35_spill] sm:$0xff] %v5487_v51  ;;  %v431_v57 = vand.u32 4294901760, %v430_v50  ;;  %4325 = vmatpush3.msra.mxu1 %v312_v6  ;;  %vm76_vm15 = vcmp.eq.s32.totalorder %v5487_v51, %v5087_v17  ;;  %v318_v25 = vsub.f32 %v5340_v59, %v8054_v45  ;;  %v8301_v50 = vmov 0.0  }
  0x2d   :  { %8299 = vst [vmem:[#allocation36_spill] sm:$0xff] %v5491_v60  ;;  %8300 = vst [vmem:[#allocation37_spill] sm:$0xff] %v5497_v26  ;;  %vm8073_vm13 = vcmp.eq.s32.totalorder %v5491_v60, %v5087_v17  ;;  %v3912_v53 = vsel %vm76_vm15, 1.0, %v8301_v50  ;;  %4301 = vmatprep.subr.msk.mxu0 %vm76_vm15, %v8302_v0  ;;  %v8303_v45 = vand.u32 4294901760, %v5353_v1  ;;  %vm8070_vm14 = vcmp.eq.s32.totalorder %v5497_v26, %v5087_v17 }
  0x2e   :  { %4326 = vmatprep.subr.mxu1 %v431_v57  ;;  %v3896_v6 = vsel %vm8073_vm13, 1.0, %v8301_v50  ;;  %v5524_v57 = vsub.f32 %v3912_v53, %v3912_v53  ;;  %v319_v36 = vand.u32 4294901760, %v318_v25  ;;  %4302 = vmatpush3.msk.msra.mxu0 %vm8073_vm13, %v8302_v0  ;;  %v3911_v28 = vsel %vm8070_vm14, 1.0, %v8301_v50 }
  0x2f   :  { %v437_v54 = vsub.f32 %v5353_v1, %v8303_v45  ;;  %v5530_v51 = vsub.f32 %v3896_v6, %v3896_v6  ;;  %4303 = vmatprep.subr.msk.mxu0 %vm8070_vm14, %v8302_v0  ;;  %v5540_v45 = vsub.f32 %v3911_v28, %v3911_v28  ;;  %v8304_v25 = vand.u32 4294901760, %v5394_v39 }
  0x30   :  { %v5546_v6 = vadd.s32 16, %v5048_v5  ;;  %4327 = vmatpush3.msra.mxu1 %v319_v36  ;;  %v8077_v60 = vand.u32 4294901760, %v5400_v31  ;;  %v5550_v56 = vadd.s32 136, %v5048_v5  ;;  %v5554_v26 = vadd.s32 8, %v5048_v5 }
  0x31   :  { %v438_v62 = vand.u32 4294901760, %v437_v54  ;;  %v325_v53 = vsub.f32 %v5394_v39, %v8304_v25  ;;  %v8078_v54 = vand.u32 4294901760, %v5410_v61  ;;  %v5560_v49 = vadd.s32 128, %v5048_v5 }
  0x32   :  { %8305 = vst [vmem:[#allocation38_spill] sm:$0xff] %v5546_v6  ;;  %8306 = vst [vmem:[#allocation39_spill] sm:$0xff] %v5550_v56  ;;  %vm8076_vm14 = vcmp.eq.s32.totalorder %v5546_v6, %v5087_v17  ;;  %vm8087_vm13 = vcmp.eq.s32.totalorder %v5550_v56, %v5087_v17 }
  0x33   :  { %8307 = vst [vmem:[#allocation40_spill] sm:$0xff] %v5554_v26  ;;  %4328 = vmatprep.subr.mxu1 %v438_v62  ;;  %v326_v28 = vand.u32 4294901760, %v325_v53  ;;  %8308 = vst [vmem:[#allocation41_spill] sm:$0xff] %v5560_v49  ;;  %v3895_v36 = vsel %vm8076_vm14, 1.0, %v8301_v50  ;;  %4304 = vmatpush3.msk.msra.mxu0 %vm8076_vm14, %v8302_v0  ;;  %v444_v62 = vsub.f32 %v5400_v31, %v8077_v60  ;;  %v3910_v6 = vsel %vm8087_vm13, 1.0, %v8301_v50 }
  0x34   :  { %v332_v53 = vsub.f32 %v5410_v61, %v8078_v54  ;;  %v5578_v25 = vsub.f32 %v3895_v36, %v3895_v36  ;;  %4305 = vmatprep.subr.msk.mxu0 %vm8087_vm13, %v8302_v0  ;;  %vm8088_vm14 = vcmp.eq.s32.totalorder %v5554_v26, %v5087_v17  ;;  %v8309_v60 = vand.u32 4294901760, %v5430_v10 }
  0x35   :  { %4329 = vmatpush3.msra.mxu1 %v326_v28  ;;  %v445_v28 = vand.u32 4294901760, %v444_v62  ;;  %v5593_v36 = vsub.f32 %v3910_v6, %v3910_v6  ;;  %v3894_v2 = vsel %vm8088_vm14, 1.0, %v8301_v50  ;;  %4306 = vmatpush3.msk.msra.mxu0 %vm8088_vm14, %v8302_v0  ;;  %vm73_vm13 = vcmp.eq.s32.totalorder %v5560_v49, %v5087_v17 }
  0x36   :  { %v451_v54 = vsub.f32 %v5430_v10, %v8309_v60  ;;  %v333_v32 = vand.u32 4294901760, %v332_v53  ;;  %v5603_v56 = vsub.f32 %v3894_v2, %v3894_v2  ;;  %v8089_v60 = vand.u32 4294901760, %v5461_v43  ;;  %4307 = vmatprep.subr.msk.mxu0 %vm73_vm13, %v8302_v0 }
  0x37   :  { %4330 = vmatprep.subr.mxu1 %v445_v28  ;;  %v3909_v6 = vsel %vm73_vm13, 1.0, %v8301_v50  ;;  %vm57_vm14 = vcmp.eq.s32.totalorder %v5048_v5, %v5087_v17  ;;  %v8102_v2 = vand.u32 4294901760, %v5493_v46 }
  0x38   :  { %v452_v40 = vand.u32 4294901760, %v451_v54  ;;  %4331 = vmatpush3.msra.mxu1 %v333_v32  ;;  %v5620_v62 = vsub.f32 %v3909_v6, %v3909_v6  ;;  %v339_v53 = vsub.f32 %v5461_v43, %v8089_v60  ;;  %v3893_v28 = vsel %vm57_vm14, 1.0, %v8301_v50  ;;  %4308 = vmatpush3.msk.msra.mxu0 %vm57_vm14, %v8302_v0 }
  0x39   :  { %v5634_v32 = vsub.f32 %v3893_v28, %v3893_v28  ;;  %v8310_v6 = vand.u32 4294901760, %v5471_v3  ;;  %v8311_v60 = vand.u32 4294901760, %v5056_v7  ;;  %4347 = vmatprep.subr.mxu0 %v5212_v44  ;;  %v8105_v50 = vand.u32 4294901760, %v5059_v8 }
  0x3a   :  { %4332 = vmatprep.subr.mxu1 %v452_v40  ;;  %v340_v26 = vand.u32 4294901760, %v339_v53  ;;  %v346_v5 = vsub.f32 %v5493_v46, %v8102_v2  ;;  %v8106_v40 = vand.u32 4294901760, %v5524_v57  ;;  %v8107_v28 = vand.u32 4294901760, %v5530_v51 }
  0x3b   :  { %v458_v54 = vsub.f32 %v5471_v3, %v8310_v6  ;;  %v252_v49 = vsub.f32 %v5056_v7, %v8311_v60  ;;  %v258_v6 = vsub.f32 %v5059_v8, %v8105_v50  ;;  %v8118_v60 = vand.u32 4294901760, %v5540_v45 }
  0x3c   :  { %4333 = vmatpush3.msra.mxu1 %v340_v26  ;;  %v347_v44 = vand.u32 4294901760, %v346_v5  ;;  %v465_v53 = vsub.f32 %v5524_v57, %v8106_v40  ;;  %v353_v2 = vsub.f32 %v5530_v51, %v8107_v28  ;;  %v8117_v7 = vand.u32 4294901760, %v5578_v25 }
  0x3d   :  { %v459_v35 = vand.u32 4294901760, %v458_v54  ;;  %v253_v27 = vand.u32 4294901760, %v252_v49  ;;  %v259_v49 = vand.u32 4294901760, %v258_v6  ;;  %v472_v54 = vsub.f32 %v5540_v45, %v8118_v60 }
  0x3e   :  { %v8110_v26 = vand.u32 4294901760, %v5593_v36  ;;  %v8116_v5 = vand.u32 4294901760, %v5603_v56  ;;  %v466_v50 = vand.u32 4294901760, %v465_v53  ;;  %v354_v40 = vand.u32 4294901760, %v353_v2 }
  0x3f   :  { %4334 = vmatprep.subr.mxu1 %v459_v35  ;;  %254 = vmatprep.mubr.f32.mxu0 %v253_v27  ;;  %v360_v28 = vsub.f32 %v5578_v25, %v8117_v7  ;;  %v8115_v8 = vand.u32 4294901760, %v5620_v62  ;;  %v473_v27 = vand.u32 4294901760, %v472_v54  ;;  %v8337_v7 = vld [vmem:[#allocation35_spill] sm:$0xff]  ;;  %v8338_v60 = vand.u32 4294901760, %v5230_v48 }
  0x40   :  { %4335 = vmatpush3.msra.mxu1 %v347_v44  ;;  %260 = vmatmul.mubr.f32.vlgmr.msra.gmra.mxu0 %v259_v49  ;;  %v479_v35 = vsub.f32 %v5593_v36, %v8110_v26  ;;  %v367_v6 = vsub.f32 %v5603_v56, %v8116_v5  ;;  %v8114_v44 = vand.u32 4294901760, %v5634_v32 }
  0x41   :  { %4336 = vmatprep.subr.mxu1 %v466_v50  ;;  %4348 = vmatpush3.msra.mxu0 %v5230_v48  ;;  %v361_v2 = vand.u32 4294901760, %v360_v28  ;;  %v486_v53 = vsub.f32 %v5620_v62, %v8115_v8  ;;  %v8335_v8 = vld [vmem:[#allocation24_spill] sm:$0xff]  ;;  %v8347_v48 = vand.u32 4294901760, %v5154_v33 }
  0x42   :  { %4337 = vmatpush3.msra.mxu1 %v354_v40  ;;  %4349 = vmatprep.subr.mxu0 %v5138_v29  ;;  %v480_v49 = vand.u32 4294901760, %v479_v35  ;;  %v368_v54 = vand.u32 4294901760, %v367_v6  ;;  %v374_v26 = vsub.f32 %v5634_v32, %v8114_v44  ;;  %v8313_v40 = vld [vmem:[#allocation25_spill] sm:$0xff]  ;;  %v8319_v35 = vld [vmem:[#allocation28_spill] sm:$0xff]  ;;  %v8333_v44 = vld [vmem:[#allocation34_spill] sm:$0xff]  ;;  %v8336_v5 = vand.u32 4294901760, %v8335_v8 }
  0x43   :  { %4338 = vmatprep.subr.mxu1 %v473_v27  ;;  %4350 = vmatpush3.msra.mxu0 %v5140_v30  ;;  %v487_v50 = vand.u32 4294901760, %v486_v53  ;;  %v8317_v27 = vld [vmem:[#allocation27_spill] sm:$0xff]  ;;  %v8321_v6 = vld [vmem:[#allocation29_spill] sm:$0xff]  ;;  %v8344_v8 = vand.u32 4294901760, %v5140_v30  ;;  %v8352_v30 = vld [vmem:[#allocation40_spill] sm:$0xff] }
  0x44   :  { %4339 = vmatpush3.msra.mxu1 %v361_v2  ;;  %4351 = vmatprep.subr.mxu0 %v5154_v33  ;;  %v375_v28 = vand.u32 4294901760, %v374_v26  ;;  %v8315_v26 = vld [vmem:[#allocation26_spill] sm:$0xff]  ;;  %v8325_v53 = vld [vmem:[#allocation31_spill] sm:$0xff] }
  0x45   :  { %4340 = vmatprep.subr.mxu1 %v480_v49  ;;  %4352 = vmatpush3.msra.mxu0 %v5156_v34  ;;  %v8323_v2 = vld [vmem:[#allocation30_spill] sm:$0xff]  ;;  %v8327_v49 = vld [vmem:[#allocation32_spill] sm:$0xff] }
  0x46   :  { %4341 = vmatpush3.msra.mxu1 %v368_v54  ;;  %4353 = vmatprep.subr.mxu0 %v5182_v37  ;;  %v8329_v54 = vld [vmem:[#allocation9_spill] sm:$0xff] }
  0x47   :  { %4342 = vmatprep.subr.mxu1 %v487_v50  ;;  %4354 = vmatpush3.msra.mxu0 %v5184_v38  ;;  %v8330_v50 = vld [vmem:[#allocation33_spill] sm:$0xff] }
  0x48   :  { %4343 = vmatpush3.msra.mxu1 %v375_v28  ;;  %4355 = vmatprep.subr.mxu0 %v5198_v41  ;;  %v8332_v28 = vld [vmem:[#allocation10_spill] sm:$0xff] }
  0x49   :  { %492 = vmatmul.mubr.f32.vlgmr.msra.gmra.mxu1 %v5046_v4  ;;  %4356 = vmatpush3.msra.mxu0 %v5200_v42  ;;  %v8339_v4 = vld [vmem:[#allocation36_spill] sm:$0xff]  ;;  %v8360_v33 = vand.u32 4294901760, %v8332_v28 }
  0x4a   :  { %4382 = vmatprep.subr.msk.mxu1 %vm88_vm0, %v8302_v0  ;;  %4357 = vmatprep.subr.mxu0 %v5228_v47 }
  0x4b   :  { %4383 = vmatpush3.msk.msra.mxu1 %vm72_vm1, %v8302_v0  ;;  %4358 = vmatpush3.msra.mxu0 %v5242_v52 }
  0x4c   :  { %4384 = vmatprep.subr.msk.mxu1 %vm87_vm2, %v8302_v0  ;;  %4359 = vmatprep.subr.mxu0 %v5268_v58 }
  0x4d   :  { %4385 = vmatpush3.msk.msra.mxu1 %vm71_vm3, %v8302_v0  ;;  %4360 = vmatpush3.msra.mxu0 %v5284_v63 }
  0x4e   :  { %4386 = vmatprep.subr.msk.mxu1 %vm86_vm4, %v8302_v0  ;;  %4361 = vmatprep.subr.mxu0 %v5328_v55 }
  0x4f   :  { %4387 = vmatpush3.msk.msra.mxu1 %vm70_vm5, %v8302_v0  ;;  %4362 = vmatpush3.msra.mxu0 %v5340_v59 }
  0x50   :  { %4388 = vmatprep.subr.msk.mxu1 %vm85_vm6, %v8302_v0  ;;  %4363 = vmatprep.subr.mxu0 %v5353_v1 }
  0x51   :  { %4389 = vmatpush3.msk.msra.mxu1 %vm69_vm7, %v8302_v0  ;;  %4364 = vmatpush3.msra.mxu0 %v5394_v39 }
  0x52   :  { %4390 = vmatprep.subr.msk.mxu1 %vm84_vm8, %v8302_v0  ;;  %4365 = vmatprep.subr.mxu0 %v5400_v31 }
  0x53   :  { %4391 = vmatpush3.msk.msra.mxu1 %vm68_vm9, %v8302_v0  ;;  %4366 = vmatpush3.msra.mxu0 %v5410_v61 }
  0x54   :  { %4392 = vmatprep.subr.msk.mxu1 %vm8111_vm10, %v8302_v0  ;;  %4367 = vmatprep.subr.mxu0 %v5430_v10  ;;  %vm8312_vm10 = vcmp.eq.s32.totalorder %v5108_v24, %v5087_v17 }
  0x55   :  { %4393 = vmatpush3.msk.msra.mxu1 %vm8112_vm11, %v8302_v0  ;;  %4368 = vmatpush3.msra.mxu0 %v5461_v43  ;;  %vm8314_vm11 = vcmp.eq.s32.totalorder %v8313_v40, %v5087_v17 }
  0x56   :  { %4394 = vmatprep.subr.msk.mxu1 %vm8113_vm12, %v8302_v0  ;;  %4369 = vmatprep.subr.mxu0 %v5471_v3  ;;  %vm8316_vm12 = vcmp.eq.s32.totalorder %v8315_v26, %v5087_v17 }
  0x57   :  { %4395 = vmatpush3.msk.msra.mxu1 %vm8312_vm10, %v8302_v0  ;;  %4370 = vmatpush3.msra.mxu0 %v5493_v46  ;;  %vm8318_vm10 = vcmp.eq.s32.totalorder %v8317_v27, %v5087_v17 }
  0x58   :  { %4396 = vmatprep.subr.msk.mxu1 %vm8314_vm11, %v8302_v0  ;;  %4371 = vmatprep.subr.mxu0 %v5524_v57  ;;  %vm8320_vm11 = vcmp.eq.s32.totalorder %v8319_v35, %v5087_v17 }
  0x59   :  { %4397 = vmatpush3.msk.msra.mxu1 %vm8316_vm12, %v8302_v0  ;;  %4372 = vmatpush3.msra.mxu0 %v5530_v51  ;;  %vm8322_vm12 = vcmp.eq.s32.totalorder %v8321_v6, %v5087_v17 }
  0x5a   :  { %4398 = vmatprep.subr.msk.mxu1 %vm8318_vm10, %v8302_v0  ;;  %4373 = vmatprep.subr.mxu0 %v5540_v45  ;;  %vm8324_vm10 = vcmp.eq.s32.totalorder %v8323_v2, %v5087_v17 }
  0x5b   :  { %4399 = vmatpush3.msk.msra.mxu1 %vm8320_vm11, %v8302_v0  ;;  %4374 = vmatpush3.msra.mxu0 %v5578_v25  ;;  %vm8326_vm11 = vcmp.eq.s32.totalorder %v8325_v53, %v5087_v17 }
  0x5c   :  { %4400 = vmatprep.subr.msk.mxu1 %vm8322_vm12, %v8302_v0  ;;  %4375 = vmatprep.subr.mxu0 %v5593_v36  ;;  %vm8328_vm12 = vcmp.eq.s32.totalorder %v8327_v49, %v5087_v17 }
  0x5d   :  { %4401 = vmatpush3.msk.msra.mxu1 %vm8324_vm10, %v8302_v0  ;;  %4376 = vmatpush3.msra.mxu0 %v5603_v56  ;;  %vm8331_vm10 = vcmp.eq.s32.totalorder %v8330_v50, %v5087_v17  ;;  %v8341_v50 = vand.u32 4294901760, %v5138_v29  ;;  %v8350_v29 = vld [vmem:[#allocation7_spill] sm:$0xff] }
  0x5e   :  { %4402 = vmatprep.subr.msk.mxu1 %vm8326_vm11, %v8302_v0  ;;  %4377 = vmatprep.subr.mxu0 %v5620_v62  ;;  %vm8334_vm11 = vcmp.eq.s32.totalorder %v8333_v44, %v5087_v17  ;;  %v8342_v44 = vld [vmem:[#allocation37_spill] sm:$0xff] }
  0x5f   :  { %4403 = vmatpush3.msk.msra.mxu1 %vm8328_vm12, %v8302_v0  ;;  %4378 = vmatpush3.msra.mxu0 %v5634_v32  ;;  %vm8340_vm12 = vcmp.eq.s32.totalorder %v8339_v4, %v5087_v17 }
  0x60   :  { %627 = vmatprep.mubr.f32.mxu0 %v8329_v54  ;;  %4404 = vmatprep.subr.msk.mxu1 %vm8331_vm10, %v8302_v0  ;;  %vm8343_vm10 = vcmp.eq.s32.totalorder %v8342_v44, %v5087_v17  ;;  %v8351_v44 = vand.u32 4294901760, %v5156_v34  ;;  %v8357_v34 = vand.u32 4294901760, %v8329_v54  ;;  %v8362_v54 = vand.u32 4294901760, %v5228_v47 }
  0x61   :  { %630 = vmatmul.mubr.f32.vlgmr.msra.gmra.mxu0 %v8332_v28  ;;  %4405 = vmatpush3.msk.msra.mxu1 %vm8334_vm11, %v8302_v0  ;;  %v8365_v47 = vand.u32 4294901760, %v5284_v63  ;;  %v8368_v63 = vmov 0.0  }
  0x62   :  { %4417 = vmatprep.subr.mxu0 %v8336_v5  ;;  %4406 = vmatprep.subr.msk.mxu1 %vm76_vm15, %v8302_v0  ;;  %v8345_v5 = vld [vmem:[#allocation38_spill] sm:$0xff] }
  0x63   :  { %4418 = vmatpush3.msra.mxu0 %v8338_v60  ;;  %4407 = vmatpush3.msk.msra.mxu1 %vm8340_vm12, %v8302_v0  ;;  %vm8346_vm11 = vcmp.eq.s32.totalorder %v8345_v5, %v5087_v17  ;;  %v8348_v60 = vld [vmem:[#allocation39_spill] sm:$0xff] }
  0x64   :  { %4419 = vmatprep.subr.mxu0 %v8341_v50  ;;  %4408 = vmatprep.subr.msk.mxu1 %vm8343_vm10, %v8302_v0  ;;  %vm8349_vm12 = vcmp.eq.s32.totalorder %v8348_v60, %v5087_v17  ;;  %v1017_v50 = vsub.s32 1, %v8350_v29  ;;  %vm8353_vm10 = vcmp.eq.s32.totalorder %v8352_v30, %v5087_v17 }
  0x65   :  { %4420 = vmatpush3.msra.mxu0 %v8344_v8  ;;  %4409 = vmatpush3.msk.msra.mxu1 %vm8346_vm11, %v8302_v0  ;;  %v8354_v8 = vand.u32 4294901760, %v5182_v37  ;;  %v8359_v37 = vld [vmem:[#allocation8_spill] sm:$0xff] }
  0x66   :  { %4421 = vmatprep.subr.mxu0 %v8347_v48  ;;  %4410 = vmatprep.subr.msk.mxu1 %vm8349_vm12, %v8302_v0  ;;  %v8356_v48 = vand.u32 4294901760, %v5184_v38  ;;  %v8361_v38 = vand.u32 4294901760, %v5200_v42  ;;  %v8364_v42 = vand.u32 4294901760, %v5268_v58  ;;  %v8367_v58 = vand.u32 4294901760, %v5340_v59 }
  0x67   :  { %4422 = vmatpush3.msra.mxu0 %v8351_v44  ;;  %4411 = vmatpush3.msk.msra.mxu1 %vm8353_vm10, %v8302_v0  ;;  %v8358_v44 = vand.u32 4294901760, %v5198_v41  ;;  %v8363_v41 = vand.u32 4294901760, %v5242_v52  ;;  %v8366_v52 = vand.u32 4294901760, %v5328_v55  ;;  %v8369_v59 = vand.u32 4294901760, %v5353_v1 }
  0x68   :  { %4423 = vmatprep.subr.mxu0 %v8354_v8  ;;  %4412 = vmatprep.subr.msk.mxu1 %vm73_vm13, %v8302_v0  ;;  %v5866_v8 = vrot.slane %v8359_v37, %v1017_v50  ;;  %v18_v50 = vld [vmem:[%s8018_s1 + $0x8] sm:$0xff] }
  0x69   :  { %4424 = vmatpush3.msra.mxu0 %v8356_v48  ;;  %4413 = vmatpush3.msk.msra.mxu1 %vm57_vm14, %v8302_v0  ;;  %v17_v48 = vld [vmem:[%s8018_s1] sm:$0xff] }
  0x6a   :  { %734 = vmatprep.mubr.f32.mxu1 %v8357_v34  ;;  %4425 = vmatprep.subr.mxu0 %v8358_v44  ;;  %vm8146_vm11 = vcmp.eq.s32.totalorder %v5067_v11, %v5866_v8  ;;  %v8370_v34 = vand.u32 4294901760, %v5394_v39  ;;  %v8371_v44 = vand.u32 4294901760, %v5400_v31  ;;  %v5976_v31 = vand.u32 4294901760, %v17_v48 }
  0x6b   :  { %738 = vmatmul.mubr.f32.vlgmr.msra.gmra.mxu1 %v8360_v33  ;;  %4426 = vmatpush3.msra.mxu0 %v8361_v38  ;;  %v4036_v55 = vsel %vm8146_vm11, 1.0, %v8368_v63  ;;  %v5964_v38 = vand.u32 4294901760, %v18_v50  ;;  %vm8121_vm12 = vcmp.eq.s32.totalorder %v5096_v20, %v5866_v8  ;;  %vm8122_vm10 = vcmp.eq.s32.totalorder %v5099_v21, %v5866_v8 }
  0x6c   :  { %4452 = vmatprep.subr.msk.mxu1 %vm88_vm0, %v8302_v0  ;;  %4427 = vmatprep.subr.mxu0 %v8362_v54  ;;  %vm1050_vm0 = vcmp.eq.s32.totalorder %v5063_v9, %v5866_v8  ;;  %v5962_v37 = vsub.f32 %v4036_v55, %v4036_v55  ;;  %v8373_v54 = vand.u32 4294901760, %v5410_v61  ;;  %8375 = vst [vmem:[#allocation27_spill] sm:$0xff] %v5976_v31 }
  0x6d   :  { %4453 = vmatpush3.msk.msra.mxu1 %vm72_vm1, %v8302_v0  ;;  %4428 = vmatpush3.msra.mxu0 %v8363_v41  ;;  %vm8149_vm1 = vcmp.eq.s32.totalorder %v5070_v12, %v5866_v8  ;;  %v4052_v28 = vsel %vm1050_vm0, 1.0, %v8368_v63  ;;  %8372 = vst [vmem:[#allocation25_spill] sm:$0xff] %v5964_v38 }
  0x6e   :  { %4454 = vmatprep.subr.msk.mxu1 %vm87_vm2, %v8302_v0  ;;  %4429 = vmatprep.subr.mxu0 %v8364_v42  ;;  %vm8196_vm2 = vcmp.eq.s32.totalorder %v5073_v13, %v5866_v8  ;;  %v4051_v33 = vsel %vm8149_vm1, 1.0, %v8368_v63  ;;  %v5960_v39 = vsub.f32 %v4052_v28, %v4052_v28  ;;  %v8377_v42 = vand.u32 4294901760, %v5430_v10 }
  0x6f   :  { %4455 = vmatpush3.msk.msra.mxu1 %vm71_vm3, %v8302_v0  ;;  %4430 = vmatpush3.msra.mxu0 %v8365_v47  ;;  %v4035_v1 = vsel %vm8196_vm2, 1.0, %v8368_v63  ;;  %vm8173_vm3 = vcmp.eq.s32.totalorder %v5076_v14, %v5866_v8  ;;  %v5972_v41 = vsub.f32 %v4051_v33, %v4051_v33  ;;  %v8380_v10 = vand.u32 4294901760, %v5461_v43 }
  0x70   :  { %4456 = vmatprep.subr.msk.mxu1 %vm86_vm4, %v8302_v0  ;;  %4431 = vmatprep.subr.mxu0 %v8366_v52  ;;  %vm8166_vm4 = vcmp.eq.s32.totalorder %v5079_v15, %v5866_v8  ;;  %v5984_v47 = vsub.f32 %v4035_v1, %v4035_v1  ;;  %v4050_v61 = vsel %vm8173_vm3, 1.0, %v8368_v63  ;;  %v8129_v28 = vand.u32 4294901760, %v5960_v39  ;;  %v8427_v15 = vld [vmem:[#allocation41_spill] sm:$0xff] }
  0x71   :  { %4457 = vmatpush3.msk.msra.mxu1 %vm70_vm5, %v8302_v0  ;;  %4432 = vmatpush3.msra.mxu0 %v8367_v58  ;;  %8374 = vst [vmem:[#allocation26_spill] sm:$0xff] %v5972_v41  ;;  %vm8165_vm5 = vcmp.eq.s32.totalorder %v5082_v16, %v5866_v8  ;;  %v4034_v52 = vsel %vm8166_vm4, 1.0, %v8368_v63  ;;  %v8382_v58 = vand.u32 4294901760, %v5471_v3  ;;  %v8123_v55 = vand.u32 4294901760, %v5962_v37 }
  0x72   :  { %4458 = vmatprep.subr.msk.mxu1 %vm85_vm6, %v8302_v0  ;;  %4433 = vmatprep.subr.mxu0 %v8369_v59  ;;  %vm8376_vm6 = vcmp.eq.s32.totalorder %v5099_v21, %v5087_v17  ;;  %8378 = vst [vmem:[#allocation28_spill] sm:$0xff] %v5984_v47  ;;  %v4049_v43 = vsel %vm8165_vm5, 1.0, %v8368_v63  ;;  %v6021_v59 = vsub.f32 %v18_v50, %v5964_v38  ;;  %v8385_v3 = vand.u32 4294901760, %v5493_v46 }
  0x73   :  { %4459 = vmatpush3.msk.msra.mxu1 %vm69_vm7, %v8302_v0  ;;  %4434 = vmatpush3.msra.mxu0 %v8370_v34  ;;  %vm8164_vm7 = vcmp.eq.s32.totalorder %v5090_v18, %v5866_v8  ;;  %v6029_v33 = vsub.f32 %v4050_v61, %v4050_v61  ;;  %v6031_v34 = vsub.f32 %v4034_v52, %v4034_v52  ;;  %v8390_v46 = vand.u32 4294901760, %v5524_v57 }
  0x74   :  { %4460 = vmatprep.subr.msk.mxu1 %vm84_vm8, %v8302_v0  ;;  %4435 = vmatprep.subr.mxu0 %v8371_v44  ;;  %vm8379_vm8 = vcmp.eq.s32.totalorder %v5102_v22, %v5087_v17  ;;  %8383 = vst [vmem:[#allocation29_spill] sm:$0xff] %v6021_v59  ;;  %v4033_v1 = vsel %vm8164_vm7, 1.0, %v8368_v63  ;;  %v6038_v50 = vsub.f32 %v17_v48, %v5976_v31  ;;  %v4047_v48 = vsel %vm8122_vm10, 1.0, %v8368_v63  ;;  %v8414_v31 = vld [vmem:[#allocation34_spill] sm:$0xff] }
  0x75   :  { %4461 = vmatpush3.msk.msra.mxu1 %vm68_vm9, %v8302_v0  ;;  %4436 = vmatpush3.msra.mxu0 %v8373_v54  ;;  %vm8128_vm9 = vcmp.eq.s32.totalorder %v5093_v19, %v5866_v8  ;;  %8386 = vst [vmem:[#allocation31_spill] sm:$0xff] %v6029_v33  ;;  %8387 = vst [vmem:[#allocation9_spill] sm:$0xff] %v6031_v34  ;;  %v4032_v54 = vsel %vm8121_vm12, 1.0, %v8368_v63  ;;  %v8392_v57 = vand.u32 4294901760, %v5530_v51  ;;  %v8125_v61 = vand.u32 4294901760, %v5972_v41 }
  0x76   :  { %4462 = vmatprep.subr.msk.mxu1 %vm8376_vm6, %v8302_v0  ;;  %4437 = vmatprep.subr.mxu0 %v8377_v42  ;;  %vm8381_vm6 = vcmp.eq.s32.totalorder %v5105_v23, %v5087_v17  ;;  %8388 = vst [vmem:[#allocation10_spill] sm:$0xff] %v6038_v50  ;;  %v4048_v44 = vsel %vm8128_vm9, 1.0, %v8368_v63  ;;  %v6066_v42 = vsub.f32 %v4049_v43, %v4049_v43  ;;  %v8127_v52 = vand.u32 4294901760, %v5984_v47 }
  0x77   :  { %4463 = vmatpush3.msk.msra.mxu1 %vm8379_vm8, %v8302_v0  ;;  %4438 = vmatpush3.msra.mxu0 %v8380_v10  ;;  %vm8384_vm8 = vcmp.eq.s32.totalorder %v5108_v24, %v5087_v17  ;;  %vm8126_vm12 = vcmp.eq.s32.totalorder %v5105_v23, %v5866_v8  ;;  %vm8394_vm10 = vcmp.eq.s32.totalorder %v8317_v27, %v5087_v17  ;;  %v8395_v10 = vand.u32 4294901760, %v5540_v45 }
  0x78   :  { %4464 = vmatprep.subr.msk.mxu1 %vm8381_vm6, %v8302_v0  ;;  %4439 = vmatprep.subr.mxu0 %v8382_v58  ;;  %vm8389_vm6 = vcmp.eq.s32.totalorder %v8313_v40, %v5087_v17  ;;  %8393 = vst [vmem:[#allocation24_spill] sm:$0xff] %v6066_v42  ;;  %v6078_v58 = vsub.f32 %v4033_v1, %v4033_v1  ;;  %v8399_v45 = vand.u32 4294901760, %v5578_v25  ;;  %v4046_v25 = vsel %vm8126_vm12, 1.0, %v8368_v63 }
  0x79   :  { %4465 = vmatpush3.msk.msra.mxu1 %vm8384_vm8, %v8302_v0  ;;  %4440 = vmatpush3.msra.mxu0 %v8385_v3  ;;  %vm8124_vm8 = vcmp.eq.s32.totalorder %v5102_v22, %v5866_v8  ;;  %v6083_v51 = vsub.f32 %v5960_v39, %v8129_v28  ;;  %v6088_v43 = vsub.f32 %v5962_v37, %v8123_v55  ;;  %v6091_v3 = vand.u32 4294901760, %v6021_v59 }
  0x7a   :  { %4466 = vmatprep.subr.msk.mxu1 %vm8389_vm6, %v8302_v0  ;;  %4441 = vmatprep.subr.mxu0 %v8390_v46  ;;  %vm8391_vm6 = vcmp.eq.s32.totalorder %v8315_v26, %v5087_v17  ;;  %8396 = vst [vmem:[#allocation35_spill] sm:$0xff] %v6078_v58  ;;  %v6099_v1 = vsub.f32 %v4048_v44, %v4048_v44  ;;  %v8401_v55 = vand.u32 4294901760, %v5593_v36  ;;  %v8132_v44 = vand.u32 4294901760, %v6029_v33 }
  0x7b   :  { %4467 = vmatpush3.msk.msra.mxu1 %vm8391_vm6, %v8302_v0  ;;  %4442 = vmatpush3.msra.mxu0 %v8392_v57  ;;  %8397 = vst [vmem:[#allocation36_spill] sm:$0xff] %v6091_v3  ;;  %v6101_v46 = vsub.f32 %v4032_v54, %v4032_v54  ;;  %v6103_v57 = vsub.f32 %v4047_v48, %v4047_v48  ;;  %v8403_v36 = vand.u32 4294901760, %v5603_v56  ;;  %v8406_v56 = vand.u32 4294901760, %v5620_v62 }
  0x7c   :  { %4468 = vmatprep.subr.msk.mxu1 %vm8394_vm10, %v8302_v0  ;;  %4443 = vmatprep.subr.mxu0 %v8395_v10  ;;  %vm8398_vm10 = vcmp.eq.s32.totalorder %v8319_v35, %v5087_v17  ;;  %v4031_v10 = vsel %vm8124_vm8, 1.0, %v8368_v63  ;;  %vm8400_vm6 = vcmp.eq.s32.totalorder %v8321_v6, %v5087_v17  ;;  %vm8402_vm8 = vcmp.eq.s32.totalorder %v8323_v2, %v5087_v17 }
  0x7d   :  { %4469 = vmatpush3.msk.msra.mxu1 %vm8398_vm10, %v8302_v0  ;;  %4444 = vmatpush3.msra.mxu0 %v8399_v45  ;;  %vm1028_vm10 = vcmp.eq.s32.totalorder %v5108_v24, %v5866_v8  ;;  %v6137_v48 = vsub.f32 %v5984_v47, %v8127_v52  ;;  %v6142_v45 = vand.u32 4294901760, %v6038_v50  ;;  %vm8180_vm12 = vcmp.eq.s32.totalorder %v8315_v26, %v5866_v8  ;;  %v8410_v52 = vld [vmem:[#allocation33_spill] sm:$0xff] }
  0x7e   :  { %4470 = vmatprep.subr.msk.mxu1 %vm8400_vm6, %v8302_v0  ;;  %4445 = vmatprep.subr.mxu0 %v8401_v55  ;;  %v6132_v55 = vsub.f32 %v5972_v41, %v8125_v61  ;;  %vm8135_vm6 = vcmp.eq.s32.totalorder %v8313_v40, %v5866_v8  ;;  %vm8407_vm9 = vcmp.eq.s32.totalorder %v8327_v49, %v5087_v17  ;;  %v8408_v28 = vand.u32 4294901760, %v5634_v32  ;;  %v8413_v61 = vld [vmem:[#allocation6_spill] sm:$0xff] }
  0x7f   :  { %4471 = vmatpush3.msk.msra.mxu1 %vm8402_vm8, %v8302_v0  ;;  %4446 = vmatpush3.msra.mxu0 %v8403_v36  ;;  %8404 = vst [vmem:[#allocation38_spill] sm:$0xff] %v6142_v45  ;;  %vm8405_vm8 = vcmp.eq.s32.totalorder %v8325_v53, %v5087_v17  ;;  %v6161_v54 = vsub.f32 %v4031_v10, %v4031_v10  ;;  %v8409_v36 = vld [vmem:[#allocation5_spill] sm:$0xff]  ;;  %v8412_v10 = vand.u32 4294901760, %v6031_v34  ;;  %v8416_v38 = vand.u32 4294901760, %v6066_v42 }
  0x80   :  { %4472 = vmatprep.subr.msk.mxu1 %vm8405_vm8, %v8302_v0  ;;  %4447 = vmatprep.subr.mxu0 %v8406_v56  ;;  %v6163_v62 = vsub.f32 %v4046_v25, %v4046_v25  ;;  %v4030_v56 = vsel %vm1028_vm10, 1.0, %v8368_v63  ;;  %v6178_v32 = vsub.f32 %v6029_v33, %v8132_v44  ;;  %vm8181_vm8 = vcmp.eq.s32.totalorder %v8317_v27, %v5866_v8 }
  0x81   :  { %4473 = vmatpush3.msk.msra.mxu1 %vm8407_vm9, %v8302_v0  ;;  %4448 = vmatpush3.msra.mxu0 %v8408_v28  ;;  %vm8411_vm9 = vcmp.eq.s32.totalorder %v8410_v52, %v5087_v17  ;;  %v4045_v28 = vsel %vm8135_vm6, 1.0, %v8368_v63  ;;  %v6187_v25 = vsub.f32 %v6031_v34, %v8412_v10  ;;  %v4029_v10 = vsel %vm8180_vm12, 1.0, %v8368_v63 }
  0x82   :  { %904 = vmatprep.mubr.f32.mxu0 %v8409_v36  ;;  %4474 = vmatprep.subr.msk.mxu1 %vm8411_vm9, %v8302_v0  ;;  %vm8415_vm9 = vcmp.eq.s32.totalorder %v8414_v31, %v5087_v17  ;;  %vm8182_vm6 = vcmp.eq.s32.totalorder %v8319_v35, %v5866_v8  ;;  %v6215_v44 = vsub.f32 %v6066_v42, %v8416_v38  ;;  %v4044_v34 = vsel %vm8181_vm8, 1.0, %v8368_v63 }
  0x83   :  { %906 = vmatmul.mubr.f32.vlgmr.msra.gmra.mxu0 %v8413_v61  ;;  %4475 = vmatpush3.msk.msra.mxu1 %vm8415_vm9, %v8302_v0  ;;  %vm8183_vm9 = vcmp.eq.s32.totalorder %v8321_v6, %v5866_v8  ;;  %v6229_v9 = vsub.f32 %v4030_v56, %v4030_v56  ;;  %v6231_v38 = vsub.f32 %v4045_v28, %v4045_v28  ;;  %v8418_v33 = vand.u32 4294901760, %v6078_v58  ;;  %v8419_v56 = vld [vmem:[#allocation37_spill] sm:$0xff] }
  0x84   :  { %4487 = vmatprep.subr.msk.mxu0 %vm1050_vm0, %v8302_v0  ;;  %4476 = vmatprep.subr.msk.mxu1 %vm76_vm15, %v8302_v0  ;;  %vm8417_vm15 = vcmp.eq.s32.totalorder %v8339_v4, %v5087_v17  ;;  %v6266_v28 = vsub.f32 %v4029_v10, %v4029_v10  ;;  %v4043_v11 = vsel %vm8183_vm9, 1.0, %v8368_v63  ;;  %v6284_v13 = vsub.f32 %v4044_v34, %v4044_v34 }
  0x85   :  { %4488 = vmatpush3.msk.msra.mxu0 %vm8146_vm11, %v8302_v0  ;;  %4477 = vmatpush3.msk.msra.mxu1 %vm8417_vm15, %v8302_v0  ;;  %v6240_v42 = vsub.f32 %v6078_v58, %v8418_v33  ;;  %vm8420_vm15 = vcmp.eq.s32.totalorder %v8419_v56, %v5087_v17  ;;  %v4028_v33 = vsel %vm8182_vm6, 1.0, %v8368_v63  ;;  %vm1025_vm11 = vcmp.eq.s32.totalorder %v8323_v2, %v5866_v8  ;;  %v8506_v2 = vld [vmem:[#allocation33_spill] sm:$0xff] }
  0x86   :  { %4489 = vmatprep.subr.msk.mxu0 %vm8149_vm1, %v8302_v0  ;;  %4478 = vmatprep.subr.msk.mxu1 %vm8420_vm15, %v8302_v0  ;;  %vm8421_vm15 = vcmp.eq.s32.totalorder %v8345_v5, %v5087_v17  ;;  %vm1040_vm1 = vcmp.eq.s32.totalorder %v8325_v53, %v5866_v8  ;;  %v8423_v58 = vand.u32 4294901760, %v6099_v1  ;;  %v8424_v47 = vand.u32 4294901760, %v6101_v46 }
  0x87   :  { %4490 = vmatpush3.msk.msra.mxu0 %vm8196_vm2, %v8302_v0  ;;  %4479 = vmatpush3.msk.msra.mxu1 %vm8421_vm15, %v8302_v0  ;;  %vm8422_vm15 = vcmp.eq.s32.totalorder %v8348_v60, %v5087_v17  ;;  %v6305_v10 = vsub.f32 %v4028_v33, %v4028_v33  ;;  %v6320_v34 = vsub.f32 %v4043_v11, %v4043_v11  ;;  %v4042_v33 = vsel %vm1040_vm1, 1.0, %v8368_v63 }
  0x88   :  { %4491 = vmatprep.subr.msk.mxu0 %vm8173_vm3, %v8302_v0  ;;  %4480 = vmatprep.subr.msk.mxu1 %vm8422_vm15, %v8302_v0  ;;  %v6289_v12 = vsub.f32 %v6099_v1, %v8423_v58  ;;  %v6294_v41 = vsub.f32 %v6101_v46, %v8424_v47  ;;  %vm8425_vm15 = vcmp.eq.s32.totalorder %v8352_v30, %v5087_v17  ;;  %v4027_v47 = vsel %vm1025_vm11, 1.0, %v8368_v63 }
  0x89   :  { %4492 = vmatpush3.msk.msra.mxu0 %vm8166_vm4, %v8302_v0  ;;  %4481 = vmatpush3.msk.msra.mxu1 %vm8425_vm15, %v8302_v0  ;;  %8426 = vst [vmem:[#allocation39_spill] sm:$0xff] %v6305_v10  ;;  %8428 = vst [vmem:[#allocation40_spill] sm:$0xff] %v6320_v34  ;;  %v8429_v11 = vand.u32 4294901760, %v6103_v57  ;;  %vm1039_vm15 = vcmp.eq.s32.totalorder %v8410_v52, %v5866_v8  ;;  %v6353_v14 = vsub.f32 %v4027_v47, %v4027_v47 }
  0x8a   :  { %4493 = vmatprep.subr.msk.mxu0 %vm8165_vm5, %v8302_v0  ;;  %4482 = vmatprep.subr.msk.mxu1 %vm73_vm13, %v8302_v0  ;;  %vm1024_vm13 = vcmp.eq.s32.totalorder %v8327_v49, %v5866_v8  ;;  %v1372_v17 = vand.u32 4294901760, %v6289_v12  ;;  %vm8431_vm5 = vcmp.eq.s32.totalorder %v5096_v20, %v5866_v8  ;;  %v8432_v58 = vand.u32 4294901760, %v6161_v54 }
  0x8b   :  { %4494 = vmatpush3.msk.msra.mxu0 %vm8164_vm7, %v8302_v0  ;;  %4483 = vmatpush3.msk.msra.mxu1 %vm57_vm14, %v8302_v0  ;;  %v6339_v16 = vsub.f32 %v6103_v57, %v8429_v11  ;;  %vm8430_vm7 = vcmp.eq.s32.totalorder %v5093_v19, %v5866_v8  ;;  %vm1023_vm14 = vcmp.eq.s32.totalorder %v8414_v31, %v5866_v8  ;;  %v8433_v11 = vand.u32 4294901760, %v6083_v51 }
  0x8c   :  { %1008 = vmatprep.mubr.f32.mxu1 %v8409_v36  ;;  %4495 = vmatprep.subr.msk.mxu0 %vm8430_vm7, %v8302_v0  ;;  %v6362_v36 = vsub.f32 %v4042_v33, %v4042_v33  ;;  %v6367_v12 = vsub.f32 %v6161_v54, %v8432_v58  ;;  %vm1038_vm7 = vcmp.eq.s32.totalorder %v8337_v7, %v5866_v8  ;;  %v8435_v58 = vand.u32 4294901760, %v6163_v62 }
  0x8d   :  { %1010 = vmatmul.mubr.f32.vlgmr.msra.gmra.mxu1 %v8413_v61  ;;  %4496 = vmatpush3.msk.msra.mxu0 %vm8431_vm5, %v8302_v0  ;;  %vm8434_vm4 = vcmp.eq.s32.totalorder %v5099_v21, %v5866_v8  ;;  %v4026_v61 = vsel %vm1024_vm13, 1.0, %v8368_v63  ;;  %v4041_v51 = vsel %vm1039_vm15, 1.0, %v8368_v63  ;;  %v8437_v21 = vand.u32 4294901760, %v6088_v43 }
  0x8e   :  { %4522 = vmatprep.subr.mxu1 %v8433_v11  ;;  %4497 = vmatprep.subr.msk.mxu0 %vm8434_vm4, %v8302_v0  ;;  %v6385_v33 = vsub.f32 %v6163_v62, %v8435_v58  ;;  %v8436_v11 = vand.u32 4294901760, %v6229_v9  ;;  %vm8438_vm4 = vcmp.eq.s32.totalorder %v5102_v22, %v5866_v8  ;;  %v1379_v58 = vand.u32 4294901760, %v6339_v16 }
  0x8f   :  { %4523 = vmatpush3.msra.mxu1 %v8437_v21  ;;  %4498 = vmatpush3.msk.msra.mxu0 %vm8438_vm4, %v8302_v0  ;;  %v4025_v20 = vsel %vm1023_vm14, 1.0, %v8368_v63  ;;  %v8439_v19 = vand.u32 4294901760, %v6231_v38  ;;  %vm1022_vm5 = vcmp.eq.s32.totalorder %v8339_v4, %v5866_v8  ;;  %v8440_v21 = vand.u32 4294901760, %v6132_v55 }
  0x90   :  { %v6394_v47 = vsub.f32 %v6229_v9, %v8436_v11  ;;  %vm8441_vm4 = vcmp.eq.s32.totalorder %v5105_v23, %v5866_v8  ;;  %v4040_v16 = vsel %vm1038_vm7, 1.0, %v8368_v63  ;;  %vm8208_vm3 = vcmp.eq.s32.totalorder %v8419_v56, %v5866_v8 }
  0x91   :  { %v6410_v11 = vsub.f32 %v6231_v38, %v8439_v19  ;;  %4524 = vmatprep.subr.mxu1 %v8440_v21  ;;  %4499 = vmatprep.subr.msk.mxu0 %vm8441_vm4, %v8302_v0  ;;  %v8442_v55 = vand.u32 4294901760, %v6137_v48  ;;  %v1267_v21 = vand.u32 4294901760, %v6367_v12  ;;  %v6435_v23 = vsub.f32 %v4026_v61, %v4026_v61 }
  0x92   :  { %4500 = vmatpush3.msk.msra.mxu0 %vm1028_vm10, %v8302_v0  ;;  %v6437_v22 = vsub.f32 %v4041_v51, %v4041_v51  ;;  %v8443_v43 = vand.u32 4294901760, %v6266_v28  ;;  %v8444_v19 = vand.u32 4294901760, %v6178_v32  ;;  %vm8445_vm4 = vcmp.eq.s32.totalorder %v8313_v40, %v5866_v8 }
  0x93   :  { %4525 = vmatpush3.msra.mxu1 %v8442_v55  ;;  %4501 = vmatprep.subr.msk.mxu0 %vm8445_vm4, %v8302_v0  ;;  %v1386_v48 = vand.u32 4294901760, %v6385_v33  ;;  %v1274_v12 = vand.u32 4294901760, %v6394_v47  ;;  %v6452_v61 = vsub.f32 %v4025_v20, %v4025_v20  ;;  %v4024_v51 = vsel %vm1022_vm5, 1.0, %v8368_v63 }
  0x94   :  { %v6442_v18 = vsub.f32 %v6266_v28, %v8443_v43  ;;  %4526 = vmatprep.subr.mxu1 %v8444_v19  ;;  %v8446_v43 = vand.u32 4294901760, %v6187_v25  ;;  %4502 = vmatpush3.msk.msra.mxu0 %vm8180_vm12, %v8302_v0  ;;  %v6464_v32 = vsub.f32 %v4040_v16, %v4040_v16  ;;  %v4039_v20 = vsel %vm8208_vm3, 1.0, %v8368_v63 }
  0x95   :  { %vm8207_vm4 = vcmp.eq.s32.totalorder %v8345_v5, %v5866_v8  ;;  %v8184_v47 = vand.u32 4294901760, %v6320_v34  ;;  %v8447_v25 = vand.u32 4294901760, %v6215_v44  ;;  %4503 = vmatprep.subr.msk.mxu0 %vm8181_vm8, %v8302_v0  ;;  %v1393_v33 = vand.u32 4294901760, %v6410_v11 }
  0x96   :  { %4527 = vmatpush3.msra.mxu1 %v8446_v43  ;;  %v8448_v16 = vand.u32 4294901760, %v6284_v13  ;;  %v8449_v55 = vand.u32 4294901760, %v6305_v10  ;;  %vm8206_vm12 = vcmp.eq.s32.totalorder %v8348_v60, %v5866_v8  ;;  %v8450_v44 = vand.u32 4294901760, %v6240_v42  ;;  %4504 = vmatpush3.msk.msra.mxu0 %vm8182_vm6, %v8302_v0 }
  0x97   :  { %4528 = vmatprep.subr.mxu1 %v8447_v25  ;;  %v1281_v11 = vand.u32 4294901760, %v6442_v18  ;;  %v6495_v25 = vsub.f32 %v4024_v51, %v4024_v51  ;;  %vm8205_vm8 = vcmp.eq.s32.totalorder %v8352_v30, %v5866_v8  ;;  %4505 = vmatprep.subr.msk.mxu0 %vm8183_vm9, %v8302_v0  ;;  %v6504_v42 = vsub.f32 %v4039_v20, %v4039_v20 }
  0x98   :  { %v1399_v19 = vsub.f32 %v6284_v13, %v8448_v16  ;;  %v1287_v43 = vsub.f32 %v6305_v10, %v8449_v55  ;;  %4529 = vmatpush3.msra.mxu1 %v8450_v44  ;;  %v8185_v16 = vand.u32 4294901760, %v6353_v14  ;;  %v4023_v18 = vsel %vm8207_vm4, 1.0, %v8368_v63  ;;  %4506 = vmatpush3.msk.msra.mxu0 %vm1025_vm11, %v8302_v0 }
  0x99   :  { %4530 = vmatprep.subr.mxu1 %v1372_v17  ;;  %vm8195_vm6 = vcmp.eq.s32.totalorder %v8427_v15, %v5866_v8  ;;  %v8451_v55 = vand.u32 4294901760, %v6294_v41  ;;  %v1406_v17 = vsub.f32 %v6320_v34, %v8184_v47  ;;  %v4038_v20 = vsel %vm8206_vm12, 1.0, %v8368_v63  ;;  %4507 = vmatprep.subr.msk.mxu0 %vm1040_vm1, %v8302_v0 }
  0x9a   :  { %vm8194_vm9 = vcmp.eq.s32.totalorder %v8350_v29, %v5866_v8  ;;  %v1400_v41 = vand.u32 4294901760, %v1399_v19  ;;  %v4022_v47 = vsel %vm8205_vm8, 1.0, %v8368_v63  ;;  %4508 = vmatpush3.msk.msra.mxu0 %vm1024_vm13, %v8302_v0  ;;  %v1294_v19 = vsub.f32 %v6353_v14, %v8185_v16 }
  0x9b   :  { %4531 = vmatpush3.msra.mxu1 %v8451_v55  ;;  %v1288_v55 = vand.u32 4294901760, %v1287_v43  ;;  %v4037_v43 = vsel %vm8195_vm6, 1.0, %v8368_v63  ;;  %4509 = vmatprep.subr.msk.mxu0 %vm1039_vm15, %v8302_v0  ;;  %v4021_v16 = vsel %vm8194_vm9, 1.0, %v8368_v63  ;;  %v8454_v44 = vand.u32 4294901760, %v6435_v23 }
  0x9c   :  { %4532 = vmatprep.subr.mxu1 %v1379_v58  ;;  %v6542_v58 = vsub.f32 %v4023_v18, %v4023_v18  ;;  %v8453_v18 = vand.u32 4294901760, %v6362_v36  ;;  %4510 = vmatpush3.msk.msra.mxu0 %vm1023_vm14, %v8302_v0  ;;  %v8456_v49 = vand.u32 4294901760, %v6437_v22  ;;  %v1220_v63 = vsub.f32 %v6038_v50, %v6142_v45 }
  0x9d   :  { %4533 = vmatpush3.msra.mxu1 %v1267_v21  ;;  %v6556_v21 = vsub.f32 %v4038_v20, %v4038_v20  ;;  %v6570_v20 = vsub.f32 %v4022_v47, %v4022_v47  ;;  %4511 = vmatprep.subr.msk.mxu0 %vm1038_vm7, %v8302_v0  ;;  %v1214_v47 = vsub.f32 %v6021_v59, %v6091_v3  ;;  %v8461_v3 = vand.u32 4294901760, %v6504_v42 }
  0x9e   :  { %8452 = vst [vmem:[#allocation8_spill] sm:$0xff] %v6542_v58  ;;  %4534 = vmatprep.subr.mxu1 %v1386_v48  ;;  %v1413_v51 = vsub.f32 %v6362_v36, %v8453_v18  ;;  %v1407_v48 = vand.u32 4294901760, %v1406_v17  ;;  %v1301_v18 = vsub.f32 %v6435_v23, %v8454_v44  ;;  %v1420_v17 = vsub.f32 %v6437_v22, %v8456_v49 }
  0x9f   :  { %4535 = vmatpush3.msra.mxu1 %v1274_v12  ;;  %v6580_v12 = vsub.f32 %v4037_v43, %v4037_v43  ;;  %4512 = vmatpush3.msk.msra.mxu0 %vm1022_vm5, %v8302_v0  ;;  %v6592_v44 = vsub.f32 %v4021_v16, %v4021_v16  ;;  %v8457_v43 = vand.u32 4294901760, %v6452_v61  ;;  %v1434_v45 = vsub.f32 %v6504_v42, %v8461_v3 }
  0xa0   :  { %4536 = vmatprep.subr.mxu1 %v1393_v33  ;;  %v1295_v33 = vand.u32 4294901760, %v1294_v19  ;;  %4513 = vmatprep.subr.msk.mxu0 %vm8208_vm3, %v8302_v0  ;;  %v8458_v19 = vand.u32 4294901760, %v6464_v32  ;;  %v6638_v3 = vand.u32 4294901760, %v1220_v63 }
  0xa1   :  { %8455 = vst [vmem:[#allocation5_spill] sm:$0xff] %v6580_v12  ;;  %4537 = vmatpush3.msra.mxu1 %v1281_v11  ;;  %v1308_v52 = vsub.f32 %v6452_v61, %v8457_v43  ;;  %v1414_v11 = vand.u32 4294901760, %v1413_v51  ;;  %4514 = vmatpush3.msk.msra.mxu0 %vm8207_vm4, %v8302_v0  ;;  %v8459_v43 = vand.u32 4294901760, %v6495_v25  ;;  %v1435_v63 = vand.u32 4294901760, %v1434_v45 }
  0xa2   :  { %4538 = vmatprep.subr.mxu1 %v1400_v41  ;;  %v1427_v16 = vsub.f32 %v6464_v32, %v8458_v19  ;;  %v1302_v41 = vand.u32 4294901760, %v1301_v18  ;;  %4515 = vmatprep.subr.msk.mxu0 %vm8206_vm12, %v8302_v0  ;;  %v1421_v19 = vand.u32 4294901760, %v1420_v17  ;;  %8463 = vst [vmem:[#allocation34_spill] sm:$0xff] %v6638_v3 }
  0xa3   :  { %4539 = vmatpush3.msra.mxu1 %v1288_v55  ;;  %v1315_v51 = vsub.f32 %v6495_v25, %v8459_v43  ;;  %v6620_v55 = vand.u32 4294901760, %v1214_v47  ;;  %4516 = vmatpush3.msk.msra.mxu0 %vm8205_vm8, %v8302_v0  ;;  %v8462_v43 = vand.u32 4294901760, %v6542_v58 }
  0xa4   :  { %4540 = vmatprep.subr.mxu1 %v1407_v48  ;;  %v1309_v48 = vand.u32 4294901760, %v1308_v52  ;;  %4517 = vmatprep.subr.msk.mxu0 %vm8195_vm6, %v8302_v0  ;;  %v1428_v47 = vand.u32 4294901760, %v1427_v16  ;;  %v8466_v16 = vand.u32 4294901760, %v6580_v12 }
  0xa5   :  { %8460 = vst [vmem:[#allocation6_spill] sm:$0xff] %v6620_v55  ;;  %4541 = vmatpush3.msra.mxu1 %v1295_v33  ;;  %v1322_v49 = vsub.f32 %v6542_v58, %v8462_v43  ;;  %v8464_v33 = vand.u32 4294901760, %v6556_v21  ;;  %4518 = vmatpush3.msk.msra.mxu0 %vm8194_vm9, %v8302_v0  ;;  %v1316_v52 = vand.u32 4294901760, %v1315_v51 }
  0xa6   :  { %4542 = vmatprep.subr.mxu1 %v1414_v11  ;;  %v8465_v11 = vand.u32 4294901760, %v6570_v20  ;;  %1216 = vmatprep.mubr.f32.mxu0 %v6620_v55  ;;  %v1448_v17 = vsub.f32 %v6580_v12, %v8466_v16  ;;  %v8470_v55 = vld [vmem:[#allocation31_spill] sm:$0xff] }
  0xa7   :  { %v1441_v18 = vsub.f32 %v6556_v21, %v8464_v33  ;;  %4543 = vmatpush3.msra.mxu1 %v1302_v41  ;;  %4557 = vmatprep.subr.mxu0 %v5960_v39  ;;  %v1323_v41 = vand.u32 4294901760, %v1322_v49  ;;  %v8467_v33 = vand.u32 4294901760, %v6592_v44 }
  0xa8   :  { %v1329_v43 = vsub.f32 %v6570_v20, %v8465_v11  ;;  %4544 = vmatprep.subr.mxu1 %v1421_v19  ;;  %1222 = vmatmul.mubr.f32.vlgmr.msra.gmra.mxu0 %v6638_v3  ;;  %v8468_v19 = vld [vmem:[#allocation26_spill] sm:$0xff]  ;;  %v1449_v16 = vand.u32 4294901760, %v1448_v17  ;;  %v8475_v17 = vld [vmem:[#allocation27_spill] sm:$0xff] }
  0xa9   :  { %4545 = vmatpush3.msra.mxu1 %v1309_v48  ;;  %v1336_v51 = vsub.f32 %v6592_v44, %v8467_v33  ;;  %v1442_v11 = vand.u32 4294901760, %v1441_v18  ;;  %4558 = vmatpush3.msra.mxu0 %v5962_v37  ;;  %v8469_v48 = vld [vmem:[#allocation28_spill] sm:$0xff]  ;;  %v8471_v33 = vld [vmem:[#allocation9_spill] sm:$0xff]  ;;  %v8473_v18 = vld [vmem:[#allocation35_spill] sm:$0xff] }
  0xaa   :  { %4546 = vmatprep.subr.mxu1 %v1428_v47  ;;  %v1330_v45 = vand.u32 4294901760, %v1329_v43  ;;  %4559 = vmatprep.subr.mxu0 %v8468_v19  ;;  %v8472_v47 = vld [vmem:[#allocation24_spill] sm:$0xff]  ;;  %v8476_v43 = vld [vmem:[#allocation11_spill] sm:$0xff] }
  0xab   :  { %4547 = vmatpush3.msra.mxu1 %v1316_v52  ;;  %4560 = vmatpush3.msra.mxu0 %v8469_v48  ;;  %v1337_v49 = vand.u32 4294901760, %v1336_v51  ;;  %v8474_v52 = vld [vmem:[#allocation25_spill] sm:$0xff]  ;;  %v8481_v51 = vld [vmem:[#allocation14_spill] sm:$0xff]  ;;  %v8490_v3 = vld [vmem:[#allocation19_spill] sm:$0xff] }
  0xac   :  { %4548 = vmatprep.subr.mxu1 %v1435_v63  ;;  %4561 = vmatprep.subr.mxu0 %v8470_v55  ;;  %v8477_v63 = vld [vmem:[#allocation12_spill] sm:$0xff] }
  0xad   :  { %4549 = vmatpush3.msra.mxu1 %v1323_v41  ;;  %4562 = vmatpush3.msra.mxu0 %v8471_v33  ;;  %vm8478_vm9 = vcmp.eq.s32.totalorder %v8477_v63, %v5866_v8  ;;  %v8479_v41 = vld [vmem:[#allocation13_spill] sm:$0xff] }
  0xae   :  { %4550 = vmatprep.subr.mxu1 %v1442_v11  ;;  %4563 = vmatprep.subr.mxu0 %v8472_v47  ;;  %vm8480_vm6 = vcmp.eq.s32.totalorder %v8479_v41, %v5866_v8  ;;  %v8482_v11 = vld [vmem:[#allocation15_spill] sm:$0xff] }
  0xaf   :  { %4551 = vmatpush3.msra.mxu1 %v1330_v45  ;;  %4564 = vmatpush3.msra.mxu0 %v8473_v18  ;;  %v8484_v45 = vld [vmem:[#allocation16_spill] sm:$0xff] }
  0xb0   :  { %4552 = vmatprep.subr.mxu1 %v1449_v16  ;;  %1452 = vmatprep.mubr.f32.mxu1 %v8474_v52  ;;  %v8486_v16 = vld [vmem:[#allocation17_spill] sm:$0xff] }
  0xb1   :  { %4553 = vmatpush3.msra.mxu1 %v1337_v49  ;;  %4565 = vmatprep.subr.mxu0 %v6099_v1  ;;  %v8488_v49 = vld [vmem:[#allocation18_spill] sm:$0xff]  ;;  %v8494_v52 = vld [vmem:[#allocation21_spill] sm:$0xff] }
  0xb2   :  { %1454 = vmatmul.mubr.f32.vlgmr.msra.gmra.mxu1 %v8475_v17  ;;  %4566 = vmatpush3.msra.mxu0 %v6101_v46  ;;  %v8492_v17 = vld [vmem:[#allocation20_spill] sm:$0xff] }
  0xb3   :  { %4592 = vmatprep.subr.msk.mxu1 %vm1050_vm0, %v8302_v0  ;;  %4567 = vmatprep.subr.mxu0 %v6103_v57 }
  0xb4   :  { %4593 = vmatpush3.msk.msra.mxu1 %vm8478_vm9, %v8302_v0  ;;  %4568 = vmatpush3.msra.mxu0 %v6161_v54  ;;  %vm8483_vm9 = vcmp.eq.s32.totalorder %v8482_v11, %v5866_v8 }
  0xb5   :  { %4594 = vmatprep.subr.msk.mxu1 %vm8480_vm6, %v8302_v0  ;;  %4569 = vmatprep.subr.mxu0 %v6163_v62  ;;  %vm8485_vm6 = vcmp.eq.s32.totalorder %v8484_v45, %v5866_v8 }
  0xb6   :  { %4595 = vmatpush3.msk.msra.mxu1 %vm8196_vm2, %v8302_v0  ;;  %4570 = vmatpush3.msra.mxu0 %v6229_v9  ;;  %vm8487_vm2 = vcmp.eq.s32.totalorder %v8486_v16, %v5866_v8 }
  0xb7   :  { %4596 = vmatprep.subr.msk.mxu1 %vm8483_vm9, %v8302_v0  ;;  %4571 = vmatprep.subr.mxu0 %v6231_v38  ;;  %vm8489_vm9 = vcmp.eq.s32.totalorder %v8488_v49, %v5866_v8 }
  0xb8   :  { %4597 = vmatpush3.msk.msra.mxu1 %vm8485_vm6, %v8302_v0  ;;  %4572 = vmatpush3.msra.mxu0 %v6266_v28  ;;  %vm8491_vm6 = vcmp.eq.s32.totalorder %v8490_v3, %v5866_v8 }
  0xb9   :  { %4598 = vmatprep.subr.msk.mxu1 %vm8487_vm2, %v8302_v0  ;;  %4573 = vmatprep.subr.mxu0 %v6284_v13  ;;  %vm8493_vm2 = vcmp.eq.s32.totalorder %v8492_v17, %v5866_v8 }
  0xba   :  { %4599 = vmatpush3.msk.msra.mxu1 %vm8489_vm9, %v8302_v0  ;;  %4574 = vmatpush3.msra.mxu0 %v6305_v10  ;;  %vm8495_vm9 = vcmp.eq.s32.totalorder %v8494_v52, %v5866_v8  ;;  %v8496_v10 = vld [vmem:[#allocation22_spill] sm:$0xff] }
  0xbb   :  { %4600 = vmatprep.subr.msk.mxu1 %vm8491_vm6, %v8302_v0  ;;  %4575 = vmatprep.subr.mxu0 %v6320_v34  ;;  %vm8497_vm6 = vcmp.eq.s32.totalorder %v8496_v10, %v5866_v8  ;;  %v8498_v34 = vld [vmem:[#allocation23_spill] sm:$0xff] }
  0xbc   :  { %4601 = vmatpush3.msk.msra.mxu1 %vm8493_vm2, %v8302_v0  ;;  %4576 = vmatpush3.msra.mxu0 %v6353_v14  ;;  %vm8499_vm2 = vcmp.eq.s32.totalorder %v8498_v34, %v5866_v8 }
  0xbd   :  { %4602 = vmatprep.subr.msk.mxu1 %vm8495_vm9, %v8302_v0  ;;  %4577 = vmatprep.subr.mxu0 %v6362_v36  ;;  %vm8500_vm9 = vcmp.eq.s32.totalorder %v8313_v40, %v5866_v8 }
  0xbe   :  { %4603 = vmatpush3.msk.msra.mxu1 %vm8497_vm6, %v8302_v0  ;;  %4578 = vmatpush3.msra.mxu0 %v6435_v23  ;;  %vm8501_vm6 = vcmp.eq.s32.totalorder %v8315_v26, %v5866_v8 }
  0xbf   :  { %4604 = vmatprep.subr.msk.mxu1 %vm8499_vm2, %v8302_v0  ;;  %4579 = vmatprep.subr.mxu0 %v6437_v22  ;;  %vm8502_vm2 = vcmp.eq.s32.totalorder %v8317_v27, %v5866_v8 }
  0xc0   :  { %4605 = vmatpush3.msk.msra.mxu1 %vm1028_vm10, %v8302_v0  ;;  %4580 = vmatpush3.msra.mxu0 %v6452_v61 }
  0xc1   :  { %4606 = vmatprep.subr.msk.mxu1 %vm8500_vm9, %v8302_v0  ;;  %4581 = vmatprep.subr.mxu0 %v6464_v32  ;;  %vm8503_vm9 = vcmp.eq.s32.totalorder %v8319_v35, %v5866_v8 }
  0xc2   :  { %4607 = vmatpush3.msk.msra.mxu1 %vm8501_vm6, %v8302_v0  ;;  %4582 = vmatpush3.msra.mxu0 %v6495_v25  ;;  %vm8504_vm6 = vcmp.eq.s32.totalorder %v8321_v6, %v5866_v8 }
  0xc3   :  { %4608 = vmatprep.subr.msk.mxu1 %vm8502_vm2, %v8302_v0  ;;  %4583 = vmatprep.subr.mxu0 %v6504_v42  ;;  %vm8514_vm2 = vcmp.eq.s32.totalorder %v8427_v15, %v5866_v8 }
  0xc4   :  { %4609 = vmatpush3.msk.msra.mxu1 %vm8503_vm9, %v8302_v0  ;;  %4584 = vmatpush3.msra.mxu0 %v6542_v58  ;;  %v8505_v58 = vld [vmem:[#allocation32_spill] sm:$0xff]  ;;  %vm8516_vm9 = vcmp.eq.s32.totalorder %v8350_v29, %v5866_v8 }
  0xc5   :  { %4610 = vmatprep.subr.msk.mxu1 %vm8504_vm6, %v8302_v0  ;;  %4585 = vmatprep.subr.mxu0 %v6556_v21  ;;  %vm8522_vm6 = vcmp.eq.s32.totalorder %v8477_v63, %v5866_v8 }
  0xc6   :  { %4611 = vmatpush3.msk.msra.mxu1 %vm1025_vm11, %v8302_v0  ;;  %4586 = vmatpush3.msra.mxu0 %v6570_v20 }
  0xc7   :  { %4612 = vmatprep.subr.msk.mxu1 %vm1040_vm1, %v8302_v0  ;;  %4587 = vmatprep.subr.mxu0 %v6580_v12  ;;  %v8507_v12 = vand.u32 4294901760, %v5960_v39  ;;  %v8510_v39 = vand.u32 4294901760, %v8469_v48 }
  0xc8   :  { %4613 = vmatpush3.msk.msra.mxu1 %vm1024_vm13, %v8302_v0  ;;  %4588 = vmatpush3.msra.mxu0 %v6592_v44 }
  0xc9   :  { %1589 = vmatprep.mubr.f32.mxu0 %v6021_v59  ;;  %4614 = vmatprep.subr.msk.mxu1 %vm1039_vm15, %v8302_v0  ;;  %v8508_v59 = vand.u32 4294901760, %v5962_v37  ;;  %v1979_v37 = vsub.s32 2, %v8350_v29 }
  0xca   :  { %1592 = vmatmul.mubr.f32.vlgmr.msra.gmra.mxu0 %v6038_v50  ;;  %4615 = vmatpush3.msk.msra.mxu1 %vm1023_vm14, %v8302_v0  ;;  %v8509_v50 = vand.u32 4294901760, %v8468_v19  ;;  %v5003_v19 = vld [vmem:[%s8019_s2] sm:$0x7] }
  0xcb   :  { %4627 = vmatprep.subr.mxu0 %v8507_v12  ;;  %4616 = vmatprep.subr.msk.mxu1 %vm1038_vm7, %v8302_v0  ;;  %v8513_v12 = vand.u32 4294901760, %v8472_v47  ;;  %v6842_v48 = vrot.slane %v5003_v19, %v1979_v37  ;;  %v8518_v47 = vand.u32 4294901760, %v6099_v1  ;;  %v8523_v1 = vand.u32 4294901760, %v6161_v54 }
  0xcc   :  { %4628 = vmatpush3.msra.mxu0 %v8508_v59  ;;  %4617 = vmatpush3.msk.msra.mxu1 %vm1022_vm5, %v8302_v0  ;;  %v8511_v59 = vand.u32 4294901760, %v8470_v55  ;;  %v8515_v55 = vand.u32 4294901760, %v8473_v18  ;;  %v8520_v18 = vand.u32 4294901760, %v6101_v46  ;;  %v8525_v46 = vand.u32 4294901760, %v6163_v62 }
  0xcd   :  { %4629 = vmatprep.subr.mxu0 %v8509_v50  ;;  %4618 = vmatprep.subr.msk.mxu1 %vm8208_vm3, %v8302_v0  ;;  %v8512_v50 = vand.u32 4294901760, %v8471_v33  ;;  %v8517_v33 = vld [vmem:[#allocation36_spill] sm:$0xff]  ;;  %v8529_v54 = vand.u32 4294901760, %v6231_v38  ;;  %v8530_v62 = vmov 0.0   ;;  %vm8541_vm3 = vcmp.eq.s32.totalorder %v8492_v17, %v5866_v8 }
  0xce   :  { %4630 = vmatpush3.msra.mxu0 %v8510_v39  ;;  %4619 = vmatpush3.msk.msra.mxu1 %vm8207_vm4, %v8302_v0  ;;  %v8519_v39 = vld [vmem:[#allocation38_spill] sm:$0xff]  ;;  %vm8211_vm4 = vcmp.eq.s32.totalorder %v8484_v45, %v6842_v48 }
  0xcf   :  { %4631 = vmatprep.subr.mxu0 %v8511_v59  ;;  %4620 = vmatprep.subr.msk.mxu1 %vm8206_vm12, %v8302_v0  ;;  %v8521_v59 = vand.u32 4294901760, %v6103_v57  ;;  %v8527_v57 = vand.u32 4294901760, %v6229_v9  ;;  %v8532_v9 = vand.u32 4294901760, %v6266_v28  ;;  %vm8209_vm12 = vcmp.eq.s32.totalorder %v8481_v51, %v6842_v48  ;;  %v8536_v28 = vld [vmem:[#allocation39_spill] sm:$0xff] }
  0xd0   :  { %4632 = vmatpush3.msra.mxu0 %v8512_v50  ;;  %4621 = vmatpush3.msk.msra.mxu1 %vm8205_vm8, %v8302_v0  ;;  %vm8528_vm8 = vcmp.eq.s32.totalorder %v8482_v11, %v5866_v8  ;;  %v8534_v50 = vand.u32 4294901760, %v6284_v13  ;;  %v8539_v13 = vld [vmem:[#allocation40_spill] sm:$0xff] }
  0xd1   :  { %4633 = vmatprep.subr.mxu0 %v8513_v12  ;;  %4622 = vmatprep.subr.msk.mxu1 %vm8514_vm2, %v8302_v0  ;;  %vm8238_vm2 = vcmp.eq.s32.totalorder %v8476_v43, %v6842_v48  ;;  %v8537_v12 = vand.u32 4294901760, %v8536_v28 }
  0xd2   :  { %4634 = vmatpush3.msra.mxu0 %v8515_v55  ;;  %4623 = vmatpush3.msk.msra.mxu1 %vm8516_vm9, %v8302_v0  ;;  %vm8524_vm9 = vcmp.eq.s32.totalorder %v8479_v41, %v5866_v8  ;;  %v4180_v37 = vsel %vm8238_vm2, 1.0, %v8530_v62 }
  0xd3   :  { %1696 = vmatprep.mubr.f32.mxu1 %v8517_v33  ;;  %4635 = vmatprep.subr.mxu0 %v8518_v47  ;;  %v6914_v55 = vsub.f32 %v4180_v37, %v4180_v37  ;;  %v8540_v47 = vand.u32 4294901760, %v8539_v13 }
  0xd4   :  { %1700 = vmatmul.mubr.f32.vlgmr.msra.gmra.mxu1 %v8519_v39  ;;  %4636 = vmatpush3.msra.mxu0 %v8520_v18 }
  0xd5   :  { %4662 = vmatprep.subr.msk.mxu1 %vm1050_vm0, %v8302_v0  ;;  %4637 = vmatprep.subr.mxu0 %v8521_v59  ;;  %vm8231_vm0 = vcmp.eq.s32.totalorder %v8477_v63, %v6842_v48  ;;  %v8542_v59 = vand.u32 4294901760, %v6353_v14  ;;  %v8216_v37 = vand.u32 4294901760, %v6914_v55 }
  0xd6   :  { %4663 = vmatpush3.msk.msra.mxu1 %vm8522_vm6, %v8302_v0  ;;  %4638 = vmatpush3.msra.mxu0 %v8523_v1  ;;  %vm8526_vm6 = vcmp.eq.s32.totalorder %v8481_v51, %v5866_v8  ;;  %v4164_v38 = vsel %vm8231_vm0, 1.0, %v8530_v62  ;;  %v4163_v1 = vsel %vm8209_vm12, 1.0, %v8530_v62  ;;  %vm8235_vm12 = vcmp.eq.s32.totalorder %v8488_v49, %v6842_v48 }
  0xd7   :  { %4664 = vmatprep.subr.msk.mxu1 %vm8524_vm9, %v8302_v0  ;;  %4639 = vmatprep.subr.mxu0 %v8525_v46  ;;  %vm8212_vm9 = vcmp.eq.s32.totalorder %v8479_v41, %v6842_v48  ;;  %v6930_v18 = vsub.f32 %v4164_v38, %v4164_v38  ;;  %v8544_v46 = vand.u32 4294901760, %v6362_v36  ;;  %v8546_v36 = vand.u32 4294901760, %v6435_v23 }
  0xd8   :  { %4665 = vmatpush3.msk.msra.mxu1 %vm8526_vm6, %v8302_v0  ;;  %4640 = vmatpush3.msra.mxu0 %v8527_v57  ;;  %vm8531_vm6 = vcmp.eq.s32.totalorder %v8484_v45, %v5866_v8  ;;  %v4179_v19 = vsel %vm8212_vm9, 1.0, %v8530_v62  ;;  %vm8547_vm9 = vcmp.eq.s32.totalorder %v8498_v34, %v5866_v8  ;;  %v6979_v23 = vsub.f32 %v4163_v1, %v4163_v1 }
  0xd9   :  { %4666 = vmatprep.subr.msk.mxu1 %vm8528_vm8, %v8302_v0  ;;  %4641 = vmatprep.subr.mxu0 %v8529_v54  ;;  %vm8533_vm8 = vcmp.eq.s32.totalorder %v8486_v16, %v5866_v8  ;;  %v6948_v57 = vsub.f32 %v4179_v19, %v4179_v19  ;;  %v4162_v54 = vsel %vm8211_vm4, 1.0, %v8530_v62  ;;  %vm8213_vm4 = vcmp.eq.s32.totalorder %v8492_v17, %v6842_v48 }
  0xda   :  { %4667 = vmatpush3.msk.msra.mxu1 %vm8531_vm6, %v8302_v0  ;;  %4642 = vmatpush3.msra.mxu0 %v8532_v9  ;;  %vm8535_vm6 = vcmp.eq.s32.totalorder %v8488_v49, %v5866_v8  ;;  %v8548_v9 = vand.u32 4294901760, %v6437_v22  ;;  %v8215_v38 = vand.u32 4294901760, %v6930_v18  ;;  %v4161_v19 = vsel %vm8235_vm12, 1.0, %v8530_v62 }
  0xdb   :  { %4668 = vmatprep.subr.msk.mxu1 %vm8533_vm8, %v8302_v0  ;;  %4643 = vmatprep.subr.mxu0 %v8534_v50  ;;  %vm8210_vm8 = vcmp.eq.s32.totalorder %v8482_v11, %v6842_v48  ;;  %v8549_v50 = vand.u32 4294901760, %v6452_v61  ;;  %v7002_v61 = vsub.f32 %v4162_v54, %v4162_v54  ;;  %v8217_v1 = vand.u32 4294901760, %v6948_v57 }
  0xdc   :  { %4669 = vmatpush3.msk.msra.mxu1 %vm8535_vm6, %v8302_v0  ;;  %4644 = vmatpush3.msra.mxu0 %v8537_v12  ;;  %vm8538_vm6 = vcmp.eq.s32.totalorder %v8490_v3, %v5866_v8  ;;  %v4178_v14 = vsel %vm8210_vm8, 1.0, %v8530_v62  ;;  %vm8236_vm8 = vcmp.eq.s32.totalorder %v8490_v3, %v6842_v48  ;;  %v8551_v12 = vand.u32 4294901760, %v6464_v32 }
  0xdd   :  { %4670 = vmatprep.subr.msk.mxu1 %vm8538_vm6, %v8302_v0  ;;  %4645 = vmatprep.subr.mxu0 %v8540_v47  ;;  %vm8543_vm6 = vcmp.eq.s32.totalorder %v8494_v52, %v5866_v8  ;;  %v6988_v28 = vsub.f32 %v4178_v14, %v4178_v14  ;;  %v4176_v13 = vsel %vm8236_vm8, 1.0, %v8530_v62  ;;  %v4160_v47 = vsel %vm8213_vm4, 1.0, %v8530_v62 }
  0xde   :  { %4671 = vmatpush3.msk.msra.mxu1 %vm8541_vm3, %v8302_v0  ;;  %4646 = vmatpush3.msra.mxu0 %v8542_v59  ;;  %vm8234_vm3 = vcmp.eq.s32.totalorder %v8486_v16, %v6842_v48  ;;  %v8553_v32 = vand.u32 4294901760, %v6495_v25  ;;  %v7025_v59 = vsub.f32 %v6914_v55, %v8216_v37  ;;  %vm2006_vm4 = vcmp.eq.s32.totalorder %v8498_v34, %v6842_v48  ;;  %v8566_v37 = vld [vmem:[#allocation5_spill] sm:$0xff] }
  0xdf   :  { %4672 = vmatprep.subr.msk.mxu1 %vm8543_vm6, %v8302_v0  ;;  %4647 = vmatprep.subr.mxu0 %v8544_v46  ;;  %vm8545_vm6 = vcmp.eq.s32.totalorder %v8496_v10, %v5866_v8  ;;  %v4177_v22 = vsel %vm8234_vm3, 1.0, %v8530_v62  ;;  %v8555_v25 = vand.u32 4294901760, %v6504_v42  ;;  %v7047_v54 = vsub.f32 %v6930_v18, %v8215_v38  ;;  %v8558_v42 = vld [vmem:[#allocation8_spill] sm:$0xff] }
  0xe0   :  { %4673 = vmatpush3.msk.msra.mxu1 %vm8545_vm6, %v8302_v0  ;;  %4648 = vmatpush3.msra.mxu0 %v8546_v36  ;;  %vm8550_vm6 = vcmp.eq.s32.totalorder %v8313_v40, %v5866_v8  ;;  %v7038_v46 = vsub.f32 %v4177_v22, %v4177_v22  ;;  %v8218_v36 = vand.u32 4294901760, %v6979_v23  ;;  %v7058_v22 = vsub.f32 %v4176_v13, %v4176_v13 }
  0xe1   :  { %4674 = vmatprep.subr.msk.mxu1 %vm8547_vm9, %v8302_v0  ;;  %4649 = vmatprep.subr.mxu0 %v8548_v9  ;;  %vm8214_vm9 = vcmp.eq.s32.totalorder %v8494_v52, %v6842_v48  ;;  %v8559_v9 = vand.u32 4294901760, %v8558_v42  ;;  %v4174_v13 = vsel %vm2006_vm4, 1.0, %v8530_v62  ;;  %v8219_v42 = vand.u32 4294901760, %v7002_v61 }
  0xe2   :  { %4675 = vmatpush3.msk.msra.mxu1 %vm1028_vm10, %v8302_v0  ;;  %4650 = vmatpush3.msra.mxu0 %v8549_v50  ;;  %vm8552_vm10 = vcmp.eq.s32.totalorder %v8315_v26, %v5866_v8  ;;  %8556 = vst [vmem:[#allocation37_spill] sm:$0xff] %v7038_v46  ;;  %v4175_v14 = vsel %vm8214_vm9, 1.0, %v8530_v62  ;;  %v7056_v50 = vsub.f32 %v4161_v19, %v4161_v19  ;;  %8561 = vst [vmem:[#allocation28_spill] sm:$0xff] %v7058_v22 }
  0xe3   :  { %4676 = vmatprep.subr.msk.mxu1 %vm8550_vm6, %v8302_v0  ;;  %4651 = vmatprep.subr.mxu0 %v8551_v12  ;;  %vm1991_vm6 = vcmp.eq.s32.totalorder %v8496_v10, %v6842_v48  ;;  %v8220_v12 = vand.u32 4294901760, %v6988_v28  ;;  %vm8562_vm9 = vcmp.eq.s32.totalorder %v8321_v6, %v5866_v8  ;;  %v7090_v38 = vsub.f32 %v6948_v57, %v8217_v1  ;;  %v8569_v1 = vld [vmem:[#allocation25_spill] sm:$0xff] }
  0xe4   :  { %4677 = vmatpush3.msk.msra.mxu1 %vm8552_vm10, %v8302_v0  ;;  %4652 = vmatpush3.msra.mxu0 %v8553_v32  ;;  %vm8554_vm10 = vcmp.eq.s32.totalorder %v8317_v27, %v5866_v8  ;;  %8560 = vst [vmem:[#allocation26_spill] sm:$0xff] %v7056_v50  ;;  %v8563_v32 = vand.u32 4294901760, %v6556_v21  ;;  %v4159_v19 = vsel %vm1991_vm6, 1.0, %v8530_v62  ;;  %v8565_v21 = vand.u32 4294901760, %v6570_v20 }
  0xe5   :  { %4678 = vmatprep.subr.msk.mxu1 %vm8554_vm10, %v8302_v0  ;;  %4653 = vmatprep.subr.mxu0 %v8555_v25  ;;  %vm8557_vm10 = vcmp.eq.s32.totalorder %v8319_v35, %v5866_v8  ;;  %v7067_v25 = vsub.f32 %v4160_v47, %v4160_v47  ;;  %v8567_v20 = vand.u32 4294901760, %v8566_v37  ;;  %v8568_v37 = vand.u32 4294901760, %v6592_v44 }
  0xe6   :  { %4679 = vmatpush3.msk.msra.mxu1 %vm8557_vm10, %v8302_v0  ;;  %4654 = vmatpush3.msra.mxu0 %v8559_v9  ;;  %v8564_v9 = vld [vmem:[#allocation30_spill] sm:$0xff]  ;;  %v8571_v47 = vand.u32 4294901760, %v7038_v46  ;;  %v8572_v33 = vand.u32 4294901760, %v7056_v50  ;;  %vm8576_vm10 = vcmp.eq.s32.totalorder %v8481_v51, %v6842_v48 }
  0xe7   :  { %4680 = vmatprep.subr.msk.mxu1 %vm8562_vm9, %v8302_v0  ;;  %4655 = vmatprep.subr.mxu0 %v8563_v32  ;;  %v7085_v32 = vsub.f32 %v4175_v14, %v4175_v14  ;;  %vm1990_vm9 = vcmp.eq.s32.totalorder %v5108_v24, %v6842_v48  ;;  %v7104_v14 = vsub.f32 %v6979_v23, %v8218_v36 }
  0xe8   :  { %4681 = vmatpush3.msk.msra.mxu1 %vm1025_vm11, %v8302_v0  ;;  %4656 = vmatpush3.msra.mxu0 %v8565_v21  ;;  %vm8247_vm11 = vcmp.eq.s32.totalorder %v8313_v40, %v6842_v48  ;;  %v7117_v21 = vsub.f32 %v4174_v13, %v4174_v13  ;;  %v7122_v36 = vsub.f32 %v6988_v28, %v8220_v12  ;;  %v4158_v44 = vsel %vm1990_vm9, 1.0, %v8530_v62  ;;  %v8570_v13 = vld [vmem:[#allocation27_spill] sm:$0xff] }
  0xe9   :  { %4682 = vmatprep.subr.msk.mxu1 %vm1040_vm1, %v8302_v0  ;;  %4657 = vmatprep.subr.mxu0 %v8567_v20  ;;  %v7115_v20 = vsub.f32 %v4159_v19, %v4159_v19  ;;  %v7137_v19 = vsub.f32 %v7002_v61, %v8219_v42  ;;  %vm8248_vm1 = vcmp.eq.s32.totalorder %v8315_v26, %v6842_v48  ;;  %v4173_v42 = vsel %vm8247_vm11, 1.0, %v8530_v62 }
  0xea   :  { %4683 = vmatpush3.msk.msra.mxu1 %vm1024_vm13, %v8302_v0  ;;  %4658 = vmatpush3.msra.mxu0 %v8568_v37  ;;  %vm8249_vm13 = vcmp.eq.s32.totalorder %v8317_v27, %v6842_v48  ;;  %v7168_v39 = vsub.f32 %v7038_v46, %v8571_v47  ;;  %v7181_v37 = vsub.f32 %v4158_v44, %v4158_v44  ;;  %v4157_v47 = vsel %vm8248_vm1, 1.0, %v8530_v62 }
  0xeb   :  { %1866 = vmatprep.mubr.f32.mxu0 %v8569_v1  ;;  %4684 = vmatprep.subr.msk.mxu1 %vm1039_vm15, %v8302_v0  ;;  %vm8250_vm15 = vcmp.eq.s32.totalorder %v8319_v35, %v6842_v48  ;;  %v4172_v12 = vsel %vm8249_vm13, 1.0, %v8530_v62  ;;  %v7194_v63 = vsub.f32 %v7056_v50, %v8572_v33  ;;  %v7205_v43 = vsub.f32 %v4173_v42, %v4173_v42 }
  0xec   :  { %1868 = vmatmul.mubr.f32.vlgmr.msra.gmra.mxu0 %v8570_v13  ;;  %4685 = vmatpush3.msk.msra.mxu1 %vm1023_vm14, %v8302_v0  ;;  %vm8251_vm14 = vcmp.eq.s32.totalorder %v8321_v6, %v6842_v48  ;;  %v4156_v33 = vsel %vm8250_vm15, 1.0, %v8530_v62  ;;  %v8578_v42 = vand.u32 4294901760, %v7058_v22  ;;  %v8581_v50 = vand.u32 4294901760, %v7067_v25 }
  0xed   :  { %4697 = vmatprep.subr.msk.mxu0 %vm8238_vm2, %v8302_v0  ;;  %4686 = vmatprep.subr.msk.mxu1 %vm1038_vm7, %v8302_v0  ;;  %vm8573_vm7 = vcmp.eq.s32.totalorder %v8479_v41, %v6842_v48  ;;  %8575 = vst [vmem:[#allocation31_spill] sm:$0xff] %v7205_v43  ;;  %v4171_v46 = vsel %vm8251_vm14, 1.0, %v8530_v62  ;;  %v7259_v41 = vsub.f32 %v4156_v33, %v4156_v33  ;;  %v8586_v16 = vand.u32 4294901760, %v7085_v32 }
  0xee   :  { %4698 = vmatpush3.msk.msra.mxu0 %vm8231_vm0, %v8302_v0  ;;  %4687 = vmatpush3.msk.msra.mxu1 %vm1022_vm5, %v8302_v0  ;;  %vm8574_vm5 = vcmp.eq.s32.totalorder %v8419_v56, %v5866_v8  ;;  %v7223_v44 = vsub.f32 %v7058_v22, %v8578_v42  ;;  %v7240_v42 = vsub.f32 %v4157_v47, %v4157_v47 }
  0xef   :  { %4699 = vmatprep.subr.msk.mxu0 %vm8573_vm7, %v8302_v0  ;;  %4688 = vmatprep.subr.msk.mxu1 %vm8574_vm5, %v8302_v0  ;;  %vm8577_vm7 = vcmp.eq.s32.totalorder %v8345_v5, %v5866_v8  ;;  %vm1987_vm5 = vcmp.eq.s32.totalorder %v8564_v9, %v6842_v48  ;;  %v7243_v22 = vsub.f32 %v4172_v12, %v4172_v12  ;;  %v8718_v9 = vmov 0.0  }
  0xf0   :  { %4700 = vmatpush3.msk.msra.mxu0 %vm8576_vm10, %v8302_v0  ;;  %4689 = vmatpush3.msk.msra.mxu1 %vm8577_vm7, %v8302_v0  ;;  %vm8579_vm10 = vcmp.eq.s32.totalorder %v8482_v11, %v6842_v48  ;;  %vm8580_vm7 = vcmp.eq.s32.totalorder %v8348_v60, %v5866_v8  ;;  %v7248_v51 = vsub.f32 %v7067_v25, %v8581_v50  ;;  %v4155_v33 = vsel %vm1987_vm5, 1.0, %v8530_v62 }
  0xf1   :  { %4701 = vmatprep.subr.msk.mxu0 %vm8579_vm10, %v8302_v0  ;;  %4690 = vmatprep.subr.msk.mxu1 %vm8580_vm7, %v8302_v0  ;;  %vm8582_vm10 = vcmp.eq.s32.totalorder %v8484_v45, %v6842_v48  ;;  %vm8583_vm7 = vcmp.eq.s32.totalorder %v8352_v30, %v5866_v8  ;;  %vm2002_vm0 = vcmp.eq.s32.totalorder %v8325_v53, %v6842_v48  ;;  %v8597_v10 = vand.u32 4294901760, %v7240_v42  ;;  %v8717_v53 = vld [vmem:[#allocation27_spill] sm:$0xff] }
  0xf2   :  { %4702 = vmatpush3.msk.msra.mxu0 %vm8582_vm10, %v8302_v0  ;;  %4691 = vmatpush3.msk.msra.mxu1 %vm8583_vm7, %v8302_v0  ;;  %vm8584_vm10 = vcmp.eq.s32.totalorder %v8427_v15, %v5866_v8  ;;  %v7272_v12 = vsub.f32 %v4171_v46, %v4171_v46  ;;  %vm8585_vm7 = vcmp.eq.s32.totalorder %v8350_v29, %v5866_v8  ;;  %v8588_v8 = vand.u32 4294901760, %v7115_v20 }
  0xf3   :  { %4703 = vmatprep.subr.msk.mxu0 %vm8234_vm3, %v8302_v0  ;;  %4692 = vmatprep.subr.msk.mxu1 %vm8584_vm10, %v8302_v0  ;;  %v7292_v45 = vsub.f32 %v7085_v32, %v8586_v16  ;;  %vm1986_vm10 = vcmp.eq.s32.totalorder %v8505_v58, %v6842_v48  ;;  %vm2001_vm3 = vcmp.eq.s32.totalorder %v8506_v2, %v6842_v48  ;;  %v4170_v16 = vsel %vm2002_vm0, 1.0, %v8530_v62 }
  0xf4   :  { %4704 = vmatpush3.msk.msra.mxu0 %vm8235_vm12, %v8302_v0  ;;  %4693 = vmatpush3.msk.msra.mxu1 %vm8585_vm7, %v8302_v0  ;;  %vm1985_vm7 = vcmp.eq.s32.totalorder %v8414_v31, %v6842_v48  ;;  %vm8587_vm12 = vcmp.eq.s32.totalorder %v8492_v17, %v6842_v48  ;;  %v7316_v50 = vsub.f32 %v4155_v33, %v4155_v33  ;;  %v8589_v46 = vand.u32 4294901760, %v7025_v59 }
  0xf5   :  { %1970 = vmatprep.mubr.f32.mxu1 %v8569_v1  ;;  %4705 = vmatprep.subr.msk.mxu0 %vm8236_vm8, %v8302_v0  ;;  %v7321_v47 = vsub.f32 %v7115_v20, %v8588_v8  ;;  %vm2000_vm8 = vcmp.eq.s32.totalorder %v8337_v7, %v6842_v48  ;;  %vm8590_vm2 = vcmp.eq.s32.totalorder %v8494_v52, %v6842_v48  ;;  %v4154_v33 = vsel %vm1986_vm10, 1.0, %v8530_v62 }
  0xf6   :  { %1972 = vmatmul.mubr.f32.vlgmr.msra.gmra.mxu1 %v8570_v13  ;;  %4706 = vmatpush3.msk.msra.mxu0 %vm8587_vm12, %v8302_v0  ;;  %v8591_v8 = vand.u32 4294901760, %v7117_v21  ;;  %v4169_v59 = vsel %vm2001_vm3, 1.0, %v8530_v62  ;;  %v8593_v52 = vand.u32 4294901760, %v7047_v54  ;;  %v7357_v49 = vsub.f32 %v4170_v16, %v4170_v16 }
  0xf7   :  { %4732 = vmatprep.subr.mxu1 %v8589_v46  ;;  %4707 = vmatprep.subr.msk.mxu0 %vm8590_vm2, %v8302_v0  ;;  %v8592_v46 = vand.u32 4294901760, %v7181_v37  ;;  %v4153_v11 = vsel %vm1985_vm7, 1.0, %v8530_v62  ;;  %vm1984_vm12 = vcmp.eq.s32.totalorder %v8339_v4, %v6842_v48  ;;  %v8594_v54 = vand.u32 4294901760, %v7090_v38 }
  0xf8   :  { %v7339_v17 = vsub.f32 %v7117_v21, %v8591_v8  ;;  %4733 = vmatpush3.msra.mxu1 %v8593_v52  ;;  %4708 = vmatpush3.msk.msra.mxu0 %vm1991_vm6, %v8302_v0  ;;  %v2341_v8 = vand.u32 4294901760, %v7292_v45  ;;  %v8595_v52 = vand.u32 4294901760, %v7205_v43  ;;  %v4168_v16 = vsel %vm2000_vm8, 1.0, %v8530_v62 }
  0xf9   :  { %v7348_v3 = vsub.f32 %v7181_v37, %v8592_v46  ;;  %4734 = vmatprep.subr.mxu1 %v8594_v54  ;;  %4709 = vmatprep.subr.msk.mxu0 %vm2006_vm4, %v8302_v0  ;;  %vm1999_vm2 = vcmp.eq.s32.totalorder %v8419_v56, %v6842_v48  ;;  %v8596_v38 = vand.u32 4294901760, %v7104_v14  ;;  %v2229_v54 = vand.u32 4294901760, %v7321_v47 }
  0xfa   :  { %v7374_v45 = vsub.f32 %v7205_v43, %v8595_v52  ;;  %4710 = vmatpush3.msk.msra.mxu0 %vm1990_vm9, %v8302_v0  ;;  %v7390_v52 = vsub.f32 %v4154_v33, %v4154_v33  ;;  %v7392_v34 = vsub.f32 %v4169_v59, %v4169_v59  ;;  %v7397_v46 = vsub.f32 %v7240_v42, %v8597_v10 }
  0xfb   :  { %4735 = vmatpush3.msra.mxu1 %v8596_v38  ;;  %v8598_v43 = vand.u32 4294901760, %v7122_v36  ;;  %4711 = vmatprep.subr.msk.mxu0 %vm8247_vm11, %v8302_v0  ;;  %v2348_v14 = vand.u32 4294901760, %v7339_v17  ;;  %v2236_v47 = vand.u32 4294901760, %v7348_v3  ;;  %v7407_v33 = vsub.f32 %v4153_v11, %v4153_v11 }
  0xfc   :  { %v4152_v10 = vsel %vm1984_vm12, 1.0, %v8530_v62  ;;  %v8599_v59 = vand.u32 4294901760, %v7137_v19  ;;  %4712 = vmatpush3.msk.msra.mxu0 %vm8248_vm1, %v8302_v0  ;;  %v4167_v3 = vsel %vm1999_vm2, 1.0, %v8530_v62  ;;  %v8252_v17 = vand.u32 4294901760, %v7259_v41  ;;  %2414 = vmatprep.mubr.f32.mxu1 %v8569_v1  ;;  %v8655_v1 = vld [vmem:[#allocation29_spill] sm:$0xff] }
  0xfd   :  { %4736 = vmatprep.subr.mxu1 %v8598_v43  ;;  %v7419_v43 = vsub.f32 %v4168_v16, %v4168_v16  ;;  %vm1983_vm11 = vcmp.eq.s32.totalorder %v8345_v5, %v6842_v48  ;;  %v8600_v11 = vand.u32 4294901760, %v7168_v39  ;;  %4713 = vmatprep.subr.msk.mxu0 %vm8249_vm13, %v8302_v0  ;;  %v2355_v36 = vand.u32 4294901760, %v7374_v45 }
  0xfe   :  { %4737 = vmatpush3.msra.mxu1 %v8599_v59  ;;  %v8601_v19 = vand.u32 4294901760, %v7243_v22  ;;  %v8253_v38 = vand.u32 4294901760, %v7272_v12  ;;  %vm1998_vm1 = vcmp.eq.s32.totalorder %v8348_v60, %v6842_v48  ;;  %v8602_v59 = vand.u32 4294901760, %v7194_v63  ;;  %4714 = vmatpush3.msk.msra.mxu0 %vm8250_vm15, %v8302_v0 }
  0xff   :  { %4738 = vmatprep.subr.mxu1 %v8600_v11  ;;  %v2243_v39 = vand.u32 4294901760, %v7397_v46  ;;  %v7448_v45 = vsub.f32 %v4152_v10, %v4152_v10  ;;  %v8254_v11 = vand.u32 4294901760, %v7316_v50  ;;  %vm8262_vm13 = vcmp.eq.s32.totalorder %v8352_v30, %v6842_v48  ;;  %4715 = vmatprep.subr.msk.mxu0 %vm8251_vm14, %v8302_v0 }
 0x100   :  { %v2361_v16 = vsub.f32 %v7243_v22, %v8601_v19  ;;  %4739 = vmatpush3.msra.mxu1 %v8602_v59  ;;  %v8603_v19 = vand.u32 4294901760, %v7223_v44  ;;  %v7459_v63 = vsub.f32 %v4167_v3, %v4167_v3  ;;  %v4151_v46 = vsel %vm1983_vm11, 1.0, %v8530_v62  ;;  %4716 = vmatpush3.msk.msra.mxu0 %vm1987_vm5, %v8302_v0 }
 0x101   :  { %vm8261_vm15 = vcmp.eq.s32.totalorder %v8427_v15, %v6842_v48  ;;  %v8604_v44 = vand.u32 4294901760, %v7248_v51  ;;  %v2249_v3 = vsub.f32 %v7259_v41, %v8252_v17  ;;  %v4166_v59 = vsel %vm1998_vm1, 1.0, %v8530_v62  ;;  %4717 = vmatprep.subr.msk.mxu0 %vm2002_vm0, %v8302_v0 }
 0x102   :  { %4740 = vmatprep.subr.mxu1 %v8603_v19  ;;  %vm8260_vm14 = vcmp.eq.s32.totalorder %v8350_v29, %v6842_v48  ;;  %v2362_v51 = vand.u32 4294901760, %v2361_v16  ;;  %v4150_v17 = vsel %vm8262_vm13, 1.0, %v8530_v62  ;;  %4718 = vmatpush3.msk.msra.mxu0 %vm1986_vm10, %v8302_v0  ;;  %v2256_v16 = vsub.f32 %v7316_v50, %v8254_v11  ;;  %v8620_v29 = vld [vmem:[#allocation34_spill] sm:$0xff] }
 0x103   :  { %4741 = vmatpush3.msra.mxu1 %v8604_v44  ;;  %v2368_v44 = vsub.f32 %v7272_v12, %v8253_v38  ;;  %v4165_v38 = vsel %vm8261_vm15, 1.0, %v8530_v62  ;;  %4719 = vmatprep.subr.msk.mxu0 %vm2001_vm3, %v8302_v0  ;;  %v4149_v11 = vsel %vm8260_vm14, 1.0, %v8530_v62  ;;  %v8607_v10 = vand.u32 4294901760, %v7390_v52 }
 0x104   :  { %4742 = vmatprep.subr.mxu1 %v2341_v8  ;;  %v7500_v8 = vsub.f32 %v4151_v46, %v4151_v46  ;;  %v8605_v46 = vand.u32 4294901760, %v7357_v49  ;;  %4720 = vmatpush3.msk.msra.mxu0 %vm1985_vm7, %v8302_v0  ;;  %v7538_v58 = vsub.f32 %v4165_v38, %v4165_v38  ;;  %v8609_v62 = vand.u32 4294901760, %v7392_v34 }
 0x105   :  { %4743 = vmatpush3.msra.mxu1 %v2229_v54  ;;  %v7514_v54 = vsub.f32 %v4166_v59, %v4166_v59  ;;  %v7528_v59 = vsub.f32 %v4150_v17, %v4150_v17  ;;  %4721 = vmatprep.subr.msk.mxu0 %vm2000_vm8, %v8302_v0  ;;  %v8610_v2 = vand.u32 4294901760, %v7407_v33  ;;  %v8703_v24 = vand.u32 4294901760, %v7448_v45 }
 0x106   :  { %4744 = vmatprep.subr.mxu1 %v2348_v14  ;;  %v2375_v19 = vsub.f32 %v7357_v49, %v8605_v46  ;;  %v2250_v14 = vand.u32 4294901760, %v2249_v3  ;;  %v2263_v46 = vsub.f32 %v7390_v52, %v8607_v10  ;;  %8608 = vst [vmem:[#allocation24_spill] sm:$0xff] %v7538_v58  ;;  %v2382_v17 = vsub.f32 %v7392_v34, %v8609_v62 }
 0x107   :  { %4745 = vmatpush3.msra.mxu1 %v2236_v47  ;;  %8606 = vst [vmem:[#allocation9_spill] sm:$0xff] %v7528_v59  ;;  %v2369_v47 = vand.u32 4294901760, %v2368_v44  ;;  %4722 = vmatpush3.msk.msra.mxu0 %vm1984_vm12, %v8302_v0  ;;  %v7548_v10 = vsub.f32 %v4149_v11, %v4149_v11  ;;  %v2270_v38 = vsub.f32 %v7407_v33, %v8610_v2  ;;  %v8617_v44 = vld [vmem:[#allocation6_spill] sm:$0xff] }
 0x108   :  { %4746 = vmatprep.subr.mxu1 %v2355_v36  ;;  %v2257_v36 = vand.u32 4294901760, %v2256_v16  ;;  %4723 = vmatprep.subr.msk.mxu0 %vm1999_vm2, %v8302_v0  ;;  %v2376_v62 = vand.u32 4294901760, %v2375_v19  ;;  %v2264_v2 = vand.u32 4294901760, %v2263_v46  ;;  %v2383_v19 = vand.u32 4294901760, %v2382_v17 }
 0x109   :  { %4747 = vmatpush3.msra.mxu1 %v2243_v39  ;;  %v8611_v39 = vand.u32 4294901760, %v7419_v43  ;;  %4724 = vmatpush3.msk.msra.mxu0 %vm1983_vm11, %v8302_v0  ;;  %v2271_v46 = vand.u32 4294901760, %v2270_v38 }
 0x10a   :  { %4748 = vmatprep.subr.mxu1 %v2362_v51  ;;  %v8612_v51 = vand.u32 4294901760, %v7448_v45  ;;  %4725 = vmatprep.subr.msk.mxu0 %vm1998_vm1, %v8302_v0 }
 0x10b   :  { %v2389_v3 = vsub.f32 %v7419_v43, %v8611_v39  ;;  %4749 = vmatpush3.msra.mxu1 %v2250_v14  ;;  %v8613_v14 = vand.u32 4294901760, %v7459_v63  ;;  %4726 = vmatpush3.msk.msra.mxu0 %vm8262_vm13, %v8302_v0 }
 0x10c   :  { %v2277_v16 = vsub.f32 %v7448_v45, %v8612_v51  ;;  %4750 = vmatprep.subr.mxu1 %v2369_v47  ;;  %v8614_v47 = vand.u32 4294901760, %v7500_v8  ;;  %4727 = vmatprep.subr.msk.mxu0 %vm8261_vm15, %v8302_v0 }
 0x10d   :  { %v2396_v39 = vsub.f32 %v7459_v63, %v8613_v14  ;;  %4751 = vmatpush3.msra.mxu1 %v2257_v36  ;;  %v2390_v17 = vand.u32 4294901760, %v2389_v3  ;;  %v8615_v36 = vand.u32 4294901760, %v7514_v54  ;;  %4728 = vmatpush3.msk.msra.mxu0 %vm8260_vm14, %v8302_v0  ;;  %v8618_v3 = vand.u32 4294901760, %v7538_v58 }
 0x10e   :  { %v2284_v51 = vsub.f32 %v7500_v8, %v8614_v47  ;;  %4752 = vmatprep.subr.mxu1 %v2376_v62  ;;  %v2278_v38 = vand.u32 4294901760, %v2277_v16  ;;  %v8616_v47 = vand.u32 4294901760, %v7528_v59  ;;  %2178 = vmatprep.mubr.f32.mxu0 %v8617_v44 }
 0x10f   :  { %v2403_v14 = vsub.f32 %v7514_v54, %v8615_v36  ;;  %4753 = vmatpush3.msra.mxu1 %v2264_v2  ;;  %v2397_v11 = vand.u32 4294901760, %v2396_v39  ;;  %v2410_v15 = vsub.f32 %v7538_v58, %v8618_v3  ;;  %4767 = vmatprep.subr.mxu0 %v6914_v55  ;;  %v8619_v36 = vand.u32 4294901760, %v7548_v10  ;;  %v8635_v3 = vld [vmem:[#allocation16_spill] sm:$0xff] }
 0x110   :  { %v2291_v62 = vsub.f32 %v7528_v59, %v8616_v47  ;;  %4754 = vmatprep.subr.mxu1 %v2383_v19  ;;  %v2285_v2 = vand.u32 4294901760, %v2284_v51  ;;  %2184 = vmatmul.mubr.f32.vlgmr.msra.gmra.mxu0 %v8620_v29  ;;  %v8621_v29 = vld [vmem:[#allocation37_spill] sm:$0xff]  ;;  %v8623_v51 = vld [vmem:[#allocation28_spill] sm:$0xff] }
 0x111   :  { %4755 = vmatpush3.msra.mxu1 %v2271_v46  ;;  %v2298_v16 = vsub.f32 %v7548_v10, %v8619_v36  ;;  %v2404_v47 = vand.u32 4294901760, %v2403_v14  ;;  %4768 = vmatpush3.msra.mxu0 %v6930_v18  ;;  %v2411_v19 = vand.u32 4294901760, %v2410_v15  ;;  %v8622_v46 = vld [vmem:[#allocation26_spill] sm:$0xff]  ;;  %v8624_v15 = vld [vmem:[#allocation11_spill] sm:$0xff] }
 0x112   :  { %4756 = vmatprep.subr.mxu1 %v2390_v17  ;;  %v2292_v44 = vand.u32 4294901760, %v2291_v62  ;;  %4769 = vmatprep.subr.mxu0 %v6948_v57  ;;  %vm8625_vm14 = vcmp.eq.s32.totalorder %v8624_v15, %v6842_v48  ;;  %v8628_v17 = vld [vmem:[#allocation13_spill] sm:$0xff]  ;;  %v8630_v14 = vld [vmem:[#allocation14_spill] sm:$0xff]  ;;  %v8634_v62 = vld [vmem:[#allocation31_spill] sm:$0xff] }
 0x113   :  { %4757 = vmatpush3.msra.mxu1 %v2278_v38  ;;  %4770 = vmatpush3.msra.mxu0 %v6979_v23  ;;  %v2299_v39 = vand.u32 4294901760, %v2298_v16  ;;  %vm8629_vm13 = vcmp.eq.s32.totalorder %v8628_v17, %v6842_v48  ;;  %v8632_v38 = vld [vmem:[#allocation15_spill] sm:$0xff]  ;;  %v8639_v36 = vld [vmem:[#allocation18_spill] sm:$0xff] }
 0x114   :  { %4758 = vmatprep.subr.mxu1 %v2397_v11  ;;  %4771 = vmatprep.subr.mxu0 %v6988_v28  ;;  %v8626_v11 = vld [vmem:[#allocation12_spill] sm:$0xff]  ;;  %v8641_v16 = vld [vmem:[#allocation19_spill] sm:$0xff] }
 0x115   :  { %4759 = vmatpush3.msra.mxu1 %v2285_v2  ;;  %4772 = vmatpush3.msra.mxu0 %v7002_v61  ;;  %vm8627_vm15 = vcmp.eq.s32.totalorder %v8626_v11, %v6842_v48  ;;  %v8637_v2 = vld [vmem:[#allocation17_spill] sm:$0xff] }
 0x116   :  { %4760 = vmatprep.subr.mxu1 %v2404_v47  ;;  %4773 = vmatprep.subr.mxu0 %v8621_v29  ;;  %v8643_v47 = vld [vmem:[#allocation20_spill] sm:$0xff] }
 0x117   :  { %4761 = vmatpush3.msra.mxu1 %v2292_v44  ;;  %4774 = vmatpush3.msra.mxu0 %v8622_v46  ;;  %v8645_v44 = vld [vmem:[#allocation21_spill] sm:$0xff] }
 0x118   :  { %4762 = vmatprep.subr.mxu1 %v2411_v19  ;;  %4775 = vmatprep.subr.mxu0 %v8623_v51  ;;  %v8713_v19 = vld [vmem:[#allocation24_spill] sm:$0xff] }
 0x119   :  { %4763 = vmatpush3.msra.mxu1 %v2299_v39  ;;  %4776 = vmatpush3.msra.mxu0 %v7067_v25 }
 0x11a   :  { %4802 = vmatprep.subr.msk.mxu1 %vm8625_vm14, %v8302_v0  ;;  %2416 = vmatmul.mubr.f32.vlgmr.msra.gmra.mxu1 %v8570_v13  ;;  %vm8631_vm14 = vcmp.eq.s32.totalorder %v8630_v14, %v6842_v48 }
 0x11b   :  { %4777 = vmatprep.subr.mxu0 %v7085_v32  ;;  %4803 = vmatpush3.msk.msra.mxu1 %vm8627_vm15, %v8302_v0  ;;  %vm8633_vm15 = vcmp.eq.s32.totalorder %v8632_v38, %v6842_v48 }
 0x11c   :  { %4778 = vmatpush3.msra.mxu0 %v7115_v20  ;;  %4804 = vmatprep.subr.msk.mxu1 %vm8629_vm13, %v8302_v0  ;;  %vm8636_vm13 = vcmp.eq.s32.totalorder %v8635_v3, %v6842_v48 }
 0x11d   :  { %4779 = vmatprep.subr.mxu0 %v7117_v21  ;;  %4805 = vmatpush3.msk.msra.mxu1 %vm8631_vm14, %v8302_v0  ;;  %vm8638_vm14 = vcmp.eq.s32.totalorder %v8637_v2, %v6842_v48 }
 0x11e   :  { %4780 = vmatpush3.msra.mxu0 %v7181_v37  ;;  %4806 = vmatprep.subr.msk.mxu1 %vm8633_vm15, %v8302_v0  ;;  %vm8640_vm15 = vcmp.eq.s32.totalorder %v8639_v36, %v6842_v48 }
 0x11f   :  { %4781 = vmatprep.subr.mxu0 %v8634_v62  ;;  %4807 = vmatpush3.msk.msra.mxu1 %vm8636_vm13, %v8302_v0  ;;  %vm8642_vm13 = vcmp.eq.s32.totalorder %v8641_v16, %v6842_v48 }
 0x120   :  { %4782 = vmatpush3.msra.mxu0 %v7240_v42  ;;  %4808 = vmatprep.subr.msk.mxu1 %vm8638_vm14, %v8302_v0  ;;  %vm8644_vm14 = vcmp.eq.s32.totalorder %v8643_v47, %v6842_v48 }
 0x121   :  { %4783 = vmatprep.subr.mxu0 %v7243_v22  ;;  %4809 = vmatpush3.msk.msra.mxu1 %vm8640_vm15, %v8302_v0  ;;  %vm8646_vm15 = vcmp.eq.s32.totalorder %v8645_v44, %v6842_v48 }
 0x122   :  { %4784 = vmatpush3.msra.mxu0 %v7259_v41  ;;  %4810 = vmatprep.subr.msk.mxu1 %vm8642_vm13, %v8302_v0  ;;  %vm8649_vm13 = vcmp.eq.s32.totalorder %v8313_v40, %v6842_v48 }
 0x123   :  { %4785 = vmatprep.subr.mxu0 %v7272_v12  ;;  %4811 = vmatpush3.msk.msra.mxu1 %vm8644_vm14, %v8302_v0  ;;  %vm8650_vm14 = vcmp.eq.s32.totalorder %v8315_v26, %v6842_v48 }
 0x124   :  { %4786 = vmatpush3.msra.mxu0 %v7316_v50  ;;  %4812 = vmatprep.subr.msk.mxu1 %vm8646_vm15, %v8302_v0  ;;  %vm8651_vm15 = vcmp.eq.s32.totalorder %v8317_v27, %v6842_v48 }
 0x125   :  { %4787 = vmatprep.subr.mxu0 %v7357_v49  ;;  %4813 = vmatpush3.msk.msra.mxu1 %vm1991_vm6, %v8302_v0 }
 0x126   :  { %4788 = vmatpush3.msra.mxu0 %v7390_v52  ;;  %4814 = vmatprep.subr.msk.mxu1 %vm2006_vm4, %v8302_v0 }
 0x127   :  { %4789 = vmatprep.subr.mxu0 %v7392_v34  ;;  %4815 = vmatpush3.msk.msra.mxu1 %vm1990_vm9, %v8302_v0 }
 0x128   :  { %4790 = vmatpush3.msra.mxu0 %v7407_v33  ;;  %4816 = vmatprep.subr.msk.mxu1 %vm8649_vm13, %v8302_v0  ;;  %vm8652_vm13 = vcmp.eq.s32.totalorder %v8319_v35, %v6842_v48 }
 0x129   :  { %4791 = vmatprep.subr.mxu0 %v7419_v43  ;;  %4817 = vmatpush3.msk.msra.mxu1 %vm8650_vm14, %v8302_v0  ;;  %vm8653_vm14 = vcmp.eq.s32.totalorder %v8321_v6, %v6842_v48 }
 0x12a   :  { %4792 = vmatpush3.msra.mxu0 %v7448_v45  ;;  %4818 = vmatprep.subr.msk.mxu1 %vm8651_vm15, %v8302_v0  ;;  %vm8664_vm15 = vcmp.eq.s32.totalorder %v8352_v30, %v6842_v48 }
 0x12b   :  { %4793 = vmatprep.subr.mxu0 %v7459_v63  ;;  %4819 = vmatpush3.msk.msra.mxu1 %vm8652_vm13, %v8302_v0 }
 0x12c   :  { %4794 = vmatpush3.msra.mxu0 %v7500_v8  ;;  %4820 = vmatprep.subr.msk.mxu1 %vm8653_vm14, %v8302_v0 }
 0x12d   :  { %4795 = vmatprep.subr.mxu0 %v7514_v54  ;;  %4821 = vmatpush3.msk.msra.mxu1 %vm1987_vm5, %v8302_v0 }
 0x12e   :  { %4796 = vmatpush3.msra.mxu0 %v7528_v59  ;;  %4822 = vmatprep.subr.msk.mxu1 %vm2002_vm0, %v8302_v0  ;;  %v8657_v59 = vld [vmem:[#allocation10_spill] sm:$0xff] }
 0x12f   :  { %4797 = vmatprep.subr.mxu0 %v7538_v58  ;;  %4823 = vmatpush3.msk.msra.mxu1 %vm1986_vm10, %v8302_v0  ;;  %v8658_v58 = vand.u32 4294901760, %v6914_v55  ;;  %v8662_v55 = vand.u32 4294901760, %v6988_v28  ;;  %v8668_v28 = vand.u32 4294901760, %v8622_v46  ;;  %v8676_v46 = vand.u32 4294901760, %v7085_v32 }
 0x130   :  { %4798 = vmatpush3.msra.mxu0 %v7548_v10  ;;  %2551 = vmatprep.mubr.f32.mxu0 %v8655_v1  ;;  %v8659_v1 = vand.u32 4294901760, %v6930_v18  ;;  %v8663_v18 = vand.u32 4294901760, %v7002_v61  ;;  %v8671_v61 = vld [vmem:[#allocation36_spill] sm:$0xff]  ;;  %v8682_v32 = vand.u32 4294901760, %v7181_v37  ;;  %v8688_v37 = vand.u32 4294901760, %v7243_v22 }
 0x131   :  { %4824 = vmatprep.subr.msk.mxu1 %vm2001_vm3, %v8302_v0  ;;  %2554 = vmatmul.mubr.f32.vlgmr.msra.gmra.mxu0 %v8657_v59  ;;  %v8660_v59 = vand.u32 4294901760, %v6948_v57  ;;  %v8665_v57 = vand.u32 4294901760, %v8621_v29  ;;  %v8673_v29 = vld [vmem:[#allocation38_spill] sm:$0xff]  ;;  %v8694_v22 = vand.u32 4294901760, %v7316_v50  ;;  %v8698_v50 = vand.u32 4294901760, %v7392_v34 }
 0x132   :  { %4825 = vmatpush3.msk.msra.mxu1 %vm1985_vm7, %v8302_v0  ;;  %4837 = vmatprep.subr.mxu0 %v8658_v58  ;;  %v8661_v58 = vand.u32 4294901760, %v6979_v23  ;;  %v8666_v23 = vld [vmem:[#allocation41_spill] sm:$0xff] }
 0x133   :  { %4826 = vmatprep.subr.msk.mxu1 %vm2000_vm8, %v8302_v0  ;;  %4838 = vmatpush3.msra.mxu0 %v8659_v1  ;;  %vm8667_vm13 = vcmp.eq.s32.totalorder %v8666_v23, %v6842_v48  ;;  %v8669_v1 = vld [vmem:[#allocation7_spill] sm:$0xff] }
 0x134   :  { %4827 = vmatpush3.msk.msra.mxu1 %vm1984_vm12, %v8302_v0  ;;  %4839 = vmatprep.subr.mxu0 %v8660_v59  ;;  %vm8670_vm14 = vcmp.eq.s32.totalorder %v8669_v1, %v6842_v48  ;;  %v8672_v59 = vand.u32 4294901760, %v8623_v51  ;;  %v8678_v51 = vand.u32 4294901760, %v7115_v20  ;;  %v8684_v20 = vand.u32 4294901760, %v8634_v62 }
 0x135   :  { %4828 = vmatprep.subr.msk.mxu1 %vm1999_vm2, %v8302_v0  ;;  %4840 = vmatpush3.msra.mxu0 %v8661_v58  ;;  %v8674_v58 = vand.u32 4294901760, %v7067_v25  ;;  %v8680_v25 = vand.u32 4294901760, %v7117_v21  ;;  %v8686_v21 = vand.u32 4294901760, %v7240_v42  ;;  %v8692_v42 = vand.u32 4294901760, %v7272_v12 }
 0x136   :  { %4829 = vmatpush3.msk.msra.mxu1 %vm1983_vm11, %v8302_v0  ;;  %4841 = vmatprep.subr.mxu0 %v8662_v55  ;;  %v4309_v55 = vpop.f32.mrf.mxu0 }
 0x137   :  { %4830 = vmatprep.subr.msk.mxu1 %vm1998_vm1, %v8302_v0  ;;  %4842 = vmatpush3.msra.mxu0 %v8663_v18 }
 0x138   :  { %4831 = vmatpush3.msk.msra.mxu1 %vm8664_vm15, %v8302_v0  ;;  %4843 = vmatprep.subr.mxu0 %v8665_v57  ;;  %vm8675_vm15 = vcmp.eq.s32.totalorder %v8624_v15, %v6842_v48  ;;  %v4310_v15 = vpop.f32.mrf.mxu0 }
 0x139   :  { %4832 = vmatprep.subr.msk.mxu1 %vm8667_vm13, %v8302_v0  ;;  %4844 = vmatpush3.msra.mxu0 %v8668_v28  ;;  %vm8677_vm13 = vcmp.eq.s32.totalorder %v8626_v11, %v6842_v48  ;;  %v4344_v11 = vpop.f32.mrf.mxu1  ;;  %v8716_v28 = vld [vmem:[#allocation25_spill] sm:$0xff] }
 0x13a   :  { %4833 = vmatpush3.msk.msra.mxu1 %vm8670_vm14, %v8302_v0  ;;  %2658 = vmatprep.mubr.f32.mxu1 %v8671_v61  ;;  %vm8679_vm14 = vcmp.eq.s32.totalorder %v8628_v17, %v6842_v48  ;;  %v4379_v17 = vpop.f32.mrf.mxu0 }
 0x13b   :  { %4845 = vmatprep.subr.mxu0 %v8672_v59  ;;  %2662 = vmatmul.mubr.f32.vlgmr.msra.gmra.mxu1 %v8673_v29 }
 0x13c   :  { %4846 = vmatpush3.msra.mxu0 %v8674_v58  ;;  %4872 = vmatprep.subr.msk.mxu1 %vm8675_vm15, %v8302_v0  ;;  %vm8681_vm15 = vcmp.eq.s32.totalorder %v8630_v14, %v6842_v48  ;;  %v8690_v14 = vand.u32 4294901760, %v7259_v41  ;;  %v8696_v41 = vand.u32 4294901760, %v7357_v49  ;;  %v4380_v62 = vpop.f32.mrf.mxu0  ;;  %v8699_v49 = vand.u32 4294901760, %v7407_v33 }
 0x13d   :  { %4847 = vmatprep.subr.mxu0 %v8676_v46  ;;  %4873 = vmatpush3.msk.msra.mxu1 %vm8677_vm13, %v8302_v0  ;;  %vm8683_vm13 = vcmp.eq.s32.totalorder %v8632_v38, %v6842_v48  ;;  %v4345_v38 = vpop.f32.mrf.mxu1  ;;  %v4311_v33 = vadd.f32 %v4310_v15, %v4309_v55 }
 0x13e   :  { %4848 = vmatpush3.msra.mxu0 %v8678_v51  ;;  %4874 = vmatprep.subr.msk.mxu1 %vm8679_vm14, %v8302_v0  ;;  %vm8685_vm14 = vcmp.eq.s32.totalorder %v8635_v3, %v6842_v48  ;;  %v8697_v3 = vand.u32 4294901760, %v7390_v52  ;;  %v8701_v52 = vand.u32 4294901760, %v7419_v43 }
 0x13f   :  { %4849 = vmatprep.subr.mxu0 %v8680_v25  ;;  %4875 = vmatpush3.msk.msra.mxu1 %vm8681_vm15, %v8302_v0  ;;  %vm8687_vm15 = vcmp.eq.s32.totalorder %v8637_v2, %v6842_v48  ;;  %v4414_v12 = vpop.f32.mrf.mxu1 }
 0x140   :  { %4850 = vmatpush3.msra.mxu0 %v8682_v32  ;;  %4876 = vmatprep.subr.msk.mxu1 %vm8683_vm13, %v8302_v0  ;;  %vm8689_vm13 = vcmp.eq.s32.totalorder %v8639_v36, %v6842_v48  ;;  %v4346_v36 = vadd.f32 %v4345_v38, %v4344_v11 }
 0x141   :  { %4851 = vmatprep.subr.mxu0 %v8684_v20  ;;  %4877 = vmatpush3.msk.msra.mxu1 %vm8685_vm14, %v8302_v0  ;;  %vm8691_vm14 = vcmp.eq.s32.totalorder %v8641_v16, %v6842_v48  ;;  %v4415_v34 = vpop.f32.mrf.mxu1  ;;  %v4381_v16 = vadd.f32 %v4380_v62, %v4379_v17 }
 0x142   :  { %4852 = vmatpush3.msra.mxu0 %v8686_v21  ;;  %4878 = vmatprep.subr.msk.mxu1 %vm8687_vm15, %v8302_v0  ;;  %vm8693_vm15 = vcmp.eq.s32.totalorder %v8643_v47, %v6842_v48  ;;  %v494_v45 = vadd.f32 %v4346_v36, %v4311_v33  ;;  %v4416_v47 = vadd.f32 %v4415_v34, %v4414_v12 }
 0x143   :  { %4853 = vmatprep.subr.mxu0 %v8688_v37  ;;  %4879 = vmatpush3.msk.msra.mxu1 %vm8689_vm13, %v8302_v0  ;;  %vm8695_vm13 = vcmp.eq.s32.totalorder %v8645_v44, %v6842_v48  ;;  %v4449_v2 = vpop.f32.mrf.mxu0 }
 0x144   :  { %4854 = vmatpush3.msra.mxu0 %v8690_v14  ;;  %4880 = vmatprep.subr.msk.mxu1 %vm8691_vm14, %v8302_v0  ;;  %vm8706_vm14 = vcmp.eq.s32.totalorder %v8319_v35, %v6842_v48  ;;  %v8711_v35 = vld [vmem:[#allocation9_spill] sm:$0xff] }
 0x145   :  { %4855 = vmatprep.subr.mxu0 %v8692_v42  ;;  %4881 = vmatpush3.msk.msra.mxu1 %vm8693_vm15, %v8302_v0  ;;  %v4450_v43 = vpop.f32.mrf.mxu0  ;;  %vm8708_vm15 = vcmp.eq.s32.totalorder %v8321_v6, %v6842_v48  ;;  %v8712_v44 = vand.u32 4294901760, %v8711_v35  ;;  %v8714_v6 = vand.u32 4294901760, %v8713_v19 }
 0x146   :  { %4856 = vmatpush3.msra.mxu0 %v8694_v22  ;;  %4882 = vmatprep.subr.msk.mxu1 %vm8695_vm13, %v8302_v0  ;;  %v4451_v39 = vadd.f32 %v4450_v43, %v4449_v2 }
 0x147   :  { %4857 = vmatprep.subr.mxu0 %v8696_v41  ;;  %4883 = vmatpush3.msk.msra.mxu1 %vm1991_vm6, %v8302_v0  ;;  %vm8700_vm6 = vcmp.eq.s32.totalorder %v8313_v40, %v6842_v48  ;;  %v8705_v40 = vand.u32 4294901760, %v7459_v63 }
 0x148   :  { %4858 = vmatpush3.msra.mxu0 %v8697_v3  ;;  %4884 = vmatprep.subr.msk.mxu1 %vm2006_vm4, %v8302_v0  ;;  %vm8702_vm4 = vcmp.eq.s32.totalorder %v8315_v26, %v6842_v48  ;;  %v8707_v26 = vand.u32 4294901760, %v7500_v8  ;;  %v632_v8 = vadd.f32 %v4381_v16, %v494_v45 }
 0x149   :  { %4859 = vmatprep.subr.mxu0 %v8698_v50  ;;  %4885 = vmatpush3.msk.msra.mxu1 %vm1990_vm9, %v8302_v0  ;;  %vm8704_vm9 = vcmp.eq.s32.totalorder %v8317_v27, %v6842_v48  ;;  %v8709_v27 = vand.u32 4294901760, %v7514_v54  ;;  %v8715_v54 = vand.u32 4294901760, %v7548_v10 }
 0x14a   :  { %4860 = vmatpush3.msra.mxu0 %v8699_v49  ;;  %4886 = vmatprep.subr.msk.mxu1 %vm8700_vm6, %v8302_v0  ;;  %v740_v57 = vadd.f32 %v4416_v47, %v632_v8 }
 0x14b   :  { %4861 = vmatprep.subr.mxu0 %v8701_v52  ;;  %4887 = vmatpush3.msk.msra.mxu1 %vm8702_vm4, %v8302_v0 }
 0x14c   :  { %4862 = vmatpush3.msra.mxu0 %v8703_v24  ;;  %4888 = vmatprep.subr.msk.mxu1 %vm8704_vm9, %v8302_v0  ;;  %v908_v10 = vadd.f32 %v4451_v39, %v740_v57 }
 0x14d   :  { %4863 = vmatprep.subr.mxu0 %v8705_v40  ;;  %4889 = vmatpush3.msk.msra.mxu1 %vm8706_vm14, %v8302_v0  ;;  %v4484_v18 = vpop.f32.mrf.mxu1 }
 0x14e   :  { %4864 = vmatpush3.msra.mxu0 %v8707_v26  ;;  %4890 = vmatprep.subr.msk.mxu1 %vm8708_vm15, %v8302_v0 }
 0x14f   :  { %4865 = vmatprep.subr.mxu0 %v8709_v27  ;;  %4891 = vmatpush3.msk.msra.mxu1 %vm1987_vm5, %v8302_v0  ;;  %v4485_v13 = vpop.f32.mrf.mxu1  ;;  %vm2951_vm5 = vcmask 7168  }
 0x150   :  { %4866 = vmatpush3.msra.mxu0 %v8712_v44  ;;  %4892 = vmatprep.subr.msk.mxu1 %vm2002_vm0, %v8302_v0  ;;  %v4486_v61 = vadd.f32 %v4485_v13, %v4484_v18  ;;  %vm8719_vm0 = vcmp.eq.s32.totalorder %v8352_v30, %v6842_v48 }
 0x151   :  { %4867 = vmatprep.subr.mxu0 %v8714_v6  ;;  %4893 = vmatpush3.msk.msra.mxu1 %vm1986_vm10, %v8302_v0 }
 0x152   :  { %4868 = vmatpush3.msra.mxu0 %v8715_v54  ;;  %2828 = vmatprep.mubr.f32.mxu0 %v8716_v28  ;;  %v1012_v31 = vadd.f32 %v4486_v61, %v908_v10 }
 0x153   :  { %4894 = vmatprep.subr.msk.mxu1 %vm2001_vm3, %v8302_v0  ;;  %2830 = vmatmul.mubr.f32.vlgmr.msra.gmra.mxu0 %v8717_v53  ;;  %vm8721_vm3 = vcmp.eq.s32.totalorder %v8669_v1, %v6842_v48 }
 0x154   :  { %4895 = vmatpush3.msk.msra.mxu1 %vm1985_vm7, %v8302_v0  ;;  %2932 = vmatprep.mubr.f32.mxu1 %v8716_v28  ;;  %v3409_v4 = vmul.f32 %v1012_v31, %v1012_v31  ;;  %v3029_v24 = vand.u32 4294901760, %v1012_v31 }
 0x155   :  { %4896 = vmatprep.subr.msk.mxu1 %vm2000_vm8, %v8302_v0  ;;  %4931 = vmatprep.subr.mxu0 %v8718_v9  ;;  %vm8720_vm8 = vcmp.eq.s32.totalorder %v8666_v23, %v6842_v48 }
 0x156   :  { %4897 = vmatpush3.msk.msra.mxu1 %vm1984_vm12, %v8302_v0  ;;  %3410 = vadd.xlane.f32.xlu1 %v3409_v4  ;;  %v3030_v45 = vsub.f32 %v1012_v31, %v3029_v24 }
 0x157   :  { %4898 = vmatprep.subr.msk.mxu1 %vm1999_vm2, %v8302_v0  ;;  %vm3866_vm2 = vcmask 64512  }
 0x158   :  { %4899 = vmatpush3.msk.msra.mxu1 %vm1983_vm11, %v8302_v0  ;;  %vm5016_vm11 = vmmov 0   ;;  %v3031_v8 = vand.u32 4294901760, %v3030_v45 }
 0x159   :  { %4900 = vmatprep.subr.msk.mxu1 %vm1998_vm1, %v8302_v0  ;;  %4933 = vmatprep.mubr.msk.f32.mxu0 %vm5016_vm11, %v8718_v9 }
 0x15a   :  { %4901 = vmatpush3.msk.msra.mxu1 %vm8719_vm0, %v8302_v0  ;;  %v3032_v54 = vsub.f32 %v3030_v45, %v3031_v8 }
 0x15b   :  { %4902 = vmatprep.subr.msk.mxu1 %vm8720_vm8, %v8302_v0 }
 0x15c   :  { %4903 = vmatpush3.msk.msra.mxu1 %vm8721_vm3, %v8302_v0 }
 0x15d   :  { %2934 = vmatmul.mubr.f32.vlgmr.msra.gmra.mxu1 %v8717_v53  ;;  %4936 = vmatprep.subr.mxu1 %v8718_v9  ;;  %v3033_v53 = vand.u32 4294901760, %v3032_v54 }
 0x15e   :  { %4938 = vmatprep.mubr.msk.f32.mxu1 %vm5016_vm11, %v8718_v9 }
 0x168   :  { %v4519_v7 = vpop.f32.mrf.mxu0 }
 0x16a   :  { %v4520_v5 = vpop.f32.mrf.mxu0 }
 0x16b   :  { %v4521_v46 = vadd.f32 %v4520_v5, %v4519_v7 }
 0x172   :  { %v4554_v60 = vpop.f32.mrf.mxu1 }
 0x174   :  { %v4555_v56 = vpop.f32.mrf.mxu1 }
 0x175   :  { %v4556_v29 = vadd.f32 %v4555_v56, %v4554_v60 }
 0x177   :  { %v1456_v25 = vadd.f32 %v4556_v29, %v4521_v46 }
 0x18a   :  { %v4589_v30 = vpop.f32.mrf.mxu0 }
 0x18c   :  { %v4590_v23 = vpop.f32.mrf.mxu0 }
 0x18d   :  { %v4591_v55 = vadd.f32 %v4590_v23, %v4589_v30 }
 0x18f   :  { %v1594_v20 = vadd.f32 %v4591_v55, %v1456_v25 }
 0x194   :  { %v4624_v59 = vpop.f32.mrf.mxu1 }
 0x196   :  { %v4625_v58 = vpop.f32.mrf.mxu1 }
 0x197   :  { %v4626_v32 = vadd.f32 %v4625_v58, %v4624_v59 }
 0x199   :  { %v1702_v21 = vadd.f32 %v4626_v32, %v1594_v20 }
 0x1ac   :  { %v4659_v48 = vpop.f32.mrf.mxu0 }
 0x1ae   :  { %v4660_v51 = vpop.f32.mrf.mxu0 }
 0x1af   :  { %v4661_v15 = vadd.f32 %v4660_v51, %v4659_v48 }
 0x1b1   :  { %v1870_v17 = vadd.f32 %v4661_v15, %v1702_v21 }
 0x1b6   :  { %v4694_v11 = vpop.f32.mrf.mxu1 }
 0x1b8   :  { %v4695_v37 = vpop.f32.mrf.mxu1 }
 0x1b9   :  { %v4696_v14 = vadd.f32 %v4695_v37, %v4694_v11 }
 0x1bb   :  { %v1974_v42 = vadd.f32 %v4696_v14, %v1870_v17 }
 0x1bd   :  { %v2939_v38 = vsub.f32 %v1012_v31, %v1974_v42 }
 0x1bf   :  { %v2940_v22 = vmul.f32 %v2939_v38, %v2939_v38 }
 0x1c1   :  { %2941 = vadd.xlane.f32.xlu0 %v2940_v22 }
 0x1d0   :  { %v4729_v41 = vpop.f32.mrf.mxu0 }
 0x1d2   :  { %v4730_v12 = vpop.f32.mrf.mxu0 }
 0x1d3   :  { %v4731_v52 = vadd.f32 %v4730_v12, %v4729_v41 }
 0x1da   :  { %v4764_v62 = vpop.f32.mrf.mxu1 }
 0x1dc   :  { %v4765_v50 = vpop.f32.mrf.mxu1 }
 0x1dd   :  { %v4766_v34 = vadd.f32 %v4765_v50, %v4764_v62 }
 0x1df   :  { %v2418_v26 = vadd.f32 %v4766_v34, %v4731_v52 }
 0x1f1   :  { %v4799_v3 = vpop.f32.mrf.mxu0 }
 0x1f3   :  { %v4800_v49 = vpop.f32.mrf.mxu0 }
 0x1f4   :  { %v4801_v16 = vadd.f32 %v4800_v49, %v4799_v3 }
 0x1f6   :  { %v2556_v47 = vadd.f32 %v4801_v16, %v2418_v26 }
 0x1fb   :  { %v4834_v2 = vpop.f32.mrf.mxu1 }
 0x1fd   :  { %v4835_v33 = vpop.f32.mrf.mxu1 }
 0x1fe   :  { %v4836_v43 = vadd.f32 %v4835_v33, %v4834_v2 }
 0x200   :  { %v2664_v35 = vadd.f32 %v4836_v43, %v2556_v47 }
 0x213   :  { %v4869_v36 = vpop.f32.mrf.mxu0 }
 0x215   :  { %v4870_v40 = vpop.f32.mrf.mxu0 }
 0x216   :  { %v4871_v27 = vadd.f32 %v4870_v40, %v4869_v36 }
 0x218   :  { %v2832_v19 = vadd.f32 %v4871_v27, %v2664_v35 }
 0x21d   :  { %v4904_v63 = vpop.f32.mrf.mxu1 }
 0x21f   :  { %v4905_v44 = vpop.f32.mrf.mxu1 }
 0x220   :  { %v4906_v6 = vadd.f32 %v4905_v44, %v4904_v63 }
 0x222   :  { %v2936_v39 = vadd.f32 %v4906_v6, %v2832_v19 }
 0x224   :  { %v2994_v18 = vand.u32 4294901760, %v2936_v39  ;;  %v3412_v57 = vmul.f32 %v2936_v39, %v2936_v39 }
 0x226   :  { %v3071_v28 = vsub.f32 %v2936_v39, %v2994_v18  ;;  %4932 = vmatpush3.xpose.msra.mxu0 %v2994_v18  ;;  %v3444_v10 = vand.u32 4294901760, %v3412_v57  ;;  %v8722_v39 = vsub.s32 0, %v8669_v1 }
 0x227   :  { %4941 = vmatprep.subr.mxu0 %v8718_v9 }
 0x228   :  { %v3072_v13 = vand.u32 4294901760, %v3071_v28  ;;  %v3516_v4 = vsub.f32 %v3412_v57, %v3444_v10 }
 0x229   :  { %4934 = vmatmul.mubr.f32.vlgmr.msra.gmra.mxu0 %v3033_v53 }
 0x22a   :  { %4942 = vmatpush3.xpose.msra.mxu0 %v3071_v28  ;;  %4943 = vmatprep.mubr.msk.f32.mxu0 %vm5016_vm11, %v8718_v9  ;;  %v3073_v61 = vsub.f32 %v3071_v28, %v3072_v13  ;;  %v3517_v7 = vand.u32 4294901760, %v3516_v4 }
 0x22b   :  { %4951 = vmatprep.subr.mxu0 %v8718_v9 }
 0x22c   :  { %v3074_v31 = vand.u32 4294901760, %v3073_v61  ;;  %v3518_v5 = vsub.f32 %v3516_v4, %v3517_v7 }
 0x22d   :  { %4944 = vmatmul.mubr.f32.vlgmr.msra.gmra.mxu0 %v3030_v45 }
 0x22e   :  { %4937 = vmatpush3.xpose.msra.mxu1 %v3074_v31  ;;  %4952 = vmatpush3.xpose.msra.mxu0 %v3072_v13  ;;  %v3519_v60 = vand.u32 4294901760, %v3518_v5 }
 0x22f   :  { %4953 = vmatprep.mubr.msk.f32.mxu0 %vm5016_vm11, %v8718_v9  ;;  %4946 = vmatprep.subr.mxu1 %v8718_v9 }
 0x230   :  { %4961 = vmatprep.subr.mxu0 %v8718_v9 }
 0x231   :  { %4939 = vmatmul.mubr.f32.vlgmr.msra.gmra.mxu1 %v3029_v24  ;;  %4954 = vmatmul.mubr.f32.vlgmr.msra.gmra.mxu0 %v3029_v24 }
 0x232   :  { %4947 = vmatpush3.xpose.msra.mxu1 %v2994_v18  ;;  %4962 = vmatpush3.xpose.msra.mxu0 %v3444_v10 }
 0x233   :  { %4948 = vmatprep.mubr.msk.f32.mxu1 %vm5016_vm11, %v8718_v9  ;;  %4956 = vmatprep.subr.mxu1 %v8718_v9 }
 0x234   :  { %4963 = vmatprep.mubr.msk.f32.mxu0 %vm5016_vm11, %v8718_v9  ;;  %4971 = vmatprep.subr.mxu0 %v8718_v9 }
 0x235   :  { %4949 = vmatmul.mubr.f32.vlgmr.msra.gmra.mxu1 %v3031_v8  ;;  %4964 = vmatmul.mubr.f32.vlgmr.msra.gmra.mxu0 %v8718_v9 }
 0x236   :  { %4957 = vmatpush3.xpose.msra.mxu1 %v2994_v18  ;;  %4972 = vmatpush3.xpose.msra.mxu0 %v3516_v4  ;;  %v3411_v18 = vpop.xlane.xlu1 %3410 }
 0x237   :  { %4958 = vmatprep.mubr.msk.f32.mxu1 %vm5016_vm11, %v8718_v9  ;;  %4966 = vmatprep.subr.mxu1 %v8718_v9 }
 0x238   :  { %4973 = vmatprep.mubr.msk.f32.mxu0 %vm5016_vm11, %v8718_v9  ;;  %4981 = vmatprep.subr.mxu0 %v8718_v9 }
 0x239   :  { %4959 = vmatmul.mubr.f32.vlgmr.msra.gmra.mxu1 %v3029_v24  ;;  %4974 = vmatmul.mubr.f32.vlgmr.msra.gmra.mxu0 %v8718_v9 }
 0x23a   :  { %4967 = vmatpush3.xpose.msra.mxu1 %v3519_v60  ;;  %4982 = vmatpush3.xpose.msra.mxu0 %v3517_v7 }
 0x23b   :  { %4968 = vmatprep.mubr.msk.f32.mxu1 %vm5016_vm11, %v8718_v9  ;;  %4976 = vmatprep.subr.mxu1 %v8718_v9 }
 0x23c   :  { %4983 = vmatprep.mubr.msk.f32.mxu0 %vm5016_vm11, %v8718_v9 }
 0x23d   :  { %4969 = vmatmul.mubr.f32.vlgmr.msra.gmra.mxu1 %v8302_v0  ;;  %4984 = vmatmul.mubr.f32.vlgmr.msra.gmra.mxu0 %v8302_v0 }
 0x23e   :  { %4977 = vmatpush3.xpose.msra.mxu1 %v3444_v10  ;;  %4978 = vmatprep.mubr.msk.f32.mxu1 %vm5016_vm11, %v8718_v9 }
 0x23f   :  { %4986 = vmatprep.subr.mxu1 %v8718_v9 }
 0x241   :  { %4979 = vmatmul.mubr.f32.vlgmr.msra.gmra.mxu1 %v8718_v9 }
 0x242   :  { %4987 = vmatpush3.xpose.msra.mxu1 %v3444_v10  ;;  %4988 = vmatprep.mubr.msk.f32.mxu1 %vm5016_vm11, %v8718_v9 }
 0x245   :  { %4989 = vmatmul.mubr.f32.vlgmr.msra.gmra.mxu1 %v8302_v0 }
 0x24a   :  { %v2942_v30 = vpop.xlane.xlu0 %2941 }
 0x24b   :  { %v2943_v56 = vadd.f32 1e-07, %v2942_v30 }
 0x24d   :  { %4999 = vrsqrt.f32 %v2943_v56  ;;  %vm2946_vm1 = vcmp.eq.f32.partialorder %v2943_v56, inf  ;;  %v2949_v48 = vand.u32 2147483648, %v2943_v56  ;;  %vm2948_vm10 = vcmp.eq.f32.partialorder %v2943_v56, 0.0 }
 0x25a   :  { %v5000_v23 = vpop.eup %4999 }
 0x25b   :  { %v2945_v59 = vmul.f32 %v5000_v23, %v2943_v56 }
 0x25d   :  { %v2947_v29 = vsel %vm2946_vm1, %v2943_v56, %v2945_v59 }
 0x25e   :  { %v2950_v58 = vsel %vm2948_vm10, %v2949_v48, %v2947_v29 }
 0x25f   :  { %v2952_v46 = vsel %vm2951_vm5, %v2950_v58, 0.0 }
 0x260   :  { %2953 = vadd.xlane.f32.xlu0 %v2952_v46 }
 0x2e9   :  { %v3035_v55 = vpop.f32.mrf.mxu0  ;;  %v2954_v25 = vpop.xlane.xlu0 %2953 }
 0x2ea   :  { %v2955_v32 = vrot.slane %v2954_v25, 4 }
 0x2eb   :  { %v4935_v51 = vpop.f32.mrf.mxu0 }
 0x2ec   :  { %v2956_v20 = vadd.f32 %v2955_v32, %v2954_v25 }
 0x2ed   :  { %v3185_v9 = vpop.f32.mrf.mxu0 }
 0x2ee   :  { %v2957_v15 = vrot.slane %v2956_v20, 2 }
 0x2ef   :  { %v4945_v0 = vpop.f32.mrf.mxu0 }
 0x2f0   :  { %v2958_v37 = vadd.f32 %v2957_v15, %v2956_v20 }
 0x2f1   :  { %v3111_v11 = vpop.f32.mrf.mxu1  ;;  %v3333_v21 = vpop.f32.mrf.mxu0 }
 0x2f2   :  { %v2959_v42 = vrot.slane %v2958_v37, 1  ;;  %v3112_v41 = vadd.f32 %v3111_v11, %v3035_v55 }
 0x2f3   :  { %v4940_v17 = vpop.f32.mrf.mxu1  ;;  %v4955_v14 = vpop.f32.mrf.mxu0 }
 0x2f4   :  { %v2960_v62 = vadd.f32 %v2959_v42, %v2958_v37  ;;  %v3186_v2 = vadd.f32 %v3185_v9, %v3112_v41 }
 0x2f5   :  { %v3259_v38 = vpop.f32.mrf.mxu1  ;;  %v3480_v22 = vpop.f32.mrf.mxu0 }
 0x2f6   :  { %4991 = vpush %v2960_v62  ;;  %v3260_v33 = vadd.f32 %v3259_v38, %v3186_v2 }
 0x2f7   :  { %v4950_v12 = vpop.f32.mrf.mxu1  ;;  %v4965_v3 = vpop.f32.mrf.mxu0 }
 0x2f8   :  { %v3334_v47 = vadd.f32 %v3333_v21, %v3260_v33 }
 0x2f9   :  { %v3405_v50 = vpop.f32.mrf.mxu1  ;;  %v3627_v49 = vpop.f32.mrf.mxu0 }
 0x2fa   :  { %v3406_v8 = vadd.f32 %v3405_v50, %v3334_v47 }
 0x2fb   :  { %v4960_v36 = vpop.f32.mrf.mxu1  ;;  %v4975_v52 = vpop.f32.mrf.mxu0 }
 0x2fc   :  { %v3851_v57 = vmul.f32 2.0, %v3406_v8 }
 0x2fd   :  { %v3555_v34 = vpop.f32.mrf.mxu1  ;;  %v3771_v24 = vpop.f32.mrf.mxu0 }
 0x2fe   :  { %v3556_v16 = vadd.f32 %v3555_v34, %v3480_v22 }
 0x2ff   :  { %v4970_v40 = vpop.f32.mrf.mxu1  ;;  %v4985_v26 = vpop.f32.mrf.mxu0 }
 0x300   :  { %v3628_v43 = vadd.f32 %v3627_v49, %v3556_v16 }
 0x301   :  { %v3698_v45 = vpop.f32.mrf.mxu1 }
 0x302   :  { %v3699_v27 = vadd.f32 %v3698_v45, %v3628_v43 }
 0x303   :  { %v4980_v63 = vpop.f32.mrf.mxu1 }
 0x304   :  { %v3772_v35 = vadd.f32 %v3771_v24, %v3699_v27 }
 0x305   :  { %v3842_v44 = vpop.f32.mrf.mxu1 }
 0x306   :  { %v3843_v19 = vadd.f32 %v3842_v44, %v3772_v35 }
 0x307   :  { %v4990_v6 = vpop.f32.mrf.mxu1 }
 0x308   :  { %v3849_v54 = vrot.slane %v3843_v19, %v8722_v39 }
 0x30a   :  { %v3850_v28 = vadd.f32 %v3849_v54, %v3411_v18 }
 0x30c   :  { %v3852_v53 = vsub.f32 %v3850_v28, %v3851_v57 }
 0x30e   :  { %v3853_v13 = vmax.f32 %v3852_v53, 0.0 }
 0x310   :  { %v3854_v10 = vadd.f32 1e-07, %v3853_v13 }
 0x312   :  { %5001 = vrsqrt.f32 %v3854_v10  ;;  %vm3857_vm7 = vcmp.eq.f32.partialorder %v3854_v10, inf  ;;  %v3860_v7 = vand.u32 2147483648, %v3854_v10  ;;  %vm3859_vm12 = vcmp.eq.f32.partialorder %v3854_v10, 0.0 }
 0x31f   :  { %v5002_v61 = vpop.eup %5001 }
 0x320   :  { %v3856_v31 = vmul.f32 %v5002_v61, %v3854_v10 }
 0x322   :  { %v3858_v4 = vsel %vm3857_vm7, %v3854_v10, %v3856_v31 }
 0x323   :  { %v3861_v5 = vsel %vm3859_vm12, %v3860_v7, %v3858_v4 }
 0x327   :  { %s4992_s2 = spop %4991 }
 0x328   :  { %s2962_s22 = smul.f32 0.125, %s4992_s2 }
 0x32a   :  { %s3862_s23 = sadd.f32 25.0, %s2962_s22 }
 0x32c   :  { %v3863_v60 = vstv %s3862_s23 }
 0x32d   :  { %v3864_v1 = vsub.f32 %v3863_v60, %v3861_v5 }
 0x32f   :  { %v3865_v30 = vmax.f32 %v3864_v1, 0.0 }
 0x331   :  { %v3867_v56 = vsel %vm3866_vm2, %v3865_v30, 0.0 }
 0x332   :  { %3868 = vadd.xlane.f32.xlu1 %v3867_v56 }
 0x3bb   :  { %v3869_v23 = vpop.xlane.xlu1 %3868 }
 0x3bc   :  { %v3870_v59 = vrot.slane %v3869_v23, 4 }
 0x3be   :  { %v3871_v48 = vadd.f32 %v3870_v59, %v3869_v23 }
 0x3c0   :  { %v3872_v29 = vrot.slane %v3871_v48, 2 }
 0x3c2   :  { %v3873_v58 = vadd.f32 %v3872_v29, %v3871_v48 }
 0x3c4   :  { %v3874_v46 = vrot.slane %v3873_v58, 1 }
 0x3c6   :  { %v3875_v55 = vadd.f32 %v3874_v46, %v3873_v58 }
 0x3c8   :  { %4993 = vpush %v3875_v55 }
 0x3f9   :  { %s4994_s24 = spop %4993 }
 0x3fa   :  { %s3877_s25 = smul.f32 0.015625, %s4994_s24 }
 0x3fc   :  { %3879 = sst [smem:[#allocation2]] %s3877_s25 }
 0x3fd   :  { %3887 = dma.smem_to_hbm %s5017_s26, 16, %s8020_s3, [#allocation3]  }
 0x3fe   :  { %5012 = dma.done.wait [#allocation3], 16  }
 0x3ff   :  { %5013 = vsyncadd [#allocation3], 4294967280 }
 0x400   :  { %3891 = sfence }
 0x401   :  { %3892 = vsyncpa [#allocation3], 1 }

</bundles_post_ra>
